<compile_context>
chip_gen: v7x
topology: tpu7x:2x2x1
jax: 0.10.0
libtpu: 0.0.40
codegen_flags: <defaults>
</compile_context>

<pallas_src>
import functools

import jax
import jax.numpy as jnp
from jax.experimental import pallas as pl
from jax.experimental.pallas import tpu as pltpu

LN_EPS = 1e-5  # PyTorch nn.LayerNorm default

# --- packed small-parameter slab layout (architecture-fixed widths) -----------
# Each entry: (name, slice_width).  Segments start on 128-lane boundaries.
_VEC_SEGS = (
    ("b1", 16), ("g1", 16), ("be1", 16),
    ("b2", 32), ("g2", 32), ("be2", 32), ("ba", 32),
    ("bo1", 512), ("go1", 512), ("beo1", 512),
    ("bo2", 512), ("go2", 512), ("beo2", 512),
    ("bo3", 128),               # final bias, zero-padded to the 128-lane output
)
_VEC_OFF = {}
_off = 0
for _name, _w in _VEC_SEGS:
    _VEC_OFF[_name] = (_off, _w)
    _off += -(-_w // 128) * 128
_VEC_TOTAL = _off               # 4096 lanes, 16 KiB f32


def _layernorm(x, gamma, beta):
    # Two-pass variance (matches torch.nn.LayerNorm, biased); rsqrt -> EUP slot.
    mu = jnp.mean(x, axis=-1, keepdims=True)
    d = x - mu
    var = jnp.mean(d * d, axis=-1, keepdims=True)
    return d * jax.lax.rsqrt(var + LN_EPS) * gamma + beta


def critic_kernel(state_ref, action_ref,
                  w1_ref, w2_ref, wa_ref, wo1_ref, wo2_ref, wo3_ref,
                  vec_ref, out_ref):
    def vec(name):
        o, w = _VEC_OFF[name]
        return vec_ref[:, o:o + w]            # [1, w] f32, 128-aligned start

    # ---- state branch ----
    s = state_ref[...].astype(jnp.bfloat16)
    h = jnp.dot(s, w1_ref[...], preferred_element_type=jnp.float32) + vec("b1")
    h = jnp.maximum(h, 0.0)
    h = _layernorm(h, vec("g1"), vec("be1"))
    h = (jnp.dot(h.astype(jnp.bfloat16), w2_ref[...],
                 preferred_element_type=jnp.float32) + vec("b2"))
    h = jnp.maximum(h, 0.0)
    h = _layernorm(h, vec("g2"), vec("be2"))                 # [TB, 32] f32

    # ---- action branch ----
    a = action_ref[...].astype(jnp.bfloat16)
    ah = jnp.dot(a, wa_ref[...], preferred_element_type=jnp.float32) + vec("ba")
    ah = jnp.maximum(ah, 0.0)                                # [TB, 32] f32

    # ---- head: concat-free split-K matmul against the resident [64,512] wo1 ----
    hb = h.astype(jnp.bfloat16)
    ab = ah.astype(jnp.bfloat16)
    x = (jnp.dot(hb, wo1_ref[0:32, :], preferred_element_type=jnp.float32)
         + jnp.dot(ab, wo1_ref[32:64, :], preferred_element_type=jnp.float32)
         + vec("bo1"))
    x = jnp.maximum(x, 0.0)
    x = _layernorm(x, vec("go1"), vec("beo1"))               # [TB, 512]
    x = (jnp.dot(x.astype(jnp.bfloat16), wo2_ref[...],
                 preferred_element_type=jnp.float32) + vec("bo2"))
    x = jnp.maximum(x, 0.0)
    x = _layernorm(x, vec("go2"), vec("beo2"))               # [TB, 512]

    # Lane-dense final matmul: wo3 zero-padded to [512,128]; only column 0 is real.
    q = (jnp.dot(x.astype(jnp.bfloat16), wo3_ref[...],
                 preferred_element_type=jnp.float32) + vec("bo3"))
    out_ref[...] = q.astype(out_ref.dtype)                   # [TB, 128]


def _pack_vectors(vals):
    """Pack [1,w] params into one lane-aligned [1, _VEC_TOTAL] f32 slab."""
    parts = []
    for name, w in _VEC_SEGS:
        seg = -(-w // 128) * 128
        v = vals[name].reshape(1, -1).astype(jnp.float32)
        parts.append(jnp.pad(v, ((0, 0), (0, seg - v.shape[1]))))
    return jnp.concatenate(parts, axis=1)


@functools.partial(jax.jit, static_argnames=("tb",))
def critic_forward(state, action, params, *, tb=512):
    """state: [B, state_dim], action: [B, subgoal_dim] -> [B, 1] (f32)."""
    (w1, b1, g1, be1, w2, b2, g2, be2, wa, ba,
     wo1, bo1, go1, beo1, wo2, bo2, go2, beo2, wo3, bo3) = params

    B, state_dim = state.shape
    subgoal_dim = action.shape[1]

    # --- host-side weight re-layout (fused into the surrounding XLA graph) ---
    # bf16 matmul operands (MXU-native); biases / LN params stay f32.
    w1b = w1.astype(jnp.bfloat16)
    w2b = w2.astype(jnp.bfloat16)
    wab = wa.astype(jnp.bfloat16)
    wo1b = wo1.astype(jnp.bfloat16)                             # [64, 512]
    wo2b = wo2.astype(jnp.bfloat16)                             # [512, 512]
    wo3b = jnp.pad(wo3, ((0, 0), (0, 128 - wo3.shape[1]))).astype(jnp.bfloat16)
    vec_slab = _pack_vectors(dict(
        b1=b1, g1=g1, be1=be1, b2=b2, g2=g2, be2=be2, ba=ba,
        bo1=bo1, go1=go1, beo1=beo1, bo2=bo2, go2=go2, beo2=beo2, bo3=bo3))

    # --- batch tiling: amortize per-step overhead, fill the 256-row MXU, and
    # keep >=2 tiles when the batch spans more than one 128-row tile so both
    # v7x TensorCores receive work (dimension_semantics=("parallel",)). ---
    b128 = pl.cdiv(B, 128) * 128
    n_tiles = max(1, pl.cdiv(b128, tb))
    if b128 > 128 and n_tiles == 1:
        n_tiles = 2
    tb_eff = pl.cdiv(pl.cdiv(B, n_tiles), 128) * 128
    Bp = n_tiles * tb_eff
    if Bp != B:
        # Padded rows are benign (LN eps keeps them finite); sliced away below.
        state = jnp.pad(state, ((0, Bp - B), (0, 0)))
        action = jnp.pad(action, ((0, Bp - B), (0, 0)))

    weights = (w1b, w2b, wab, wo1b, wo2b, wo3b, vec_slab)

    def batch_spec(ncols):
        return pl.BlockSpec((tb_eff, ncols), lambda i: (i, 0))

    def resident_spec(arr):
        # Full-array block, constant index_map -> DMA'd once, VMEM-resident.
        return pl.BlockSpec(arr.shape, lambda i: (0, 0))

    in_specs = ([batch_spec(state_dim), batch_spec(subgoal_dim)]
                + [resident_spec(w) for w in weights])
    out_spec = pl.BlockSpec((tb_eff, 128), lambda i: (i, 0))

    # Advisory cost hint for XLA scheduling around the custom call.
    flops = 2 * Bp * (state_dim * 16 + 16 * 32 + subgoal_dim * 32
                      + 32 * 512 + 32 * 512 + 512 * 512 + 512 * 128)
    weight_bytes = sum(int(w.size) * w.dtype.itemsize for w in weights)
    bytes_accessed = ((int(state.size) + int(action.size) + Bp * 128) * 4
                      + weight_bytes)

    q_full = pl.pallas_call(
        critic_kernel,
        out_shape=jax.ShapeDtypeStruct((Bp, 128), jnp.float32),
        grid=(n_tiles,),
        in_specs=in_specs,
        out_specs=out_spec,
        compiler_params=pltpu.CompilerParams(
            dimension_semantics=("parallel",),     # shard batch tiles across TCs (v7x)
            vmem_limit_bytes=32 * 1024 * 1024,     # plenty for TB<=1024; safe on v5e/v6e/v7x
        ),
        cost_estimate=pl.CostEstimate(
            flops=flops,
            transcendentals=4 * Bp,
            bytes_accessed=int(bytes_accessed),
        ),
    )(state, action, *weights)

    return q_full[:B, :1]


def init_params(key, state_dim, subgoal_dim):
    """Deterministic init mimicking PyTorch Linear default (U[-1/sqrt(fan_in), ...])."""
    def linear(key, fan_in, fan_out):
        kw, kb = jax.random.split(key)
        bound = 1.0 / jnp.sqrt(fan_in)
        w = jax.random.uniform(kw, (fan_in, fan_out), jnp.float32, -bound, bound)
        b = jax.random.uniform(kb, (1, fan_out), jnp.float32, -bound, bound)
        return w, b

    keys = jax.random.split(key, 6)
    w1, b1 = linear(keys[0], state_dim, 16)
    g1, be1 = jnp.ones((1, 16), jnp.float32), jnp.zeros((1, 16), jnp.float32)
    w2, b2 = linear(keys[1], 16, 32)
    g2, be2 = jnp.ones((1, 32), jnp.float32), jnp.zeros((1, 32), jnp.float32)
    wa, ba = linear(keys[2], subgoal_dim, 32)
    wo1, bo1 = linear(keys[3], 64, 512)
    go1, beo1 = jnp.ones((1, 512), jnp.float32), jnp.zeros((1, 512), jnp.float32)
    wo2, bo2 = linear(keys[4], 512, 512)
    go2, beo2 = jnp.ones((1, 512), jnp.float32), jnp.zeros((1, 512), jnp.float32)
    wo3, bo3 = linear(keys[5], 512, 1)
    return (w1, b1, g1, be1, w2, b2, g2, be2, wa, ba,
            wo1, bo1, go1, beo1, wo2, bo2, go2, beo2, wo3, bo3)


def critic_reference(state, action, params):
    """Pure-JAX f32 reference (matches the PyTorch module literally)."""
    (w1, b1, g1, be1, w2, b2, g2, be2, wa, ba,
     wo1, bo1, go1, beo1, wo2, bo2, go2, beo2, wo3, bo3) = params

    def ln(x, g, b):
        mu = jnp.mean(x, axis=-1, keepdims=True)
        var = jnp.mean((x - mu) ** 2, axis=-1, keepdims=True)
        return (x - mu) * jax.lax.rsqrt(var + LN_EPS) * g + b

    h = ln(jnp.maximum(state @ w1 + b1, 0.0), g1, be1)
    h = ln(jnp.maximum(h @ w2 + b2, 0.0), g2, be2)
    a = jnp.maximum(action @ wa + ba, 0.0)
    x = jnp.concatenate([h, a], axis=1)
    x = ln(jnp.maximum(x @ wo1 + bo1, 0.0), go1, beo1)
    x = ln(jnp.maximum(x @ wo2 + bo2, 0.0), go2, beo2)
    return x @ wo3 + bo3


if __name__ == "__main__":
    STATE_DIM = 24
    SUBGOAL_DIM = 8
    BATCH = 8

    key = jax.random.PRNGKey(0)
    k_s, k_a, k_p = jax.random.split(key, 3)

    state = jax.random.normal(k_s, (BATCH, STATE_DIM), jnp.float32)
    action = jax.random.normal(k_a, (BATCH, SUBGOAL_DIM), jnp.float32)
    params = init_params(k_p, STATE_DIM, SUBGOAL_DIM)

    q = critic_forward(state, action, params)
    q = jax.block_until_ready(q)

    q_ref = critic_reference(state, action, params)
    assert q.shape == (BATCH, 1)
    # bf16 MXU operands (f32 accumulation) -> relaxed tolerance vs. the f32 reference.
    assert jnp.allclose(q, q_ref, atol=5e-2, rtol=5e-2), (q, q_ref)

    print("KERNEL_OK")
</pallas_src>

<mosaic_0001>
module attributes {stable_mosaic.version = 11 : i64} {
  func.func @critic_kernel(%arg0: i32, %arg1: memref<128x24xf32, #tpu.memory_space<vmem>>, %arg2: memref<128x8xf32, #tpu.memory_space<vmem>>, %arg3: memref<24x16xbf16, #tpu.memory_space<vmem>>, %arg4: memref<16x32xbf16, #tpu.memory_space<vmem>>, %arg5: memref<8x32xbf16, #tpu.memory_space<vmem>>, %arg6: memref<64x512xbf16, #tpu.memory_space<vmem>>, %arg7: memref<512x512xbf16, #tpu.memory_space<vmem>>, %arg8: memref<512x128xbf16, #tpu.memory_space<vmem>>, %arg9: memref<1x4096xf32, #tpu.memory_space<vmem>>, %arg10: memref<128x128xf32, #tpu.memory_space<vmem>>) attributes {dimension_semantics = [#tpu.dimension_semantics<parallel>], iteration_bounds = array<i64: 1>, scalar_prefetch = 0 : i64, scratch_operands = 0 : i64, tpu.core_type = #tpu.core_type<tc>, window_params = [{transform_indices = @transform_0, window_bounds = array<i64: 128, 24>}, {transform_indices = @transform_1, window_bounds = array<i64: 128, 8>}, {pipeline_mode = #tpu.pipeline_mode<synchronous>, transform_indices = @transform_2, window_bounds = array<i64: 24, 16>}, {pipeline_mode = #tpu.pipeline_mode<synchronous>, transform_indices = @transform_3, window_bounds = array<i64: 16, 32>}, {pipeline_mode = #tpu.pipeline_mode<synchronous>, transform_indices = @transform_4, window_bounds = array<i64: 8, 32>}, {pipeline_mode = #tpu.pipeline_mode<synchronous>, transform_indices = @transform_5, window_bounds = array<i64: 64, 512>}, {pipeline_mode = #tpu.pipeline_mode<synchronous>, transform_indices = @transform_6, window_bounds = array<i64: 512, 512>}, {pipeline_mode = #tpu.pipeline_mode<synchronous>, transform_indices = @transform_7, window_bounds = array<i64: 512, 128>}, {pipeline_mode = #tpu.pipeline_mode<synchronous>, transform_indices = @transform_8, window_bounds = array<i64: 1, 4096>}, {transform_indices = @transform_9, window_bounds = array<i64: 128, 128>}]} {
    %c0 = arith.constant 0 : index
    %c0_0 = arith.constant 0 : index
    %0 = vector.load %arg1[%c0, %c0_0] : memref<128x24xf32, #tpu.memory_space<vmem>>, vector<128x24xf32>
    %1 = arith.truncf %0 : vector<128x24xf32> to vector<128x24xbf16>
    %c0_1 = arith.constant 0 : index
    %c0_2 = arith.constant 0 : index
    %2 = vector.load %arg3[%c0_1, %c0_2] : memref<24x16xbf16, #tpu.memory_space<vmem>>, vector<24x16xbf16>
    %cst = arith.constant dense<0.000000e+00> : vector<128x16xf32>
    %3 = tpu.matmul %1, %2, %cst {dimension_numbers = #tpu.dot_dimension_numbers<[1], [0], [0], [1], [0, 0, 1, 1], [], []>} : vector<128x24xbf16>, vector<24x16xbf16>, vector<128x16xf32> -> vector<128x16xf32>
    %c0_3 = arith.constant 0 : index
    %c0_4 = arith.constant 0 : index
    %4 = vector.load %arg9[%c0_3, %c0_4] : memref<1x4096xf32, #tpu.memory_space<vmem>>, vector<1x16xf32>
    %5 = vector.broadcast %4 : vector<1x16xf32> to vector<128x16xf32>
    %6 = arith.addf %3, %5 : vector<128x16xf32>
    %cst_5 = arith.constant 0.000000e+00 : f32
    %7 = vector.broadcast %cst_5 : f32 to vector<128x16xf32>
    %8 = arith.maximumf %6, %7 : vector<128x16xf32>
    %c0_6 = arith.constant 0 : index
    %c128 = arith.constant 128 : index
    %9 = vector.load %arg9[%c0_6, %c128] : memref<1x4096xf32, #tpu.memory_space<vmem>>, vector<1x16xf32>
    %c0_7 = arith.constant 0 : index
    %c256 = arith.constant 256 : index
    %10 = vector.load %arg9[%c0_7, %c256] : memref<1x4096xf32, #tpu.memory_space<vmem>>, vector<1x16xf32>
    %cst_8 = arith.constant dense<0.000000e+00> : vector<128xf32>
    %11 = vector.multi_reduction <add>, %8, %cst_8 [1] : vector<128x16xf32> to vector<128xf32>
    %12 = vector.shape_cast %11 : vector<128xf32> to vector<128x1xf32>
    %cst_9 = arith.constant 1.600000e+01 : f32
    %13 = vector.broadcast %cst_9 : f32 to vector<128x1xf32>
    %14 = arith.divf %12, %13 : vector<128x1xf32>
    %15 = vector.broadcast %14 : vector<128x1xf32> to vector<128x16xf32>
    %16 = arith.subf %8, %15 : vector<128x16xf32>
    %17 = arith.mulf %16, %16 : vector<128x16xf32>
    %cst_10 = arith.constant dense<0.000000e+00> : vector<128xf32>
    %18 = vector.multi_reduction <add>, %17, %cst_10 [1] : vector<128x16xf32> to vector<128xf32>
    %19 = vector.shape_cast %18 : vector<128xf32> to vector<128x1xf32>
    %cst_11 = arith.constant 1.600000e+01 : f32
    %20 = vector.broadcast %cst_11 : f32 to vector<128x1xf32>
    %21 = arith.divf %19, %20 : vector<128x1xf32>
    %cst_12 = arith.constant 9.99999974E-6 : f32
    %22 = vector.broadcast %cst_12 : f32 to vector<128x1xf32>
    %23 = arith.addf %21, %22 : vector<128x1xf32>
    %24 = math.rsqrt %23 : vector<128x1xf32>
    %25 = vector.broadcast %24 : vector<128x1xf32> to vector<128x16xf32>
    %26 = arith.mulf %16, %25 : vector<128x16xf32>
    %27 = vector.broadcast %9 : vector<1x16xf32> to vector<128x16xf32>
    %28 = arith.mulf %26, %27 : vector<128x16xf32>
    %29 = vector.broadcast %10 : vector<1x16xf32> to vector<128x16xf32>
    %30 = arith.addf %28, %29 : vector<128x16xf32>
    %31 = arith.truncf %30 : vector<128x16xf32> to vector<128x16xbf16>
    %c0_13 = arith.constant 0 : index
    %c0_14 = arith.constant 0 : index
    %32 = vector.load %arg4[%c0_13, %c0_14] : memref<16x32xbf16, #tpu.memory_space<vmem>>, vector<16x32xbf16>
    %cst_15 = arith.constant dense<0.000000e+00> : vector<128x32xf32>
    %33 = tpu.matmul %31, %32, %cst_15 {dimension_numbers = #tpu.dot_dimension_numbers<[1], [0], [0], [1], [0, 0, 1, 1], [], []>} : vector<128x16xbf16>, vector<16x32xbf16>, vector<128x32xf32> -> vector<128x32xf32>
    %c0_16 = arith.constant 0 : index
    %c384 = arith.constant 384 : index
    %34 = vector.load %arg9[%c0_16, %c384] : memref<1x4096xf32, #tpu.memory_space<vmem>>, vector<1x32xf32>
    %35 = vector.broadcast %34 : vector<1x32xf32> to vector<128x32xf32>
    %36 = arith.addf %33, %35 : vector<128x32xf32>
    %cst_17 = arith.constant 0.000000e+00 : f32
    %37 = vector.broadcast %cst_17 : f32 to vector<128x32xf32>
    %38 = arith.maximumf %36, %37 : vector<128x32xf32>
    %c0_18 = arith.constant 0 : index
    %c512 = arith.constant 512 : index
    %39 = vector.load %arg9[%c0_18, %c512] : memref<1x4096xf32, #tpu.memory_space<vmem>>, vector<1x32xf32>
    %c0_19 = arith.constant 0 : index
    %c640 = arith.constant 640 : index
    %40 = vector.load %arg9[%c0_19, %c640] : memref<1x4096xf32, #tpu.memory_space<vmem>>, vector<1x32xf32>
    %cst_20 = arith.constant dense<0.000000e+00> : vector<128xf32>
    %41 = vector.multi_reduction <add>, %38, %cst_20 [1] : vector<128x32xf32> to vector<128xf32>
    %42 = vector.shape_cast %41 : vector<128xf32> to vector<128x1xf32>
    %cst_21 = arith.constant 3.200000e+01 : f32
    %43 = vector.broadcast %cst_21 : f32 to vector<128x1xf32>
    %44 = arith.divf %42, %43 : vector<128x1xf32>
    %45 = vector.broadcast %44 : vector<128x1xf32> to vector<128x32xf32>
    %46 = arith.subf %38, %45 : vector<128x32xf32>
    %47 = arith.mulf %46, %46 : vector<128x32xf32>
    %cst_22 = arith.constant dense<0.000000e+00> : vector<128xf32>
    %48 = vector.multi_reduction <add>, %47, %cst_22 [1] : vector<128x32xf32> to vector<128xf32>
    %49 = vector.shape_cast %48 : vector<128xf32> to vector<128x1xf32>
    %cst_23 = arith.constant 3.200000e+01 : f32
    %50 = vector.broadcast %cst_23 : f32 to vector<128x1xf32>
    %51 = arith.divf %49, %50 : vector<128x1xf32>
    %cst_24 = arith.constant 9.99999974E-6 : f32
    %52 = vector.broadcast %cst_24 : f32 to vector<128x1xf32>
    %53 = arith.addf %51, %52 : vector<128x1xf32>
    %54 = math.rsqrt %53 : vector<128x1xf32>
    %55 = vector.broadcast %54 : vector<128x1xf32> to vector<128x32xf32>
    %56 = arith.mulf %46, %55 : vector<128x32xf32>
    %57 = vector.broadcast %39 : vector<1x32xf32> to vector<128x32xf32>
    %58 = arith.mulf %56, %57 : vector<128x32xf32>
    %59 = vector.broadcast %40 : vector<1x32xf32> to vector<128x32xf32>
    %60 = arith.addf %58, %59 : vector<128x32xf32>
    %c0_25 = arith.constant 0 : index
    %c0_26 = arith.constant 0 : index
    %61 = vector.load %arg2[%c0_25, %c0_26] : memref<128x8xf32, #tpu.memory_space<vmem>>, vector<128x8xf32>
    %62 = arith.truncf %61 : vector<128x8xf32> to vector<128x8xbf16>
    %c0_27 = arith.constant 0 : index
    %c0_28 = arith.constant 0 : index
    %63 = vector.load %arg5[%c0_27, %c0_28] : memref<8x32xbf16, #tpu.memory_space<vmem>>, vector<8x32xbf16>
    %cst_29 = arith.constant dense<0.000000e+00> : vector<128x32xf32>
    %64 = tpu.matmul %62, %63, %cst_29 {dimension_numbers = #tpu.dot_dimension_numbers<[1], [0], [0], [1], [0, 0, 1, 1], [], []>} : vector<128x8xbf16>, vector<8x32xbf16>, vector<128x32xf32> -> vector<128x32xf32>
    %c0_30 = arith.constant 0 : index
    %c768 = arith.constant 768 : index
    %65 = vector.load %arg9[%c0_30, %c768] : memref<1x4096xf32, #tpu.memory_space<vmem>>, vector<1x32xf32>
    %66 = vector.broadcast %65 : vector<1x32xf32> to vector<128x32xf32>
    %67 = arith.addf %64, %66 : vector<128x32xf32>
    %cst_31 = arith.constant 0.000000e+00 : f32
    %68 = vector.broadcast %cst_31 : f32 to vector<128x32xf32>
    %69 = arith.maximumf %67, %68 : vector<128x32xf32>
    %70 = arith.truncf %60 : vector<128x32xf32> to vector<128x32xbf16>
    %71 = arith.truncf %69 : vector<128x32xf32> to vector<128x32xbf16>
    %c0_32 = arith.constant 0 : index
    %c0_33 = arith.constant 0 : index
    %72 = vector.load %arg6[%c0_32, %c0_33] : memref<64x512xbf16, #tpu.memory_space<vmem>>, vector<32x512xbf16>
    %cst_34 = arith.constant dense<0.000000e+00> : vector<128x512xf32>
    %73 = tpu.matmul %70, %72, %cst_34 {dimension_numbers = #tpu.dot_dimension_numbers<[1], [0], [0], [1], [0, 0, 1, 1], [], []>} : vector<128x32xbf16>, vector<32x512xbf16>, vector<128x512xf32> -> vector<128x512xf32>
    %c32 = arith.constant 32 : index
    %c0_35 = arith.constant 0 : index
    %74 = vector.load %arg6[%c32, %c0_35] : memref<64x512xbf16, #tpu.memory_space<vmem>>, vector<32x512xbf16>
    %cst_36 = arith.constant dense<0.000000e+00> : vector<128x512xf32>
    %75 = tpu.matmul %71, %74, %cst_36 {dimension_numbers = #tpu.dot_dimension_numbers<[1], [0], [0], [1], [0, 0, 1, 1], [], []>} : vector<128x32xbf16>, vector<32x512xbf16>, vector<128x512xf32> -> vector<128x512xf32>
    %76 = arith.addf %73, %75 : vector<128x512xf32>
    %c0_37 = arith.constant 0 : index
    %c896 = arith.constant 896 : index
    %77 = vector.load %arg9[%c0_37, %c896] : memref<1x4096xf32, #tpu.memory_space<vmem>>, vector<1x512xf32>
    %78 = vector.broadcast %77 : vector<1x512xf32> to vector<128x512xf32>
    %79 = arith.addf %76, %78 : vector<128x512xf32>
    %cst_38 = arith.constant 0.000000e+00 : f32
    %80 = vector.broadcast %cst_38 : f32 to vector<128x512xf32>
    %81 = arith.maximumf %79, %80 : vector<128x512xf32>
    %c0_39 = arith.constant 0 : index
    %c1408 = arith.constant 1408 : index
    %82 = vector.load %arg9[%c0_39, %c1408] : memref<1x4096xf32, #tpu.memory_space<vmem>>, vector<1x512xf32>
    %c0_40 = arith.constant 0 : index
    %c1920 = arith.constant 1920 : index
    %83 = vector.load %arg9[%c0_40, %c1920] : memref<1x4096xf32, #tpu.memory_space<vmem>>, vector<1x512xf32>
    %cst_41 = arith.constant dense<0.000000e+00> : vector<128xf32>
    %84 = vector.multi_reduction <add>, %81, %cst_41 [1] : vector<128x512xf32> to vector<128xf32>
    %85 = vector.shape_cast %84 : vector<128xf32> to vector<128x1xf32>
    %cst_42 = arith.constant 5.120000e+02 : f32
    %86 = vector.broadcast %cst_42 : f32 to vector<128x1xf32>
    %87 = arith.divf %85, %86 : vector<128x1xf32>
    %88 = vector.broadcast %87 : vector<128x1xf32> to vector<128x512xf32>
    %89 = arith.subf %81, %88 : vector<128x512xf32>
    %90 = arith.mulf %89, %89 : vector<128x512xf32>
    %cst_43 = arith.constant dense<0.000000e+00> : vector<128xf32>
    %91 = vector.multi_reduction <add>, %90, %cst_43 [1] : vector<128x512xf32> to vector<128xf32>
    %92 = vector.shape_cast %91 : vector<128xf32> to vector<128x1xf32>
    %cst_44 = arith.constant 5.120000e+02 : f32
    %93 = vector.broadcast %cst_44 : f32 to vector<128x1xf32>
    %94 = arith.divf %92, %93 : vector<128x1xf32>
    %cst_45 = arith.constant 9.99999974E-6 : f32
    %95 = vector.broadcast %cst_45 : f32 to vector<128x1xf32>
    %96 = arith.addf %94, %95 : vector<128x1xf32>
    %97 = math.rsqrt %96 : vector<128x1xf32>
    %98 = vector.broadcast %97 : vector<128x1xf32> to vector<128x512xf32>
    %99 = arith.mulf %89, %98 : vector<128x512xf32>
    %100 = vector.broadcast %82 : vector<1x512xf32> to vector<128x512xf32>
    %101 = arith.mulf %99, %100 : vector<128x512xf32>
    %102 = vector.broadcast %83 : vector<1x512xf32> to vector<128x512xf32>
    %103 = arith.addf %101, %102 : vector<128x512xf32>
    %104 = arith.truncf %103 : vector<128x512xf32> to vector<128x512xbf16>
    %c0_46 = arith.constant 0 : index
    %c0_47 = arith.constant 0 : index
    %105 = vector.load %arg7[%c0_46, %c0_47] : memref<512x512xbf16, #tpu.memory_space<vmem>>, vector<512x512xbf16>
    %cst_48 = arith.constant dense<0.000000e+00> : vector<128x512xf32>
    %106 = tpu.matmul %104, %105, %cst_48 {dimension_numbers = #tpu.dot_dimension_numbers<[1], [0], [0], [1], [0, 0, 1, 1], [], []>} : vector<128x512xbf16>, vector<512x512xbf16>, vector<128x512xf32> -> vector<128x512xf32>
    %c0_49 = arith.constant 0 : index
    %c2432 = arith.constant 2432 : index
    %107 = vector.load %arg9[%c0_49, %c2432] : memref<1x4096xf32, #tpu.memory_space<vmem>>, vector<1x512xf32>
    %108 = vector.broadcast %107 : vector<1x512xf32> to vector<128x512xf32>
    %109 = arith.addf %106, %108 : vector<128x512xf32>
    %cst_50 = arith.constant 0.000000e+00 : f32
    %110 = vector.broadcast %cst_50 : f32 to vector<128x512xf32>
    %111 = arith.maximumf %109, %110 : vector<128x512xf32>
    %c0_51 = arith.constant 0 : index
    %c2944 = arith.constant 2944 : index
    %112 = vector.load %arg9[%c0_51, %c2944] : memref<1x4096xf32, #tpu.memory_space<vmem>>, vector<1x512xf32>
    %c0_52 = arith.constant 0 : index
    %c3456 = arith.constant 3456 : index
    %113 = vector.load %arg9[%c0_52, %c3456] : memref<1x4096xf32, #tpu.memory_space<vmem>>, vector<1x512xf32>
    %cst_53 = arith.constant dense<0.000000e+00> : vector<128xf32>
    %114 = vector.multi_reduction <add>, %111, %cst_53 [1] : vector<128x512xf32> to vector<128xf32>
    %115 = vector.shape_cast %114 : vector<128xf32> to vector<128x1xf32>
    %cst_54 = arith.constant 5.120000e+02 : f32
    %116 = vector.broadcast %cst_54 : f32 to vector<128x1xf32>
    %117 = arith.divf %115, %116 : vector<128x1xf32>
    %118 = vector.broadcast %117 : vector<128x1xf32> to vector<128x512xf32>
    %119 = arith.subf %111, %118 : vector<128x512xf32>
    %120 = arith.mulf %119, %119 : vector<128x512xf32>
    %cst_55 = arith.constant dense<0.000000e+00> : vector<128xf32>
    %121 = vector.multi_reduction <add>, %120, %cst_55 [1] : vector<128x512xf32> to vector<128xf32>
    %122 = vector.shape_cast %121 : vector<128xf32> to vector<128x1xf32>
    %cst_56 = arith.constant 5.120000e+02 : f32
    %123 = vector.broadcast %cst_56 : f32 to vector<128x1xf32>
    %124 = arith.divf %122, %123 : vector<128x1xf32>
    %cst_57 = arith.constant 9.99999974E-6 : f32
    %125 = vector.broadcast %cst_57 : f32 to vector<128x1xf32>
    %126 = arith.addf %124, %125 : vector<128x1xf32>
    %127 = math.rsqrt %126 : vector<128x1xf32>
    %128 = vector.broadcast %127 : vector<128x1xf32> to vector<128x512xf32>
    %129 = arith.mulf %119, %128 : vector<128x512xf32>
    %130 = vector.broadcast %112 : vector<1x512xf32> to vector<128x512xf32>
    %131 = arith.mulf %129, %130 : vector<128x512xf32>
    %132 = vector.broadcast %113 : vector<1x512xf32> to vector<128x512xf32>
    %133 = arith.addf %131, %132 : vector<128x512xf32>
    %134 = arith.truncf %133 : vector<128x512xf32> to vector<128x512xbf16>
    %c0_58 = arith.constant 0 : index
    %c0_59 = arith.constant 0 : index
    %135 = vector.load %arg8[%c0_58, %c0_59] : memref<512x128xbf16, #tpu.memory_space<vmem>>, vector<512x128xbf16>
    %cst_60 = arith.constant dense<0.000000e+00> : vector<128x128xf32>
    %136 = tpu.matmul %134, %135, %cst_60 {dimension_numbers = #tpu.dot_dimension_numbers<[1], [0], [0], [1], [0, 0, 1, 1], [], []>} : vector<128x512xbf16>, vector<512x128xbf16>, vector<128x128xf32> -> vector<128x128xf32>
    %c0_61 = arith.constant 0 : index
    %c3968 = arith.constant 3968 : index
    %137 = vector.load %arg9[%c0_61, %c3968] : memref<1x4096xf32, #tpu.memory_space<vmem>>, vector<1x128xf32>
    %138 = vector.broadcast %137 : vector<1x128xf32> to vector<128x128xf32>
    %139 = arith.addf %136, %138 : vector<128x128xf32>
    %c0_62 = arith.constant 0 : index
    %c0_63 = arith.constant 0 : index
    %140 = vector.load %arg10[%c0_62, %c0_63] : memref<128x128xf32, #tpu.memory_space<vmem>>, vector<128x128xf32>
    tpu.vector_store %arg10[%c0_62, %c0_63], %139 {strides = array<i32>} : memref<128x128xf32, #tpu.memory_space<vmem>>, vector<128x128xf32>,
    return
  }
  func.func @transform_0(%arg0: i32) -> (i32, i32) {
    %c0_i32 = arith.constant 0 : i32
    %c0_i32_0 = arith.constant 0 : i32
    return %arg0, %c0_i32 : i32, i32
  }
  func.func @transform_1(%arg0: i32) -> (i32, i32) {
    %c0_i32 = arith.constant 0 : i32
    %c0_i32_0 = arith.constant 0 : i32
    return %arg0, %c0_i32 : i32, i32
  }
  func.func @transform_2(%arg0: i32) -> (i32, i32) {
    %c0_i32 = arith.constant 0 : i32
    %c0_i32_0 = arith.constant 0 : i32
    %c0_i32_1 = arith.constant 0 : i32
    return %c0_i32, %c0_i32_0 : i32, i32
  }
  func.func @transform_3(%arg0: i32) -> (i32, i32) {
    %c0_i32 = arith.constant 0 : i32
    %c0_i32_0 = arith.constant 0 : i32
    %c0_i32_1 = arith.constant 0 : i32
    return %c0_i32, %c0_i32_0 : i32, i32
  }
  func.func @transform_4(%arg0: i32) -> (i32, i32) {
    %c0_i32 = arith.constant 0 : i32
    %c0_i32_0 = arith.constant 0 : i32
    %c0_i32_1 = arith.constant 0 : i32
    return %c0_i32, %c0_i32_0 : i32, i32
  }
  func.func @transform_5(%arg0: i32) -> (i32, i32) {
    %c0_i32 = arith.constant 0 : i32
    %c0_i32_0 = arith.constant 0 : i32
    %c0_i32_1 = arith.constant 0 : i32
    return %c0_i32, %c0_i32_0 : i32, i32
  }
  func.func @transform_6(%arg0: i32) -> (i32, i32) {
    %c0_i32 = arith.constant 0 : i32
    %c0_i32_0 = arith.constant 0 : i32
    %c0_i32_1 = arith.constant 0 : i32
    return %c0_i32, %c0_i32_0 : i32, i32
  }
  func.func @transform_7(%arg0: i32) -> (i32, i32) {
    %c0_i32 = arith.constant 0 : i32
    %c0_i32_0 = arith.constant 0 : i32
    %c0_i32_1 = arith.constant 0 : i32
    return %c0_i32, %c0_i32_0 : i32, i32
  }
  func.func @transform_8(%arg0: i32) -> (i32, i32) {
    %c0_i32 = arith.constant 0 : i32
    %c0_i32_0 = arith.constant 0 : i32
    %c0_i32_1 = arith.constant 0 : i32
    return %c0_i32, %c0_i32_0 : i32, i32
  }
  func.func @transform_9(%arg0: i32) -> (i32, i32) {
    %c0_i32 = arith.constant 0 : i32
    %c0_i32_0 = arith.constant 0 : i32
    return %arg0, %c0_i32 : i32, i32
  }
}

</mosaic_0001>

<bundles_post_ra>
// kernel: critic_forward.1
= control target key start
LH: loop header
LB: loop body
LE: loop exit
PB: predicated region body
PF: predicated region fallthrough
CT: control target
= control target key end

     0   :  { %vm101_vm0 = vcmask 1043456   ;;  %vm76_vm1 = vcmask 195584   ;;  %vm220_vm2 = vcmask 130048   ;;  %vm922_vm3 = vcmask 64512   ;;  %s9457_s2 = inlined_call_operand.vmem [shape: bf16[24,16], index: 2, kind: input, shape index: {}]   ;;  %s9458_s0 = inlined_call_operand.vmem [shape: f32[128,24], index: 0, kind: input, shape index: {}]   ;;  %s9459_s8 = inlined_call_operand.vmem [shape: f32[1,4096], index: 8, kind: input, shape index: {}]   ;;  %s9460_s3 = inlined_call_operand.vmem [shape: bf16[16,32], index: 3, kind: input, shape index: {}]   ;;  %s9461_s4 = inlined_call_operand.vmem [shape: bf16[8,32], index: 4, kind: input, shape index: {}]   ;;  %s9462_s1 = inlined_call_operand.vmem [shape: f32[128,8], index: 1, kind: input, shape index: {}]   ;;  %s9463_s5 = inlined_call_operand.vmem [shape: bf16[64,512], index: 5, kind: input, shape index: {}]   ;;  %s9464_s6 = inlined_call_operand.vmem [shape: bf16[512,512], index: 6, kind: input, shape index: {}]   ;;  %s9465_s7 = inlined_call_operand.vmem [shape: bf16[512,128], index: 7, kind: input, shape index: {}]   ;;  %s9466_s9 = inlined_call_operand.vmem [shape: f32[128,128], index: 9, kind: output, shape index: {}]  }
   0x1   :  { %v5501_v0 = vld [vmem:[%s9457_s2] sm:$0xff]   ;;  %v5502_v1 = vld [vmem:[%s9457_s2 + $0x8] ss:$0 sps:$4 sm:$0xff]   ;;  %v35_v5 = vld [vmem:[%s9458_s0 + $0x10] sm:$0xff]  ;;  %vm636_vm4 = vcmask 261120  }
   0x2   :  { %v33_v2 = vld [vmem:[%s9458_s0] sm:$0xff]  ;;  %v34_v3 = vld [vmem:[%s9458_s0 + $0x8] sm:$0xff]  ;;  %5248 = vmatprep.subr.bf16.mxu0 %v5501_v0  ;;  %v36_v6 = vld [vmem:[%s9458_s0 + $0x18] sm:$0xff]  ;;  %v103_v7 = vsel %vm101_vm0, %v5502_v1, 0 }
   0x3   :  { %v49_v4 = vpack.c.bf16 %v34_v3, %v33_v2  ;;  %5249 = vmatpush3.bf16.msra.mxu0 %v5501_v0  ;;  %v37_v8 = vld [vmem:[%s9458_s0 + $0x20] sm:$0xff]  ;;  %v38_v9 = vld [vmem:[%s9458_s0 + $0x28] sm:$0xff]  ;;  %v50_v10 = vpack.c.bf16 %v36_v6, %v35_v5  ;;  %v39_v12 = vld [vmem:[%s9458_s0 + $0x30] sm:$0xff] }
   0x4   :  { %5498 = vmatprep.subr.msk.bf16.mxu0 %vm101_vm0, %v5502_v1  ;;  %v51_v11 = vpack.c.bf16 %v38_v9, %v37_v8  ;;  %v40_v13 = vld [vmem:[%s9458_s0 + $0x38] sm:$0xff]  ;;  %v41_v14 = vld [vmem:[%s9458_s0 + $0x40] sm:$0xff]  ;;  %v42_v15 = vld [vmem:[%s9458_s0 + $0x48] sm:$0xff] }
   0x5   :  { %5252 = vmatprep.mubr.msk.bf16.mxu0 %vm76_vm1, %v49_v4  ;;  %v52_v16 = vpack.c.bf16 %v40_v13, %v39_v12  ;;  %v53_v17 = vpack.c.bf16 %v42_v15, %v41_v14  ;;  %v43_v18 = vld [vmem:[%s9458_s0 + $0x50] sm:$0xff]  ;;  %v44_v19 = vld [vmem:[%s9458_s0 + $0x58] sm:$0xff]  ;;  %v45_v20 = vld [vmem:[%s9458_s0 + $0x60] sm:$0xff] }
   0x6   :  { %v46_v21 = vld [vmem:[%s9458_s0 + $0x68] sm:$0xff]  ;;  %v54_v22 = vpack.c.bf16 %v44_v19, %v43_v18  ;;  %v47_v24 = vld [vmem:[%s9458_s0 + $0x70] sm:$0xff]  ;;  %v48_v25 = vld [vmem:[%s9458_s0 + $0x78] sm:$0xff] }
   0x7   :  { %5251 = vmatpush3.bf16.msra.mxu0 %v103_v7  ;;  %v55_v23 = vpack.c.bf16 %v46_v21, %v45_v20  ;;  %v56_v26 = vpack.c.bf16 %v48_v25, %v47_v24  ;;  %v5998_v27 = vld [vmem:[%s9459_s8] ss:$0 sm:$0xff] }
   0xa   :  { %5253 = vmatmul.mubr.msk.bf16.vlgmr.msra.gmra.mrb[0].mxu0 %vm76_vm1, %v50_v10 }
   0xb   :  { %5256 = vmatprep.mubr.msk.bf16.mxu0 %vm76_vm1, %v51_v11 }
  0x12   :  { %5257 = vmatmul.mubr.msk.bf16.gmra.mrb[4].mxu0 %vm76_vm1, %v52_v16 }
  0x13   :  { %5260 = vmatprep.mubr.msk.bf16.mxu0 %vm76_vm1, %v53_v17 }
  0x1a   :  { %5261 = vmatmul.mubr.msk.bf16.gmra.mrb[8].mxu0 %vm76_vm1, %v54_v22 }
  0x1b   :  { %5264 = vmatprep.mubr.msk.bf16.mxu0 %vm76_vm1, %v55_v23 }
  0x22   :  { %5265 = vmatmul.mubr.msk.bf16.gmra.mrb[12].mxu0 %vm76_vm1, %v56_v26 }
  0xdd   :  { %v5254_v28 = vpop.f32.mrb[0].mxu0 }
  0xde   :  { %v6001_v29 = vadd.f32 %v5254_v28, %v5998_v27  ;;  %v139_v30 = vpop.f32.mrb[1].mxu0  ;;  %v5503_v28 = vld [vmem:[%s9460_s3] sm:$0xff]  }
  0xdf   :  { %v6004_v31 = vadd.f32 %v5998_v27, %v139_v30  ;;  %v5255_v32 = vpop.f32.mrb[2].mxu0  ;;  %5268 = vmatprep.subr.bf16.mxu0 %v5503_v28  ;;  %5304 = vmatprep.subr.bf16.mxu1 %v5503_v28 }
  0xe0   :  { %v204_v33 = vmax.f32 %v6001_v29, 0.0  ;;  %v6008_v34 = vadd.f32 %v5255_v32, %v5998_v27  ;;  %v142_v35 = vpop.f32.mrb[3].mxu0  ;;  %5269 = vmatpush3.bf16.msra.mxu0 %v5503_v28  ;;  %5305 = vmatpush3.bf16.msra.mxu1 %v5503_v28 }
  0xe1   :  { %v202_v36 = vmax.f32 %v6004_v31, 0.0  ;;  %v6012_v37 = vadd.f32 %v5998_v27, %v142_v35 }
  0xe2   :  { %v205_v38 = vmax.f32 %v6008_v34, 0.0  ;;  %v227_v39 = vsel %vm220_vm2, %v204_v33, 0.0 }
  0xe3   :  { %v203_v40 = vmax.f32 %v6012_v37, 0.0  ;;  %228 = vadd.xlane.f32.xlu1 %v227_v39  ;;  %v221_v41 = vsel %vm220_vm2, %v202_v36, 0.0 }
  0xe4   :  { %222 = vadd.xlane.f32.xlu0 %v221_v41  ;;  %v230_v45 = vsel %vm220_vm2, %v205_v38, 0.0 }
  0xe5   :  { %v5258_v42 = vpop.f32.mrb[4].mxu0  ;;  %v224_v48 = vsel %vm220_vm2, %v203_v40, 0.0 }
  0xe6   :  { %v6023_v43 = vadd.f32 %v5258_v42, %v5998_v27  ;;  %v155_v44 = vpop.f32.mrb[5].mxu0 }
  0xe7   :  { %v6029_v46 = vadd.f32 %v5998_v27, %v155_v44  ;;  %231 = vadd.xlane.f32.xlu1 %v230_v45  ;;  %v5259_v47 = vpop.f32.mrb[6].mxu0 }
  0xe8   :  { %v6035_v49 = vadd.f32 %v5259_v47, %v5998_v27  ;;  %v158_v50 = vpop.f32.mrb[7].mxu0  ;;  %225 = vadd.xlane.f32.xlu0 %v224_v48  ;;  %v208_v51 = vmax.f32 %v6023_v43, 0.0 }
  0xe9   :  { %v206_v52 = vmax.f32 %v6029_v46, 0.0  ;;  %v6040_v53 = vadd.f32 %v5998_v27, %v158_v50 }
  0xea   :  { %v209_v54 = vmax.f32 %v6035_v49, 0.0  ;;  %v239_v59 = vsel %vm220_vm2, %v208_v51, 0.0 }
  0xeb   :  { %v207_v55 = vmax.f32 %v6040_v53, 0.0  ;;  %v233_v56 = vsel %vm220_vm2, %v206_v52, 0.0 }
  0xec   :  { %234 = vadd.xlane.f32.xlu0 %v233_v56  ;;  %v242_v0 = vsel %vm220_vm2, %v209_v54, 0.0 }
  0xed   :  { %v5262_v57 = vpop.f32.mrb[8].mxu0  ;;  %v236_v58 = vsel %vm220_vm2, %v207_v55, 0.0 }
  0xee   :  { %v6054_v60 = vadd.f32 %v5262_v57, %v5998_v27  ;;  %v171_v61 = vpop.f32.mrb[9].mxu0  ;;  %237 = vadd.xlane.f32.xlu1 %v236_v58 }
  0xef   :  { %v6057_v62 = vadd.f32 %v5998_v27, %v171_v61  ;;  %v5263_v63 = vpop.f32.mrb[10].mxu0 }
  0xf0   :  { %v6063_v1 = vadd.f32 %v5263_v63, %v5998_v27  ;;  %v174_v2 = vpop.f32.mrb[11].mxu0  ;;  %240 = vadd.xlane.f32.xlu0 %v239_v59  ;;  %v212_v3 = vmax.f32 %v6054_v60, 0.0 }
  0xf1   :  { %v210_v4 = vmax.f32 %v6057_v62, 0.0  ;;  %v6068_v5 = vadd.f32 %v5998_v27, %v174_v2 }
  0xf2   :  { %243 = vadd.xlane.f32.xlu1 %v242_v0  ;;  %v213_v6 = vmax.f32 %v6063_v1, 0.0  ;;  %v251_v11 = vsel %vm220_vm2, %v212_v3, 0.0 }
  0xf3   :  { %v211_v7 = vmax.f32 %v6068_v5, 0.0  ;;  %v245_v8 = vsel %vm220_vm2, %v210_v4, 0.0 }
  0xf4   :  { %246 = vadd.xlane.f32.xlu0 %v245_v8  ;;  %v254_v16 = vsel %vm220_vm2, %v213_v6, 0.0 }
  0xf5   :  { %v5266_v9 = vpop.f32.mrb[12].mxu0  ;;  %v248_v10 = vsel %vm220_vm2, %v211_v7, 0.0 }
  0xf6   :  { %v6082_v12 = vadd.f32 %v5266_v9, %v5998_v27  ;;  %v187_v13 = vpop.f32.mrb[13].mxu0  ;;  %249 = vadd.xlane.f32.xlu1 %v248_v10 }
  0xf7   :  { %v6085_v14 = vadd.f32 %v5998_v27, %v187_v13  ;;  %v5267_v15 = vpop.f32.mrb[14].mxu0 }
  0xf8   :  { %v6091_v17 = vadd.f32 %v5267_v15, %v5998_v27  ;;  %v190_v18 = vpop.f32.mrb[15].mxu0  ;;  %252 = vadd.xlane.f32.xlu0 %v251_v11  ;;  %v216_v19 = vmax.f32 %v6082_v12, 0.0 }
  0xf9   :  { %v214_v20 = vmax.f32 %v6085_v14, 0.0  ;;  %v6096_v21 = vadd.f32 %v5998_v27, %v190_v18 }
  0xfa   :  { %255 = vadd.xlane.f32.xlu1 %v254_v16  ;;  %v217_v22 = vmax.f32 %v6091_v17, 0.0  ;;  %v263_v26 = vsel %vm220_vm2, %v216_v19, 0.0 }
  0xfb   :  { %v215_v23 = vmax.f32 %v6096_v21, 0.0  ;;  %v257_v24 = vsel %vm220_vm2, %v214_v20, 0.0 }
  0xfc   :  { %258 = vadd.xlane.f32.xlu0 %v257_v24  ;;  %v266_v27 = vsel %vm220_vm2, %v217_v22, 0.0 }
  0xfd   :  { %v260_v25 = vsel %vm220_vm2, %v215_v23, 0.0 }
  0xfe   :  { %261 = vadd.xlane.f32.xlu1 %v260_v25 }
 0x100   :  { %264 = vadd.xlane.f32.xlu0 %v263_v26 }
 0x102   :  { %267 = vadd.xlane.f32.xlu1 %v266_v27 }
 0x170   :  { %v229_v30 = vpop.xlane.xlu1 %228 }
 0x171   :  { %v272_v32 = vmul.f32 0.0625, %v229_v30  ;;  %v223_v35 = vpop.xlane.xlu0 %222 }
 0x172   :  { %v270_v39 = vmul.f32 0.0625, %v223_v35 }
 0x173   :  { %v6117_v41 = vsub.f32 %v204_v33, %v272_v32 }
 0x174   :  { %v6121_v42 = vsub.f32 %v202_v36, %v270_v39  ;;  %v232_v44 = vpop.xlane.xlu1 %231 }
 0x175   :  { %v273_v45 = vmul.f32 0.0625, %v232_v44  ;;  %v226_v47 = vpop.xlane.xlu0 %225  ;;  %v304_v31 = vmul.f32 %v6117_v41, %v6117_v41 }
 0x176   :  { %v271_v48 = vmul.f32 0.0625, %v226_v47  ;;  %v302_v50 = vmul.f32 %v6121_v42, %v6121_v42 }
 0x177   :  { %v6127_v56 = vsub.f32 %v205_v38, %v273_v45 }
 0x178   :  { %v6131_v29 = vsub.f32 %v203_v40, %v271_v48  ;;  %v318_v33 = vsel %vm220_vm2, %v302_v50, 0.0  ;;  %v324_v40 = vsel %vm220_vm2, %v304_v31, 0.0 }
 0x179   :  { %319 = vadd.xlane.f32.xlu0 %v318_v33  ;;  %v235_v36 = vpop.xlane.xlu0 %234  ;;  %v305_v34 = vmul.f32 %v6127_v56, %v6127_v56 }
 0x17a   :  { %v274_v57 = vmul.f32 0.0625, %v235_v36  ;;  %v303_v58 = vmul.f32 %v6131_v29, %v6131_v29 }
 0x17b   :  { %v238_v59 = vpop.xlane.xlu1 %237  ;;  %v327_v46 = vsel %vm220_vm2, %v305_v34, 0.0 }
 0x17c   :  { %v6142_v37 = vsub.f32 %v206_v52, %v274_v57  ;;  %v275_v38 = vmul.f32 0.0625, %v238_v59  ;;  %v321_v61 = vsel %vm220_vm2, %v303_v58, 0.0 }
 0x17d   :  { %325 = vadd.xlane.f32.xlu0 %v324_v40  ;;  %322 = vadd.xlane.f32.xlu1 %v321_v61  ;;  %v241_v63 = vpop.xlane.xlu0 %240 }
 0x17e   :  { %v6148_v0 = vsub.f32 %v207_v55, %v275_v38  ;;  %v276_v2 = vmul.f32 0.0625, %v241_v63  ;;  %v306_v8 = vmul.f32 %v6142_v37, %v6142_v37 }
 0x17f   :  { %v244_v9 = vpop.xlane.xlu1 %243 }
 0x180   :  { %v6155_v52 = vsub.f32 %v208_v51, %v276_v2  ;;  %v277_v10 = vmul.f32 0.0625, %v244_v9  ;;  %v330_v11 = vsel %vm220_vm2, %v306_v8, 0.0  ;;  %v307_v13 = vmul.f32 %v6148_v0, %v6148_v0 }
 0x181   :  { %328 = vadd.xlane.f32.xlu1 %v327_v46  ;;  %331 = vadd.xlane.f32.xlu0 %v330_v11  ;;  %v247_v53 = vpop.xlane.xlu0 %246 }
 0x182   :  { %v6162_v55 = vsub.f32 %v209_v54, %v277_v10  ;;  %v278_v15 = vmul.f32 0.0625, %v247_v53  ;;  %v308_v16 = vmul.f32 %v6155_v52, %v6155_v52  ;;  %v333_v51 = vsel %vm220_vm2, %v307_v13, 0.0 }
 0x183   :  { %v250_v43 = vpop.xlane.xlu1 %249 }
 0x184   :  { %v6169_v18 = vsub.f32 %v210_v4, %v278_v15  ;;  %v279_v24 = vmul.f32 0.0625, %v250_v43  ;;  %v336_v25 = vsel %vm220_vm2, %v308_v16, 0.0  ;;  %v309_v26 = vmul.f32 %v6162_v55, %v6162_v55 }
 0x185   :  { %334 = vadd.xlane.f32.xlu1 %v333_v51  ;;  %337 = vadd.xlane.f32.xlu0 %v336_v25  ;;  %v253_v49 = vpop.xlane.xlu0 %252 }
 0x186   :  { %v6176_v54 = vsub.f32 %v211_v7, %v279_v24  ;;  %v280_v27 = vmul.f32 0.0625, %v253_v49  ;;  %v310_v28 = vmul.f32 %v6169_v18, %v6169_v18  ;;  %v339_v4 = vsel %vm220_vm2, %v309_v26, 0.0 }
 0x187   :  { %v256_v62 = vpop.xlane.xlu1 %255 }
 0x188   :  { %v6183_v30 = vsub.f32 %v212_v3, %v280_v27  ;;  %v281_v32 = vmul.f32 0.0625, %v256_v62  ;;  %v342_v35 = vsel %vm220_vm2, %v310_v28, 0.0  ;;  %v311_v39 = vmul.f32 %v6176_v54, %v6176_v54 }
 0x189   :  { %340 = vadd.xlane.f32.xlu1 %v339_v4  ;;  %343 = vadd.xlane.f32.xlu0 %v342_v35  ;;  %v259_v5 = vpop.xlane.xlu0 %258  ;;  %v6231_v35 = vld [vmem:[%s9459_s8 + $0x1] ss:$0 sm:$0xff] }
 0x18a   :  { %v6190_v7 = vsub.f32 %v213_v6, %v281_v32  ;;  %v282_v44 = vmul.f32 0.0625, %v259_v5  ;;  %v312_v45 = vmul.f32 %v6183_v30, %v6183_v30  ;;  %v345_v3 = vsel %vm220_vm2, %v311_v39, 0.0 }
 0x18b   :  { %v262_v60 = vpop.xlane.xlu1 %261 }
 0x18c   :  { %v6197_v47 = vsub.f32 %v214_v20, %v282_v44  ;;  %v283_v48 = vmul.f32 0.0625, %v262_v60  ;;  %v348_v50 = vsel %vm220_vm2, %v312_v45, 0.0  ;;  %v313_v33 = vmul.f32 %v6190_v7, %v6190_v7 }
 0x18d   :  { %346 = vadd.xlane.f32.xlu1 %v345_v3  ;;  %349 = vadd.xlane.f32.xlu0 %v348_v50  ;;  %v265_v1 = vpop.xlane.xlu0 %264 }
 0x18e   :  { %v6204_v6 = vsub.f32 %v215_v23, %v283_v48  ;;  %v284_v31 = vmul.f32 0.0625, %v265_v1  ;;  %v314_v36 = vmul.f32 %v6197_v47, %v6197_v47  ;;  %v351_v20 = vsel %vm220_vm2, %v313_v33, 0.0 }
 0x18f   :  { %v268_v14 = vpop.xlane.xlu1 %267 }
 0x190   :  { %v6211_v57 = vsub.f32 %v216_v19, %v284_v31  ;;  %v285_v58 = vmul.f32 0.0625, %v268_v14  ;;  %v354_v59 = vsel %vm220_vm2, %v314_v36, 0.0  ;;  %v315_v34 = vmul.f32 %v6204_v6, %v6204_v6 }
 0x191   :  { %352 = vadd.xlane.f32.xlu1 %v351_v20  ;;  %355 = vadd.xlane.f32.xlu0 %v354_v59 }
 0x192   :  { %v6218_v21 = vsub.f32 %v217_v22, %v285_v58  ;;  %v316_v23 = vmul.f32 %v6211_v57, %v6211_v57  ;;  %v357_v38 = vsel %vm220_vm2, %v315_v34, 0.0 }
 0x194   :  { %v360_v12 = vsel %vm220_vm2, %v316_v23, 0.0  ;;  %v317_v19 = vmul.f32 %v6218_v21, %v6218_v21 }
 0x195   :  { %358 = vadd.xlane.f32.xlu1 %v357_v38  ;;  %361 = vadd.xlane.f32.xlu0 %v360_v12 }
 0x196   :  { %v363_v40 = vsel %vm220_vm2, %v317_v19, 0.0 }
 0x199   :  { %364 = vadd.xlane.f32.xlu1 %v363_v40 }
 0x206   :  { %v320_v61 = vpop.xlane.xlu0 %319 }
 0x207   :  { %v366_v63 = vmul.f32 0.0625, %v320_v61 }
 0x209   :  { %v382_v17 = vadd.f32 1e-05, %v366_v63 }
 0x20a   :  { %v323_v22 = vpop.xlane.xlu1 %322  ;;  %v326_v2 = vpop.xlane.xlu0 %325 }
 0x20b   :  { %5752 = vrsqrt.f32 %v382_v17  ;;  %v367_v8 = vmul.f32 0.0625, %v323_v22  ;;  %v368_v9 = vmul.f32 0.0625, %v326_v2 }
 0x20d   :  { %v383_v46 = vadd.f32 1e-05, %v367_v8  ;;  %v384_v10 = vadd.f32 1e-05, %v368_v9 }
 0x20e   :  { %v329_v11 = vpop.xlane.xlu1 %328  ;;  %v332_v13 = vpop.xlane.xlu0 %331 }
 0x20f   :  { %5754 = vrsqrt.f32 %v383_v46  ;;  %v369_v53 = vmul.f32 0.0625, %v329_v11  ;;  %v370_v15 = vmul.f32 0.0625, %v332_v13 }
 0x210   :  { %5756 = vrsqrt.f32 %v384_v10 }
 0x211   :  { %v385_v16 = vadd.f32 1e-05, %v369_v53  ;;  %v386_v43 = vadd.f32 1e-05, %v370_v15 }
 0x212   :  { %v335_v51 = vpop.xlane.xlu1 %334  ;;  %v338_v24 = vpop.xlane.xlu0 %337 }
 0x213   :  { %5758 = vrsqrt.f32 %v385_v16  ;;  %v371_v25 = vmul.f32 0.0625, %v335_v51  ;;  %v372_v26 = vmul.f32 0.0625, %v338_v24 }
 0x214   :  { %5760 = vrsqrt.f32 %v386_v43 }
 0x215   :  { %v5753_v49 = vpop.eup %5752  ;;  %v387_v27 = vadd.f32 1e-05, %v371_v25  ;;  %v388_v28 = vadd.f32 1e-05, %v372_v26 }
 0x216   :  { %v341_v62 = vpop.xlane.xlu1 %340  ;;  %v344_v4 = vpop.xlane.xlu0 %343  ;;  %v414_v32 = vmul.f32 %v5753_v49, %v6121_v42  ;;  %v6238_v42 = vld [vmem:[%s9459_s8 + $0x2] ss:$0 sm:$0xff] }
 0x217   :  { %5762 = vrsqrt.f32 %v387_v27  ;;  %v373_v39 = vmul.f32 0.0625, %v341_v62  ;;  %v374_v5 = vmul.f32 0.0625, %v344_v4 }
 0x218   :  { %5764 = vrsqrt.f32 %v388_v28  ;;  %v436_v1 = vmul.f32 %v6231_v35, %v414_v32 }
 0x219   :  { %v5755_v44 = vpop.eup %5754  ;;  %v389_v45 = vadd.f32 1e-05, %v373_v39  ;;  %v390_v60 = vadd.f32 1e-05, %v374_v5 }
 0x21a   :  { %v5757_v3 = vpop.eup %5756  ;;  %v347_v48 = vpop.xlane.xlu1 %346  ;;  %v415_v33 = vmul.f32 %v5755_v44, %v6131_v29  ;;  %v458_v40 = vadd.f32 %v6238_v42, %v436_v1 }
 0x21b   :  { %v350_v50 = vpop.xlane.xlu0 %349  ;;  %v416_v31 = vmul.f32 %v5757_v3, %v6117_v41  ;;  %5766 = vrsqrt.f32 %v389_v45  ;;  %v375_v36 = vmul.f32 0.0625, %v347_v48 }
 0x21c   :  { %v376_v14 = vmul.f32 0.0625, %v350_v50  ;;  %5768 = vrsqrt.f32 %v390_v60  ;;  %v437_v20 = vmul.f32 %v6231_v35, %v415_v33 }
 0x21d   :  { %v5759_v58 = vpop.eup %5758  ;;  %v391_v59 = vadd.f32 1e-05, %v375_v36  ;;  %v438_v29 = vmul.f32 %v6231_v35, %v416_v31 }
 0x21e   :  { %v392_v34 = vadd.f32 1e-05, %v376_v14  ;;  %v5761_v23 = vpop.eup %5760  ;;  %v417_v38 = vmul.f32 %v5759_v58, %v6127_v56  ;;  %v353_v12 = vpop.xlane.xlu1 %352  ;;  %v459_v41 = vadd.f32 %v6238_v42, %v437_v20 }
 0x21f   :  { %v356_v19 = vpop.xlane.xlu0 %355  ;;  %5770 = vrsqrt.f32 %v391_v59  ;;  %v377_v61 = vmul.f32 0.0625, %v353_v12  ;;  %v418_v2 = vmul.f32 %v5761_v23, %v6142_v37  ;;  %v460_v56 = vadd.f32 %v6238_v42, %v438_v29 }
 0x220   :  { %v378_v63 = vmul.f32 0.0625, %v356_v19  ;;  %v439_v17 = vmul.f32 %v6231_v35, %v417_v38  ;;  %5772 = vrsqrt.f32 %v392_v34  ;;  %v474_v22 = vpack.c.bf16 %v459_v41, %v458_v40 }
 0x221   :  { %v5763_v8 = vpop.eup %5762  ;;  %v393_v9 = vadd.f32 1e-05, %v377_v61  ;;  %v440_v16 = vmul.f32 %v6231_v35, %v418_v2 }
 0x222   :  { %v394_v46 = vadd.f32 1e-05, %v378_v63  ;;  %v5765_v10 = vpop.eup %5764  ;;  %v461_v11 = vadd.f32 %v6238_v42, %v439_v17  ;;  %v359_v13 = vpop.xlane.xlu1 %358  ;;  %5270 = vmatprep.mubr.msk.bf16.mxu0 %vm220_vm2, %v474_v22  ;;  %v419_v15 = vmul.f32 %v5763_v8, %v6148_v0 }
 0x223   :  { %v362_v53 = vpop.xlane.xlu0 %361  ;;  %5774 = vrsqrt.f32 %v393_v9  ;;  %v379_v43 = vmul.f32 0.0625, %v359_v13  ;;  %v420_v37 = vmul.f32 %v5765_v10, %v6155_v52  ;;  %v462_v0 = vadd.f32 %v6238_v42, %v440_v16 }
 0x224   :  { %v380_v51 = vmul.f32 0.0625, %v362_v53  ;;  %5776 = vrsqrt.f32 %v394_v46  ;;  %v475_v24 = vpack.c.bf16 %v461_v11, %v460_v56  ;;  %v441_v25 = vmul.f32 %v6231_v35, %v419_v15  ;;  %v892_v53 = vld [vmem:[%s9462_s1 + $0x10] sm:$0xff]  ;;  %v893_v15 = vld [vmem:[%s9462_s1 + $0x18] sm:$0xff] }
 0x225   :  { %v5767_v26 = vpop.eup %5766  ;;  %v395_v49 = vadd.f32 1e-05, %v379_v43  ;;  %v442_v39 = vmul.f32 %v6231_v35, %v420_v37  ;;  %v907_v16 = vpack.c.bf16 %v893_v15, %v892_v53  ;;  %v894_v43 = vld [vmem:[%s9462_s1 + $0x20] sm:$0xff]  ;;  %v896_v37 = vld [vmem:[%s9462_s1 + $0x30] sm:$0xff] }
 0x226   :  { %v396_v27 = vadd.f32 1e-05, %v380_v51  ;;  %v5769_v28 = vpop.eup %5768  ;;  %v365_v62 = vpop.xlane.xlu1 %364  ;;  %5271 = vmatmul.mubr.msk.bf16.vlgmr.msra.gmra.mrb[16].mxu0 %vm220_vm2, %v475_v24  ;;  %v463_v4 = vadd.f32 %v6238_v42, %v441_v25  ;;  %v421_v32 = vmul.f32 %v5767_v26, %v6162_v55  ;;  %v895_v51 = vld [vmem:[%s9462_s1 + $0x28] sm:$0xff]  ;;  %v897_v25 = vld [vmem:[%s9462_s1 + $0x38] sm:$0xff]  ;;  %v898_v26 = vld [vmem:[%s9462_s1 + $0x40] sm:$0xff] }
 0x227   :  { %5778 = vrsqrt.f32 %v395_v49  ;;  %v381_v52 = vmul.f32 0.0625, %v365_v62  ;;  %v422_v5 = vmul.f32 %v5769_v28, %v6169_v18  ;;  %v464_v50 = vadd.f32 %v6238_v42, %v442_v39  ;;  %v899_v49 = vld [vmem:[%s9462_s1 + $0x48] sm:$0xff]  ;;  %v900_v62 = vld [vmem:[%s9462_s1 + $0x50] sm:$0xff] }
 0x228   :  { %5780 = vrsqrt.f32 %v396_v27  ;;  %v476_v44 = vpack.c.bf16 %v463_v4, %v462_v0  ;;  %v443_v45 = vmul.f32 %v6231_v35, %v421_v32  ;;  %v908_v24 = vpack.c.bf16 %v895_v51, %v894_v43  ;;  %v901_v0 = vld [vmem:[%s9462_s1 + $0x58] sm:$0xff]  ;;  %v902_v4 = vld [vmem:[%s9462_s1 + $0x60] sm:$0xff]  ;;  %v903_v32 = vld [vmem:[%s9462_s1 + $0x68] sm:$0xff] }
 0x229   :  { %v5771_v60 = vpop.eup %5770  ;;  %v397_v3 = vadd.f32 1e-05, %v381_v52  ;;  %v444_v1 = vmul.f32 %v6231_v35, %v422_v5  ;;  %v909_v27 = vpack.c.bf16 %v897_v25, %v896_v37  ;;  %v910_v28 = vpack.c.bf16 %v899_v49, %v898_v26  ;;  %v904_v5 = vld [vmem:[%s9462_s1 + $0x70] sm:$0xff] }
 0x22a   :  { %v5773_v48 = vpop.eup %5772  ;;  %5274 = vmatprep.mubr.msk.bf16.mxu1 %vm220_vm2, %v476_v44  ;;  %v465_v33 = vadd.f32 %v6238_v42, %v443_v45  ;;  %v423_v55 = vmul.f32 %v5771_v60, %v6176_v54  ;;  %v911_v39 = vpack.c.bf16 %v901_v0, %v900_v62  ;;  %v912_v52 = vpack.c.bf16 %v903_v32, %v902_v4  ;;  %v905_v44 = vld [vmem:[%s9462_s1 + $0x78] sm:$0xff]  ;;  %v6357_v60 = vld [vmem:[%s9459_s8 + $0x3] ss:$0 sm:$0xff] }
 0x22b   :  { %5782 = vrsqrt.f32 %v397_v3  ;;  %v424_v18 = vmul.f32 %v5773_v48, %v6183_v30  ;;  %v466_v58 = vadd.f32 %v6238_v42, %v444_v1  ;;  %v913_v45 = vpack.c.bf16 %v905_v44, %v904_v5 }
 0x22c   :  { %v477_v31 = vpack.c.bf16 %v465_v33, %v464_v50  ;;  %v445_v36 = vmul.f32 %v6231_v35, %v423_v55 }
 0x22d   :  { %v5775_v14 = vpop.eup %5774  ;;  %v446_v54 = vmul.f32 %v6231_v35, %v424_v18 }
 0x22e   :  { %v5777_v20 = vpop.eup %5776  ;;  %5275 = vmatmul.mubr.msk.bf16.vlgmr.msra.gmra.mrb[0].mxu1 %vm220_vm2, %v477_v31  ;;  %v467_v59 = vadd.f32 %v6238_v42, %v445_v36  ;;  %v425_v34 = vmul.f32 %v5775_v14, %v6190_v7 }
 0x22f   :  { %v426_v23 = vmul.f32 %v5777_v20, %v6197_v47  ;;  %v468_v19 = vadd.f32 %v6238_v42, %v446_v54 }
 0x230   :  { %v478_v29 = vpack.c.bf16 %v467_v59, %v466_v58  ;;  %v447_v30 = vmul.f32 %v6231_v35, %v425_v34 }
 0x231   :  { %v5779_v38 = vpop.eup %5778  ;;  %v448_v61 = vmul.f32 %v6231_v35, %v426_v23 }
 0x232   :  { %v5781_v12 = vpop.eup %5780  ;;  %5278 = vmatprep.mubr.msk.bf16.mxu1 %vm220_vm2, %v478_v29  ;;  %v469_v40 = vadd.f32 %v6238_v42, %v447_v30  ;;  %v427_v41 = vmul.f32 %v5779_v38, %v6204_v6 }
 0x233   :  { %v428_v7 = vmul.f32 %v5781_v12, %v6211_v57  ;;  %v470_v2 = vadd.f32 %v6238_v42, %v448_v61 }
 0x234   :  { %v479_v63 = vpack.c.bf16 %v469_v40, %v468_v19  ;;  %v449_v47 = vmul.f32 %v6231_v35, %v427_v41 }
 0x235   :  { %v5783_v17 = vpop.eup %5782  ;;  %v450_v9 = vmul.f32 %v6231_v35, %v428_v7 }
 0x236   :  { %v429_v22 = vmul.f32 %v5783_v17, %v6218_v21  ;;  %5279 = vmatmul.mubr.msk.bf16.gmra.mrb[4].mxu1 %vm220_vm2, %v479_v63  ;;  %v471_v8 = vadd.f32 %v6238_v42, %v449_v47  ;;  %v914_v21 = vld [vmem:[%s9461_s4] sm:$0xf] }
 0x237   :  { %v472_v57 = vadd.f32 %v6238_v42, %v450_v9  ;;  %5499 = vmatprep.subr.msk.bf16.mxu1 %vm101_vm0, %v914_v21  ;;  %v948_v11 = vsel %vm101_vm0, %v914_v21, 0 }
 0x238   :  { %v480_v46 = vpack.c.bf16 %v471_v8, %v470_v2  ;;  %v451_v6 = vmul.f32 %v6231_v35, %v429_v22  ;;  %5287 = vmatpush3.bf16.msra.mxu1 %v948_v11  ;;  %v890_v35 = vld [vmem:[%s9462_s1] sm:$0xff] }
 0x23a   :  { %5282 = vmatprep.mubr.msk.bf16.mxu1 %vm220_vm2, %v480_v46  ;;  %v473_v10 = vadd.f32 %v6238_v42, %v451_v6  ;;  %v891_v42 = vld [vmem:[%s9462_s1 + $0x8] sm:$0xff] }
 0x23b   :  { %v906_v13 = vpack.c.bf16 %v891_v42, %v890_v35 }
 0x23c   :  { %v481_v56 = vpack.c.bf16 %v473_v10, %v472_v57 }
 0x23e   :  { %5283 = vmatmul.mubr.msk.bf16.gmra.mrb[8].mxu1 %vm220_vm2, %v481_v56 }
 0x23f   :  { %5288 = vmatprep.mubr.msk.bf16.mxu1 %vm922_vm3, %v906_v13 }
 0x246   :  { %5289 = vmatmul.mubr.msk.bf16.vlgmr.msra.gmra.mrb[12].mxu1 %vm922_vm3, %v907_v16 }
 0x247   :  { %5292 = vmatprep.mubr.msk.bf16.mxu1 %vm922_vm3, %v908_v24 }
 0x24e   :  { %5293 = vmatmul.mubr.msk.bf16.gmra.mrb[16].mxu1 %vm922_vm3, %v909_v27 }
 0x24f   :  { %5296 = vmatprep.mubr.msk.bf16.mxu1 %vm922_vm3, %v910_v28 }
 0x256   :  { %5297 = vmatmul.mubr.msk.bf16.gmra.mrb[20].mxu1 %vm922_vm3, %v911_v39 }
 0x257   :  { %5300 = vmatprep.mubr.msk.bf16.mxu1 %vm922_vm3, %v912_v52 }
 0x25e   :  { %5301 = vmatmul.mubr.msk.bf16.gmra.mrb[24].mxu1 %vm922_vm3, %v913_v45 }
 0x2f9   :  { %v5272_v3 = vpop.f32.mrb[16].mxu0 }
 0x2fa   :  { %v555_v48 = vpop.f32.mrb[17].mxu0  ;;  %v6360_v50 = vadd.f32 %v5272_v3, %v6357_v60  ;;  %v5504_v3 = vld [vmem:[%s9463_s5 + $0x48] ss:$16 sps:$4 sm:$0xff]  }
 0x2fb   :  { %v6363_v33 = vadd.f32 %v6357_v60, %v555_v48  ;;  %v5273_v55 = vpop.f32.mrb[18].mxu0  ;;  %v5880_v48 = vmov 0  }
 0x2fc   :  { %v558_v1 = vpop.f32.mrb[19].mxu0  ;;  %v6367_v31 = vadd.f32 %v5273_v55, %v6357_v60  ;;  %v620_v14 = vmax.f32 %v6360_v50, 0.0  ;;  %1191 = vmatprep.mubr.bf16.mxu0 %v5880_v48  ;;  %1304 = vmatprep.mubr.bf16.mxu1 %v5880_v48  ;;  %v5506_v55 = vld [vmem:[%s9463_s5 + $0x4c] ss:$16 sps:$4 sm:$0xff]  }
 0x2fd   :  { %v618_v18 = vmax.f32 %v6363_v33, 0.0  ;;  %v6370_v36 = vadd.f32 %v6357_v60, %v558_v1  ;;  %v5507_v1 = vld [vmem:[%s9463_s5 + $0x40] ss:$16 sps:$4 sm:$0xff]   ;;  %1272 = vmatprep.subr.bf16.mxu1 %v5506_v55 }
 0x2fe   :  { %v621_v59 = vmax.f32 %v6367_v31, 0.0  ;;  %v643_v12 = vsel %vm636_vm4, %v620_v14, 0.0  ;;  %1273 = vmatpush1.bf16.msra.mxu1 %v5504_v3  ;;  %v5525_v3 = vld [vmem:[%s9463_s5 + $0x28] ss:$16 sps:$4 sm:$0xff]  }
 0x2ff   :  { %v619_v20 = vmax.f32 %v6370_v36, 0.0  ;;  %v637_v58 = vsel %vm636_vm4, %v618_v18, 0.0 }
 0x300   :  { %638 = vadd.xlane.f32.xlu0 %v637_v58  ;;  %v646_v7 = vsel %vm636_vm4, %v621_v59, 0.0  ;;  %v5509_v58 = vld [vmem:[%s9463_s5 + $0x44] ss:$16 sps:$4 sm:$0xff]  }
 0x301   :  { %v5276_v34 = vpop.f32.mrb[0].mxu1  ;;  %v640_v54 = vsel %vm636_vm4, %v619_v20, 0.0  ;;  %1159 = vmatprep.subr.bf16.mxu0 %v5509_v58 }
 0x302   :  { %641 = vadd.xlane.f32.xlu1 %v640_v54  ;;  %v571_v23 = vpop.f32.mrb[1].mxu1  ;;  %v6382_v29 = vadd.f32 %v5276_v34, %v6357_v60  ;;  %v5510_v34 = vld [vmem:[%s9463_s5 + $0x60] ss:$16 sps:$4 sm:$0xff]   ;;  %v5512_v54 = vld [vmem:[%s9463_s5 + $0x64] ss:$16 sps:$4 sm:$0xff]   ;;  %1160 = vmatpush1.bf16.msra.mxu0 %v5507_v1 }
 0x303   :  { %v6385_v30 = vadd.f32 %v6357_v60, %v571_v23  ;;  %v5277_v38 = vpop.f32.mrb[2].mxu1  ;;  %v5513_v23 = vld [vmem:[%s9463_s5 + $0x68] ss:$16 sps:$4 sm:$0xff]   ;;  %1161 = vmatprep.subr.bf16.mxu0 %v5512_v54 }
 0x304   :  { %644 = vadd.xlane.f32.xlu0 %v643_v12  ;;  %v574_v19 = vpop.f32.mrb[3].mxu1  ;;  %v6392_v41 = vadd.f32 %v5277_v38, %v6357_v60  ;;  %v624_v63 = vmax.f32 %v6382_v29, 0.0  ;;  %v5515_v38 = vld [vmem:[%s9463_s5 + $0x6c] ss:$16 sps:$4 sm:$0xff]   ;;  %v5518_v12 = vld [vmem:[%s9463_s5 + $0x4] ss:$16 sps:$4 sm:$0xff]  }
 0x305   :  { %v622_v40 = vmax.f32 %v6385_v30, 0.0  ;;  %v6395_v61 = vadd.f32 %v6357_v60, %v574_v19  ;;  %1274 = vmatprep.subr.bf16.mxu1 %v5515_v38  ;;  %v5521_v19 = vld [vmem:[%s9463_s5 + $0xc] ss:$16 sps:$4 sm:$0xff]  }
 0x306   :  { %647 = vadd.xlane.f32.xlu1 %v646_v7  ;;  %v625_v22 = vmax.f32 %v6392_v41, 0.0  ;;  %v655_v10 = vsel %vm636_vm4, %v624_v63, 0.0  ;;  %1275 = vmatpush1.bf16.msra.mxu1 %v5513_v23  ;;  %v6506_v7 = vld [vmem:[%s9459_s8 + $0x6] ss:$0 sm:$0xff] }
 0x307   :  { %v623_v47 = vmax.f32 %v6395_v61, 0.0  ;;  %v649_v17 = vsel %vm636_vm4, %v622_v40, 0.0  ;;  %1162 = vmatpush1.bf16.msra.mxu0 %v5510_v34  ;;  %1562 = vmatprep.subr.bf16.mxu1 %v5521_v19 }
 0x308   :  { %650 = vadd.xlane.f32.xlu0 %v649_v17  ;;  %v658_v42 = vsel %vm636_vm4, %v625_v22, 0.0  ;;  %1449 = vmatprep.subr.bf16.mxu0 %v5518_v12 }
 0x309   :  { %v5280_v2 = vpop.f32.mrb[4].mxu1  ;;  %v652_v8 = vsel %vm636_vm4, %v623_v47, 0.0 }
 0x30a   :  { %653 = vadd.xlane.f32.xlu1 %v652_v8  ;;  %v587_v9 = vpop.f32.mrb[5].mxu1  ;;  %v6410_v46 = vadd.f32 %v5280_v2, %v6357_v60 }
 0x30b   :  { %v6413_v6 = vadd.f32 %v6357_v60, %v587_v9  ;;  %v5281_v57 = vpop.f32.mrb[6].mxu1 }
 0x30c   :  { %656 = vadd.xlane.f32.xlu0 %v655_v10  ;;  %v590_v56 = vpop.f32.mrb[7].mxu1  ;;  %v6420_v11 = vadd.f32 %v5281_v57, %v6357_v60  ;;  %v628_v13 = vmax.f32 %v6410_v46, 0.0 }
 0x30d   :  { %v626_v21 = vmax.f32 %v6413_v6, 0.0  ;;  %v6423_v35 = vadd.f32 %v6357_v60, %v590_v56 }
 0x30e   :  { %659 = vadd.xlane.f32.xlu1 %v658_v42  ;;  %v629_v16 = vmax.f32 %v6420_v11, 0.0  ;;  %v667_v49 = vsel %vm636_vm4, %v628_v13, 0.0 }
 0x30f   :  { %v627_v53 = vmax.f32 %v6423_v35, 0.0  ;;  %v661_v15 = vsel %vm636_vm4, %v626_v21, 0.0 }
 0x310   :  { %662 = vadd.xlane.f32.xlu0 %v661_v15  ;;  %v670_v4 = vsel %vm636_vm4, %v629_v16, 0.0 }
 0x311   :  { %v5284_v43 = vpop.f32.mrb[8].mxu1  ;;  %v664_v51 = vsel %vm636_vm4, %v627_v53, 0.0 }
 0x312   :  { %665 = vadd.xlane.f32.xlu1 %v664_v51  ;;  %v603_v37 = vpop.f32.mrb[9].mxu1  ;;  %v6438_v24 = vadd.f32 %v5284_v43, %v6357_v60 }
 0x313   :  { %v6441_v25 = vadd.f32 %v6357_v60, %v603_v37  ;;  %v5285_v26 = vpop.f32.mrb[10].mxu1 }
 0x314   :  { %668 = vadd.xlane.f32.xlu0 %v667_v49  ;;  %v606_v27 = vpop.f32.mrb[11].mxu1  ;;  %v6448_v62 = vadd.f32 %v5285_v26, %v6357_v60  ;;  %v632_v32 = vmax.f32 %v6438_v24, 0.0 }
 0x315   :  { %v630_v28 = vmax.f32 %v6441_v25, 0.0  ;;  %v6451_v0 = vadd.f32 %v6357_v60, %v606_v27  ;;  %v5516_v27 = vld [vmem:[%s9463_s5] ss:$16 sps:$4 sm:$0xff]  }
 0x316   :  { %671 = vadd.xlane.f32.xlu1 %v670_v4  ;;  %v633_v5 = vmax.f32 %v6448_v62, 0.0  ;;  %v679_v45 = vsel %vm636_vm4, %v632_v32, 0.0  ;;  %v5519_v4 = vld [vmem:[%s9463_s5 + $0x8] ss:$16 sps:$4 sm:$0xff]  }
 0x317   :  { %v631_v39 = vmax.f32 %v6451_v0, 0.0  ;;  %v673_v52 = vsel %vm636_vm4, %v630_v28, 0.0 }
 0x318   :  { %674 = vadd.xlane.f32.xlu0 %v673_v52  ;;  %v682_v60 = vsel %vm636_vm4, %v633_v5, 0.0  ;;  %v5524_v52 = vld [vmem:[%s9463_s5 + $0x24] ss:$16 sps:$4 sm:$0xff]  }
 0x319   :  { %v676_v44 = vsel %vm636_vm4, %v631_v39, 0.0  ;;  %v5290_v17 = vpop.f32.mrb[12].mxu1 }
 0x31a   :  { %677 = vadd.xlane.f32.xlu1 %v676_v44  ;;  %v993_v2 = vadd.f32 %v5290_v17, %v6506_v7  ;;  %v984_v8 = vpop.f32.mrb[13].mxu1  ;;  %v5527_v44 = vld [vmem:[%s9463_s5 + $0x2c] ss:$16 sps:$4 sm:$0xff]  }
 0x31b   :  { %v985_v9 = vadd.f32 %v6506_v7, %v984_v8  ;;  %v5291_v57 = vpop.f32.mrb[14].mxu1 }
 0x31c   :  { %680 = vadd.xlane.f32.xlu0 %v679_v45  ;;  %v1049_v10 = vmax.f32 %v993_v2, 0.0  ;;  %v996_v56 = vadd.f32 %v5291_v57, %v6506_v7  ;;  %v987_v42 = vpop.f32.mrb[15].mxu1 }
 0x31d   :  { %v1047_v15 = vmax.f32 %v985_v9, 0.0  ;;  %v988_v43 = vadd.f32 %v6506_v7, %v987_v42 }
 0x31e   :  { %683 = vadd.xlane.f32.xlu1 %v682_v60  ;;  %v1050_v51 = vmax.f32 %v996_v56, 0.0  ;;  %v5522_v60 = vld [vmem:[%s9463_s5 + $0x20] ss:$16 sps:$4 sm:$0xff]  }
 0x31f   :  { %v1048_v37 = vmax.f32 %v988_v43, 0.0 }
 0x320   :  { %v1072_v26 = vpack.c.bf16 %v1050_v51, %v1049_v10 }
 0x321   :  { %v1071_v49 = vpack.c.bf16 %v1048_v37, %v1047_v15  ;;  %v5294_v45 = vpop.f32.mrb[16].mxu1 }
 0x322   :  { %v1009_v55 = vadd.f32 %v5294_v45, %v6506_v7  ;;  %v1000_v1 = vpop.f32.mrb[17].mxu1 }
 0x323   :  { %4891 = vmatmul.mubr.msk.bf16.vlgmr.msra.gmra.mrb[20].mxu0 %vm636_vm4, %v1071_v49  ;;  %4899 = vmatmul.mubr.msk.bf16.vlgmr.msra.gmra.mrb[28].mxu1 %vm636_vm4, %v1071_v49  ;;  %v1001_v58 = vadd.f32 %v6506_v7, %v1000_v1  ;;  %v5295_v34 = vpop.f32.mrb[18].mxu1 }
 0x324   :  { %1201 = vmatprep.mubr.bf16.mxu0 %v5880_v48  ;;  %1314 = vmatprep.mubr.bf16.mxu1 %v5880_v48  ;;  %v1053_v54 = vmax.f32 %v1009_v55, 0.0  ;;  %v1012_v23 = vadd.f32 %v5295_v34, %v6506_v7  ;;  %v1003_v38 = vpop.f32.mrb[19].mxu1 }
 0x325   :  { %1450 = vmatpush1.bf16.msra.mxu0 %v5516_v27  ;;  %1563 = vmatpush1.bf16.msra.mxu1 %v5519_v4  ;;  %v1051_v12 = vmax.f32 %v1001_v58, 0.0  ;;  %v1004_v19 = vadd.f32 %v6506_v7, %v1003_v38 }
 0x326   :  { %1451 = vmatprep.subr.bf16.mxu0 %v5524_v52  ;;  %1564 = vmatprep.subr.bf16.mxu1 %v5527_v44  ;;  %v1054_v17 = vmax.f32 %v1012_v23, 0.0 }
 0x327   :  { %v1052_v2 = vmax.f32 %v1004_v19, 0.0 }
 0x328   :  { %v1074_v8 = vpack.c.bf16 %v1054_v17, %v1053_v54 }
 0x329   :  { %1452 = vmatpush1.bf16.msra.mxu0 %v5522_v60  ;;  %1565 = vmatpush1.bf16.msra.mxu1 %v5525_v3  ;;  %v1073_v9 = vpack.c.bf16 %v1052_v2, %v1051_v12  ;;  %v5298_v57 = vpop.f32.mrb[20].mxu1 }
 0x32a   :  { %v1025_v10 = vadd.f32 %v5298_v57, %v6506_v7  ;;  %v1016_v56 = vpop.f32.mrb[21].mxu1 }
 0x32b   :  { %4892 = vmatmul.mubr.msk.bf16.gmra.mrb[24].mxu0 %vm636_vm4, %v1072_v26  ;;  %4900 = vmatmul.mubr.msk.bf16.gmra.mrb[32].mxu1 %vm636_vm4, %v1072_v26  ;;  %v1017_v42 = vadd.f32 %v6506_v7, %v1016_v56  ;;  %v5299_v15 = vpop.f32.mrb[22].mxu1 }
 0x32c   :  { %1211 = vmatprep.mubr.bf16.mxu0 %v5880_v48  ;;  %1324 = vmatprep.mubr.bf16.mxu1 %v5880_v48  ;;  %v1057_v43 = vmax.f32 %v1025_v10, 0.0  ;;  %v1028_v51 = vadd.f32 %v5299_v15, %v6506_v7  ;;  %v1019_v37 = vpop.f32.mrb[23].mxu1 }
 0x32d   :  { %v1055_v49 = vmax.f32 %v1017_v42, 0.0  ;;  %v1020_v26 = vadd.f32 %v6506_v7, %v1019_v37 }
 0x32e   :  { %v1058_v27 = vmax.f32 %v1028_v51, 0.0 }
 0x32f   :  { %v1056_v4 = vmax.f32 %v1020_v26, 0.0 }
 0x330   :  { %v6550_v52 = vpack.c.bf16 %v1058_v27, %v1057_v43 }
 0x331   :  { %v1075_v44 = vpack.c.bf16 %v1056_v4, %v1055_v49  ;;  %v5302_v45 = vpop.f32.mrb[24].mxu1 }
 0x332   :  { %v1041_v60 = vadd.f32 %v5302_v45, %v6506_v7  ;;  %v1032_v3 = vpop.f32.mrb[25].mxu1 }
 0x333   :  { %4893 = vmatmul.mubr.msk.bf16.gmra.mrb[28].mxu0 %vm636_vm4, %v1073_v9  ;;  %4901 = vmatmul.mubr.msk.bf16.gmra.mrb[36].mxu1 %vm636_vm4, %v1073_v9  ;;  %v1033_v55 = vadd.f32 %v6506_v7, %v1032_v3  ;;  %v5303_v1 = vpop.f32.mrb[26].mxu1 }
 0x334   :  { %1221 = vmatprep.mubr.bf16.mxu0 %v5880_v48  ;;  %1334 = vmatprep.mubr.bf16.mxu1 %v5880_v48  ;;  %v1061_v58 = vmax.f32 %v1041_v60, 0.0  ;;  %v1044_v34 = vadd.f32 %v5303_v1, %v6506_v7  ;;  %v1035_v54 = vpop.f32.mrb[27].mxu1 }
 0x335   :  { %v1059_v23 = vmax.f32 %v1033_v55, 0.0  ;;  %v1036_v38 = vadd.f32 %v6506_v7, %v1035_v54 }
 0x336   :  { %v1062_v12 = vmax.f32 %v1044_v34, 0.0 }
 0x337   :  { %v1060_v19 = vmax.f32 %v1036_v38, 0.0 }
 0x338   :  { %v6560_v17 = vpack.c.bf16 %v1062_v12, %v1061_v58 }
 0x339   :  { %v6562_v9 = vpack.c.bf16 %v1060_v19, %v1059_v23 }
 0x33b   :  { %4894 = vmatmul.mubr.msk.bf16.gmra.mrb[32].mxu0 %vm636_vm4, %v1074_v8  ;;  %4902 = vmatmul.mubr.msk.bf16.gmra.mrb[40].mxu1 %vm636_vm4, %v1074_v8 }
 0x33c   :  { %1231 = vmatprep.mubr.bf16.mxu0 %v5880_v48  ;;  %1344 = vmatprep.mubr.bf16.mxu1 %v5880_v48 }
 0x343   :  { %4895 = vmatmul.mubr.msk.bf16.gmra.mrb[36].mxu0 %vm636_vm4, %v1075_v44  ;;  %4903 = vmatmul.mubr.msk.bf16.gmra.mrb[44].mxu1 %vm636_vm4, %v1075_v44 }
 0x344   :  { %1241 = vmatprep.mubr.bf16.mxu0 %v5880_v48  ;;  %1354 = vmatprep.mubr.bf16.mxu1 %v5880_v48 }
 0x34b   :  { %4896 = vmatmul.mubr.msk.bf16.gmra.mrb[40].mxu0 %vm636_vm4, %v6550_v52  ;;  %4904 = vmatmul.mubr.msk.bf16.gmra.mrb[48].mxu1 %vm636_vm4, %v6550_v52 }
 0x34c   :  { %1251 = vmatprep.mubr.bf16.mxu0 %v5880_v48  ;;  %1364 = vmatprep.mubr.bf16.mxu1 %v5880_v48 }
 0x353   :  { %4897 = vmatmul.mubr.msk.bf16.gmra.mrb[44].mxu0 %vm636_vm4, %v6562_v9  ;;  %4905 = vmatmul.mubr.msk.bf16.gmra.mrb[52].mxu1 %vm636_vm4, %v6562_v9 }
 0x354   :  { %1261 = vmatprep.mubr.bf16.mxu0 %v5880_v48  ;;  %1374 = vmatprep.mubr.bf16.mxu1 %v5880_v48 }
 0x35b   :  { %4898 = vmatmul.mubr.msk.bf16.gmra.mrb[48].mxu0 %vm636_vm4, %v6560_v17  ;;  %4906 = vmatmul.mubr.msk.bf16.gmra.mrb[56].mxu1 %vm636_vm4, %v6560_v17 }
 0x35c   :  { %1481 = vmatprep.mubr.bf16.mxu0 %v5880_v48  ;;  %1594 = vmatprep.mubr.bf16.mxu1 %v5880_v48 }
 0x38d   :  { %v639_v2 = vpop.xlane.xlu0 %638 }
 0x38e   :  { %v686_v57 = vmul.f32 0.03125, %v639_v2 }
 0x38f   :  { %v642_v10 = vpop.xlane.xlu1 %641 }
 0x390   :  { %v6566_v7 = vsub.f32 %v618_v18, %v686_v57  ;;  %v687_v56 = vmul.f32 0.03125, %v642_v10 }
 0x391   :  { %v645_v42 = vpop.xlane.xlu0 %644 }
 0x392   :  { %v6570_v8 = vsub.f32 %v619_v20, %v687_v56  ;;  %v688_v15 = vmul.f32 0.03125, %v645_v42  ;;  %v718_v43 = vmul.f32 %v6566_v7, %v6566_v7 }
 0x393   :  { %v648_v51 = vpop.xlane.xlu1 %647 }
 0x394   :  { %v6578_v33 = vsub.f32 %v620_v14, %v688_v15  ;;  %v689_v18 = vmul.f32 0.03125, %v648_v51  ;;  %v734_v37 = vsel %vm636_vm4, %v718_v43, 0.0  ;;  %v719_v36 = vmul.f32 %v6570_v8, %v6570_v8 }
 0x395   :  { %735 = vadd.xlane.f32.xlu0 %v734_v37  ;;  %v651_v20 = vpop.xlane.xlu0 %650 }
 0x396   :  { %v6587_v49 = vsub.f32 %v621_v59, %v689_v18  ;;  %v690_v26 = vmul.f32 0.03125, %v651_v20  ;;  %v737_v50 = vsel %vm636_vm4, %v719_v36, 0.0  ;;  %v720_v14 = vmul.f32 %v6578_v33, %v6578_v33 }
 0x397   :  { %v654_v27 = vpop.xlane.xlu1 %653  ;;  %738 = vadd.xlane.f32.xlu1 %v737_v50 }
 0x398   :  { %v6594_v4 = vsub.f32 %v622_v40, %v690_v26  ;;  %v691_v44 = vmul.f32 0.03125, %v654_v27  ;;  %v740_v45 = vsel %vm636_vm4, %v720_v14, 0.0  ;;  %v721_v31 = vmul.f32 %v6587_v49, %v6587_v49 }
 0x399   :  { %741 = vadd.xlane.f32.xlu0 %v740_v45  ;;  %v657_v59 = vpop.xlane.xlu0 %656 }
 0x39a   :  { %v6601_v60 = vsub.f32 %v623_v47, %v691_v44  ;;  %v692_v3 = vmul.f32 0.03125, %v657_v59  ;;  %v743_v55 = vsel %vm636_vm4, %v721_v31, 0.0  ;;  %v722_v30 = vmul.f32 %v6594_v4, %v6594_v4 }
 0x39b   :  { %v660_v40 = vpop.xlane.xlu1 %659  ;;  %744 = vadd.xlane.f32.xlu1 %v743_v55 }
 0x39c   :  { %v6610_v1 = vsub.f32 %v624_v63, %v692_v3  ;;  %v693_v58 = vmul.f32 0.03125, %v660_v40  ;;  %v746_v61 = vsel %vm636_vm4, %v722_v30, 0.0  ;;  %v723_v47 = vmul.f32 %v6601_v60, %v6601_v60 }
 0x39d   :  { %747 = vadd.xlane.f32.xlu0 %v746_v61  ;;  %v663_v34 = vpop.xlane.xlu0 %662 }
 0x39e   :  { %v6621_v29 = vsub.f32 %v625_v22, %v693_v58  ;;  %v694_v63 = vmul.f32 0.03125, %v663_v34  ;;  %v749_v54 = vsel %vm636_vm4, %v723_v47, 0.0  ;;  %v724_v23 = vmul.f32 %v6610_v1, %v6610_v1 }
 0x39f   :  { %v666_v38 = vpop.xlane.xlu1 %665  ;;  %750 = vadd.xlane.f32.xlu1 %v749_v54 }
 0x3a0   :  { %v6628_v52 = vsub.f32 %v626_v21, %v694_v63  ;;  %v695_v12 = vmul.f32 0.03125, %v666_v38  ;;  %v752_v19 = vsel %vm636_vm4, %v724_v23, 0.0  ;;  %v725_v41 = vmul.f32 %v6621_v29, %v6621_v29 }
 0x3a1   :  { %753 = vadd.xlane.f32.xlu0 %v752_v19  ;;  %v669_v22 = vpop.xlane.xlu0 %668 }
 0x3a2   :  { %v6635_v2 = vsub.f32 %v627_v53, %v695_v12  ;;  %v696_v57 = vmul.f32 0.03125, %v669_v22  ;;  %v755_v10 = vsel %vm636_vm4, %v725_v41, 0.0  ;;  %v726_v6 = vmul.f32 %v6628_v52, %v6628_v52 }
 0x3a3   :  { %v672_v21 = vpop.xlane.xlu1 %671  ;;  %756 = vadd.xlane.f32.xlu1 %v755_v10 }
 0x3a4   :  { %v6644_v56 = vsub.f32 %v628_v13, %v696_v57  ;;  %v697_v42 = vmul.f32 0.03125, %v672_v21  ;;  %v758_v35 = vsel %vm636_vm4, %v726_v6, 0.0  ;;  %v727_v53 = vmul.f32 %v6635_v2, %v6635_v2  ;;  %v6701_v6 = vld [vmem:[%s9459_s8 + $0x4] ss:$0 sm:$0xff] }
 0x3a5   :  { %759 = vadd.xlane.f32.xlu0 %v758_v35  ;;  %v675_v15 = vpop.xlane.xlu0 %674 }
 0x3a6   :  { %v6655_v46 = vsub.f32 %v629_v16, %v697_v42  ;;  %v698_v13 = vmul.f32 0.03125, %v675_v15  ;;  %v761_v43 = vsel %vm636_vm4, %v727_v53, 0.0  ;;  %v728_v51 = vmul.f32 %v6644_v56, %v6644_v56 }
 0x3a7   :  { %762 = vadd.xlane.f32.xlu1 %v761_v43  ;;  %v678_v18 = vpop.xlane.xlu1 %677 }
 0x3a8   :  { %v6662_v9 = vsub.f32 %v630_v28, %v698_v13  ;;  %v699_v37 = vmul.f32 0.03125, %v678_v18  ;;  %v764_v36 = vsel %vm636_vm4, %v728_v51, 0.0  ;;  %v729_v11 = vmul.f32 %v6655_v46, %v6655_v46  ;;  %v6709_v51 = vld [vmem:[%s9459_s8 + $0x5] ss:$0 sm:$0xff] }
 0x3a9   :  { %765 = vadd.xlane.f32.xlu0 %v764_v36  ;;  %v681_v16 = vpop.xlane.xlu0 %680 }
 0x3aa   :  { %v6669_v20 = vsub.f32 %v631_v39, %v699_v37  ;;  %v700_v26 = vmul.f32 0.03125, %v681_v16  ;;  %v767_v50 = vsel %vm636_vm4, %v729_v11, 0.0  ;;  %v730_v25 = vmul.f32 %v6662_v9, %v6662_v9 }
 0x3ab   :  { %768 = vadd.xlane.f32.xlu1 %v767_v50  ;;  %v684_v28 = vpop.xlane.xlu1 %683 }
 0x3ac   :  { %v6678_v14 = vsub.f32 %v632_v32, %v700_v26  ;;  %v701_v27 = vmul.f32 0.03125, %v684_v28  ;;  %v770_v0 = vsel %vm636_vm4, %v730_v25, 0.0  ;;  %v731_v39 = vmul.f32 %v6669_v20, %v6669_v20 }
 0x3ad   :  { %771 = vadd.xlane.f32.xlu0 %v770_v0 }
 0x3ae   :  { %v6689_v44 = vsub.f32 %v633_v5, %v701_v27  ;;  %v773_v24 = vsel %vm636_vm4, %v731_v39, 0.0  ;;  %v732_v32 = vmul.f32 %v6678_v14, %v6678_v14 }
 0x3af   :  { %774 = vadd.xlane.f32.xlu1 %v773_v24 }
 0x3b0   :  { %v776_v45 = vsel %vm636_vm4, %v732_v32, 0.0  ;;  %v733_v17 = vmul.f32 %v6689_v44, %v6689_v44 }
 0x3b1   :  { %777 = vadd.xlane.f32.xlu0 %v776_v45 }
 0x3b2   :  { %v779_v31 = vsel %vm636_vm4, %v733_v17, 0.0 }
 0x3b3   :  { %780 = vadd.xlane.f32.xlu1 %v779_v31 }
 0x422   :  { %v736_v59 = vpop.xlane.xlu0 %735 }
 0x423   :  { %v782_v3 = vmul.f32 0.03125, %v736_v59 }
 0x424   :  { %v739_v62 = vpop.xlane.xlu1 %738 }
 0x425   :  { %v798_v5 = vadd.f32 1e-05, %v782_v3  ;;  %v783_v55 = vmul.f32 0.03125, %v739_v62 }
 0x426   :  { %v742_v30 = vpop.xlane.xlu0 %741 }
 0x427   :  { %5784 = vrsqrt.f32 %v798_v5  ;;  %v799_v40 = vadd.f32 1e-05, %v783_v55  ;;  %v784_v58 = vmul.f32 0.03125, %v742_v30 }
 0x428   :  { %v745_v61 = vpop.xlane.xlu1 %744 }
 0x429   :  { %5786 = vrsqrt.f32 %v799_v40  ;;  %v800_v47 = vadd.f32 1e-05, %v784_v58  ;;  %v785_v34 = vmul.f32 0.03125, %v745_v61 }
 0x42a   :  { %v748_v63 = vpop.xlane.xlu0 %747 }
 0x42b   :  { %5788 = vrsqrt.f32 %v800_v47  ;;  %v801_v54 = vadd.f32 1e-05, %v785_v34  ;;  %v786_v23 = vmul.f32 0.03125, %v748_v63 }
 0x42c   :  { %v751_v38 = vpop.xlane.xlu1 %750 }
 0x42d   :  { %5790 = vrsqrt.f32 %v801_v54  ;;  %v787_v12 = vmul.f32 0.03125, %v751_v38  ;;  %v802_v19 = vadd.f32 1e-05, %v786_v23 }
 0x42e   :  { %v754_v22 = vpop.xlane.xlu0 %753 }
 0x42f   :  { %v803_v41 = vadd.f32 1e-05, %v787_v12  ;;  %v788_v53 = vmul.f32 0.03125, %v754_v22 }
 0x430   :  { %v757_v57 = vpop.xlane.xlu1 %756 }
 0x431   :  { %v5785_v10 = vpop.eup %5784  ;;  %5792 = vrsqrt.f32 %v803_v41  ;;  %v789_v21 = vmul.f32 0.03125, %v757_v57  ;;  %v804_v16 = vadd.f32 1e-05, %v788_v53 }
 0x432   :  { %v830_v42 = vmul.f32 %v5785_v10, %v6566_v7  ;;  %5794 = vrsqrt.f32 %v802_v19  ;;  %v760_v25 = vpop.xlane.xlu0 %759 }
 0x433   :  { %v5787_v35 = vpop.eup %5786  ;;  %v805_v18 = vadd.f32 1e-05, %v789_v21  ;;  %v790_v24 = vmul.f32 0.03125, %v760_v25 }
 0x434   :  { %v852_v15 = vmul.f32 %v6701_v6, %v830_v42  ;;  %v831_v13 = vmul.f32 %v5787_v35, %v6570_v8  ;;  %v763_v36 = vpop.xlane.xlu1 %762 }
 0x435   :  { %v5789_v43 = vpop.eup %5788  ;;  %5796 = vrsqrt.f32 %v805_v18  ;;  %v791_v28 = vmul.f32 0.03125, %v763_v36  ;;  %v806_v59 = vadd.f32 1e-05, %v790_v24 }
 0x436   :  { %v853_v37 = vmul.f32 %v6701_v6, %v831_v13  ;;  %v874_v7 = vadd.f32 %v6709_v51, %v852_v15  ;;  %v832_v50 = vmul.f32 %v5789_v43, %v6578_v33  ;;  %5798 = vrsqrt.f32 %v804_v16  ;;  %v766_v62 = vpop.xlane.xlu0 %765 }
 0x437   :  { %v5791_v11 = vpop.eup %5790  ;;  %v807_v17 = vadd.f32 1e-05, %v791_v28  ;;  %v792_v61 = vmul.f32 0.03125, %v766_v62 }
 0x438   :  { %v875_v26 = vadd.f32 %v6709_v51, %v853_v37  ;;  %v833_v8 = vmul.f32 %v5791_v11, %v6587_v49  ;;  %v854_v32 = vmul.f32 %v6701_v6, %v832_v50  ;;  %v769_v49 = vpop.xlane.xlu1 %768 }
 0x439   :  { %5800 = vrsqrt.f32 %v807_v17  ;;  %v793_v55 = vmul.f32 0.03125, %v769_v49  ;;  %v808_v23 = vadd.f32 1e-05, %v792_v61 }
 0x43a   :  { %v1063_v27 = vpack.c.bf16 %v875_v26, %v874_v7  ;;  %v855_v0 = vmul.f32 %v6701_v6, %v833_v8  ;;  %v876_v5 = vadd.f32 %v6709_v51, %v854_v32  ;;  %5802 = vrsqrt.f32 %v806_v59  ;;  %v772_v12 = vpop.xlane.xlu0 %771 }
 0x43b   :  { %v5793_v39 = vpop.eup %5792  ;;  %v809_v34 = vadd.f32 1e-05, %v793_v55  ;;  %v794_v21 = vmul.f32 0.03125, %v772_v12 }
 0x43c   :  { %4915 = vmatmul.mubr.msk.bf16.vlgmr.msra.gmra.mrb[20].mxu0 %vm636_vm4, %v1063_v27  ;;  %4923 = vmatmul.mubr.msk.bf16.vlgmr.msra.gmra.mrb[28].mxu1 %vm636_vm4, %v1063_v27  ;;  %v5795_v45 = vpop.eup %5794  ;;  %v835_v33 = vmul.f32 %v5793_v39, %v6601_v60  ;;  %v877_v31 = vadd.f32 %v6709_v51, %v855_v0  ;;  %v775_v63 = vpop.xlane.xlu1 %774 }
 0x43d   :  { %1491 = vmatprep.mubr.bf16.mxu0 %v5880_v48  ;;  %1604 = vmatprep.mubr.bf16.mxu1 %v5880_v48  ;;  %v834_v3 = vmul.f32 %v5795_v45, %v6594_v4  ;;  %5804 = vrsqrt.f32 %v809_v34  ;;  %v795_v41 = vmul.f32 0.03125, %v775_v63  ;;  %v810_v13 = vadd.f32 1e-05, %v794_v21 }
 0x43e   :  { %v1064_v30 = vpack.c.bf16 %v877_v31, %v876_v5  ;;  %v857_v40 = vmul.f32 %v6701_v6, %v835_v33  ;;  %5806 = vrsqrt.f32 %v808_v23  ;;  %v778_v18 = vpop.xlane.xlu0 %777 }
 0x43f   :  { %v5797_v58 = vpop.eup %5796  ;;  %v856_v60 = vmul.f32 %v6701_v6, %v834_v3  ;;  %v811_v35 = vadd.f32 1e-05, %v795_v41  ;;  %v796_v26 = vmul.f32 0.03125, %v778_v18 }
 0x440   :  { %v5799_v47 = vpop.eup %5798  ;;  %v837_v4 = vmul.f32 %v5797_v58, %v6621_v29  ;;  %v879_v54 = vadd.f32 %v6709_v51, %v857_v40  ;;  %v781_v53 = vpop.xlane.xlu1 %780 }
 0x441   :  { %v836_v38 = vmul.f32 %v5799_v47, %v6610_v1  ;;  %v878_v19 = vadd.f32 %v6709_v51, %v856_v60  ;;  %5808 = vrsqrt.f32 %v811_v35  ;;  %v797_v36 = vmul.f32 0.03125, %v781_v53 }
 0x442   :  { %v859_v57 = vmul.f32 %v6701_v6, %v837_v4  ;;  %5810 = vrsqrt.f32 %v810_v13  ;;  %v812_v28 = vadd.f32 1e-05, %v796_v26  ;;  %v1677_v47 = vlaneseq }
 0x443   :  { %v1065_v22 = vpack.c.bf16 %v879_v54, %v878_v19  ;;  %v5801_v10 = vpop.eup %5800  ;;  %v858_v29 = vmul.f32 %v6701_v6, %v836_v38  ;;  %v813_v8 = vadd.f32 1e-05, %v797_v36 }
 0x444   :  { %4916 = vmatmul.mubr.msk.bf16.gmra.mrb[24].mxu0 %vm636_vm4, %v1064_v30  ;;  %4924 = vmatmul.mubr.msk.bf16.gmra.mrb[32].mxu1 %vm636_vm4, %v1064_v30  ;;  %v5803_v42 = vpop.eup %5802  ;;  %v839_v1 = vmul.f32 %v5801_v10, %v6635_v2  ;;  %v881_v15 = vadd.f32 %v6709_v51, %v859_v57  ;;  %v1678_v34 = vshrl.u32 %v1677_v47, 7 }
 0x445   :  { %1501 = vmatprep.mubr.bf16.mxu0 %v5880_v48  ;;  %1614 = vmatprep.mubr.bf16.mxu1 %v5880_v48  ;;  %v838_v43 = vmul.f32 %v5803_v42, %v6628_v52  ;;  %v880_v37 = vadd.f32 %v6709_v51, %v858_v29  ;;  %5812 = vrsqrt.f32 %v813_v8 }
 0x446   :  { %v861_v16 = vmul.f32 %v6701_v6, %v839_v1  ;;  %5814 = vrsqrt.f32 %v812_v28  ;;  %v6786_v4 = vsub.s32 0, %v1678_v34  ;;  %v6791_v63 = vsub.s32 2, %v1678_v34 }
 0x447   :  { %v1066_v11 = vpack.c.bf16 %v881_v15, %v880_v37  ;;  %v5805_v7 = vpop.eup %5804  ;;  %v860_v2 = vmul.f32 %v6701_v6, %v838_v43  ;;  %v6795_v54 = vsub.s32 3, %v1678_v34 }
 0x448   :  { %v5807_v50 = vpop.eup %5806  ;;  %v841_v52 = vmul.f32 %v5805_v7, %v6655_v46  ;;  %v883_v25 = vadd.f32 %v6709_v51, %v861_v16  ;;  %9676 = vst [vmem:[#allocation2_spill] sm:$0xff] %v6786_v4  ;;  %9677 = vst [vmem:[#allocation3_spill] sm:$0xff] %v6791_v63 }
 0x449   :  { %v840_v27 = vmul.f32 %v5807_v50, %v6644_v56  ;;  %v882_v0 = vadd.f32 %v6709_v51, %v860_v2  ;;  %9679 = vst [vmem:[#allocation5_spill] sm:$0xff] %v6795_v54 }
 0x44a   :  { %v863_v24 = vmul.f32 %v6701_v6, %v841_v52 }
 0x44b   :  { %v1067_v39 = vpack.c.bf16 %v883_v25, %v882_v0  ;;  %v5809_v32 = vpop.eup %5808  ;;  %v862_v45 = vmul.f32 %v6701_v6, %v840_v27 }
 0x44c   :  { %4917 = vmatmul.mubr.msk.bf16.gmra.mrb[28].mxu0 %vm636_vm4, %v1065_v22  ;;  %4925 = vmatmul.mubr.msk.bf16.gmra.mrb[36].mxu1 %vm636_vm4, %v1065_v22  ;;  %v5811_v46 = vpop.eup %5810  ;;  %v843_v56 = vmul.f32 %v5809_v32, %v6669_v20  ;;  %v885_v17 = vadd.f32 %v6709_v51, %v863_v24 }
 0x44d   :  { %1511 = vmatprep.mubr.bf16.mxu0 %v5880_v48  ;;  %1624 = vmatprep.mubr.bf16.mxu1 %v5880_v48  ;;  %v842_v33 = vmul.f32 %v5811_v46, %v6662_v9  ;;  %v884_v49 = vadd.f32 %v6709_v51, %v862_v45 }
 0x44e   :  { %v865_v59 = vmul.f32 %v6701_v6, %v843_v56 }
 0x44f   :  { %v1068_v31 = vpack.c.bf16 %v885_v17, %v884_v49  ;;  %v5813_v3 = vpop.eup %5812  ;;  %v864_v62 = vmul.f32 %v6701_v6, %v842_v33 }
 0x450   :  { %v5815_v5 = vpop.eup %5814  ;;  %v845_v20 = vmul.f32 %v5813_v3, %v6689_v44  ;;  %v887_v9 = vadd.f32 %v6709_v51, %v865_v59 }
 0x451   :  { %v844_v55 = vmul.f32 %v5815_v5, %v6678_v14  ;;  %v886_v30 = vadd.f32 %v6709_v51, %v864_v62 }
 0x452   :  { %v867_v58 = vmul.f32 %v6701_v6, %v845_v20 }
 0x453   :  { %v1069_v40 = vpack.c.bf16 %v887_v9, %v886_v30  ;;  %v866_v61 = vmul.f32 %v6701_v6, %v844_v55  ;;  %v1675_v6 = vld [vmem:[%s9459_s8 + $0x7] sm:$0xf] }
 0x454   :  { %4918 = vmatmul.mubr.msk.bf16.gmra.mrb[32].mxu0 %vm636_vm4, %v1066_v11  ;;  %4926 = vmatmul.mubr.msk.bf16.gmra.mrb[40].mxu1 %vm636_vm4, %v1066_v11  ;;  %v889_v44 = vadd.f32 %v6709_v51, %v867_v58  ;;  %v6801_v23 = vrot.slane %v1675_v6, %v6791_v63  ;;  %v6807_v41 = vrot.slane %v1675_v6, %v6795_v54 }
 0x455   :  { %1521 = vmatprep.mubr.bf16.mxu0 %v5880_v48  ;;  %1634 = vmatprep.mubr.bf16.mxu1 %v5880_v48  ;;  %v888_v60 = vadd.f32 %v6709_v51, %v866_v61  ;;  %v6798_v51 = vrot.slane %v1675_v6, %v6786_v4 }
 0x457   :  { %v1070_v14 = vpack.c.bf16 %v889_v44, %v888_v60 }
 0x45c   :  { %4919 = vmatmul.mubr.msk.bf16.gmra.mrb[36].mxu0 %vm636_vm4, %v1067_v39  ;;  %4927 = vmatmul.mubr.msk.bf16.gmra.mrb[44].mxu1 %vm636_vm4, %v1067_v39 }
 0x45d   :  { %1531 = vmatprep.mubr.bf16.mxu0 %v5880_v48  ;;  %1644 = vmatprep.mubr.bf16.mxu1 %v5880_v48 }
 0x464   :  { %4920 = vmatmul.mubr.msk.bf16.gmra.mrb[40].mxu0 %vm636_vm4, %v1068_v31  ;;  %4928 = vmatmul.mubr.msk.bf16.gmra.mrb[48].mxu1 %vm636_vm4, %v1068_v31 }
 0x465   :  { %1541 = vmatprep.mubr.bf16.mxu0 %v5880_v48  ;;  %1654 = vmatprep.mubr.bf16.mxu1 %v5880_v48 }
 0x46c   :  { %4921 = vmatmul.mubr.msk.bf16.gmra.mrb[44].mxu0 %vm636_vm4, %v1069_v40  ;;  %4929 = vmatmul.mubr.msk.bf16.gmra.mrb[52].mxu1 %vm636_vm4, %v1069_v40 }
 0x46d   :  { %1551 = vmatprep.mubr.bf16.mxu0 %v5880_v48  ;;  %1664 = vmatprep.mubr.bf16.mxu1 %v5880_v48  ;;  %v6793_v48 = vsub.s32 1, %v1678_v34 }
 0x46f   :  { %9678 = vst [vmem:[#allocation4_spill] sm:$0xff] %v6793_v48  ;;  %v6804_v38 = vrot.slane %v1675_v6, %v6793_v48 }
 0x474   :  { %4922 = vmatmul.mubr.msk.bf16.gmra.mrb[48].mxu0 %vm636_vm4, %v1070_v14  ;;  %4930 = vmatmul.mubr.msk.bf16.gmra.mrb[56].mxu1 %vm636_vm4, %v1070_v14 }
 0x50f   :  { %v1483_v12 = vpop.f32.mrb[20].mxu0  ;;  %v1596_v19 = vpop.f32.mrb[28].mxu1 }
 0x510   :  { %v6810_v22 = vadd.f32 %v6798_v51, %v1483_v12  ;;  %v1485_v57 = vpop.f32.mrb[21].mxu0  ;;  %v1598_v10 = vpop.f32.mrb[29].mxu1  ;;  %v6813_v21 = vadd.f32 %v6801_v23, %v1596_v19 }
 0x511   :  { %v6816_v29 = vadd.f32 %v6804_v38, %v1485_v57  ;;  %v1487_v42 = vpop.f32.mrb[22].mxu0  ;;  %v1600_v35 = vpop.f32.mrb[30].mxu1  ;;  %v6824_v18 = vadd.f32 %v6807_v41, %v1598_v10 }
 0x512   :  { %v9500_v1 = vmax.f32 %v6810_v22, 0.0  ;;  %v6820_v53 = vadd.f32 %v6798_v51, %v1487_v42  ;;  %v1489_v15 = vpop.f32.mrb[23].mxu0  ;;  %v1602_v13 = vpop.f32.mrb[31].mxu1  ;;  %v6827_v37 = vadd.f32 %v6801_v23, %v1600_v35  ;;  %v9498_v16 = vmax.f32 %v6813_v21, 0.0 }
 0x513   :  { %v9499_v43 = vmax.f32 %v6816_v29, 0.0  ;;  %v6830_v36 = vadd.f32 %v6804_v38, %v1489_v15  ;;  %v6840_v2 = vadd.f32 %v6807_v41, %v1602_v13  ;;  %v9495_v50 = vmax.f32 %v6824_v18, 0.0 }
 0x514   :  { %v9491_v11 = vmax.f32 %v6820_v53, 0.0  ;;  %v9489_v8 = vmax.f32 %v6827_v37, 0.0 }
 0x515   :  { %v1827_v7 = vadd.f32 %v9499_v43, %v9500_v1  ;;  %v9490_v26 = vmax.f32 %v6830_v36, 0.0  ;;  %v9485_v49 = vmax.f32 %v6840_v2, 0.0 }
 0x517   :  { %v1832_v52 = vadd.f32 %v9490_v26, %v9491_v11  ;;  %v1493_v25 = vpop.f32.mrb[24].mxu0  ;;  %v1606_v28 = vpop.f32.mrb[32].mxu1  ;;  %v1828_v27 = vadd.f32 %v1827_v7, %v9498_v16 }
 0x518   :  { %v6851_v0 = vadd.f32 %v6798_v51, %v1493_v25  ;;  %v1495_v39 = vpop.f32.mrb[25].mxu0  ;;  %v1608_v24 = vpop.f32.mrb[33].mxu1  ;;  %v6854_v32 = vadd.f32 %v6801_v23, %v1606_v28 }
 0x519   :  { %v6857_v45 = vadd.f32 %v6804_v38, %v1495_v39  ;;  %v1497_v46 = vpop.f32.mrb[26].mxu0  ;;  %v1610_v56 = vpop.f32.mrb[34].mxu1  ;;  %v1829_v17 = vadd.f32 %v1828_v27, %v9495_v50  ;;  %v1833_v33 = vadd.f32 %v1832_v52, %v9489_v8  ;;  %v6870_v20 = vadd.f32 %v6807_v41, %v1608_v24 }
 0x51a   :  { %v9484_v31 = vmax.f32 %v6851_v0, 0.0  ;;  %v6866_v59 = vadd.f32 %v6798_v51, %v1497_v46  ;;  %v1499_v3 = vpop.f32.mrb[27].mxu0  ;;  %v1612_v62 = vpop.f32.mrb[35].mxu1  ;;  %v6873_v9 = vadd.f32 %v6801_v23, %v1610_v56  ;;  %v9482_v58 = vmax.f32 %v6854_v32, 0.0 }
 0x51b   :  { %v9483_v5 = vmax.f32 %v6857_v45, 0.0  ;;  %v6876_v55 = vadd.f32 %v6804_v38, %v1499_v3  ;;  %1830 = vadd.xlane.f32.xlu0 %v1829_v17  ;;  %v1834_v40 = vadd.f32 %v1833_v33, %v9485_v49  ;;  %v6888_v60 = vadd.f32 %v6807_v41, %v1612_v62 }
 0x51c   :  { %v9475_v30 = vmax.f32 %v6866_v59, 0.0  ;;  %v9479_v14 = vmax.f32 %v6870_v20, 0.0  ;;  %v9473_v47 = vmax.f32 %v6873_v9, 0.0 }
 0x51d   :  { %v1837_v61 = vadd.f32 %v9483_v5, %v9484_v31  ;;  %v9474_v44 = vmax.f32 %v6876_v55, 0.0  ;;  %1835 = vadd.xlane.f32.xlu1 %v1834_v40  ;;  %v9469_v28 = vmax.f32 %v6888_v60, 0.0 }
 0x51f   :  { %v1842_v34 = vadd.f32 %v9474_v44, %v9475_v30  ;;  %v1503_v6 = vpop.f32.mrb[28].mxu0  ;;  %v1616_v12 = vpop.f32.mrb[36].mxu1  ;;  %v1838_v19 = vadd.f32 %v1837_v61, %v9482_v58 }
 0x520   :  { %v6899_v57 = vadd.f32 %v6798_v51, %v1503_v6  ;;  %v1505_v10 = vpop.f32.mrb[29].mxu0  ;;  %v1618_v42 = vpop.f32.mrb[37].mxu1  ;;  %v6902_v35 = vadd.f32 %v6801_v23, %v1616_v12 }
 0x521   :  { %v6905_v15 = vadd.f32 %v6804_v38, %v1505_v10  ;;  %v1507_v13 = vpop.f32.mrb[30].mxu0  ;;  %v1620_v7 = vpop.f32.mrb[38].mxu1  ;;  %v1839_v52 = vadd.f32 %v1838_v19, %v9479_v14  ;;  %v1843_v25 = vadd.f32 %v1842_v34, %v9473_v47  ;;  %v6918_v17 = vadd.f32 %v6807_v41, %v1618_v42 }
 0x522   :  { %v9468_v27 = vmax.f32 %v6899_v57, 0.0  ;;  %v6914_v39 = vadd.f32 %v6798_v51, %v1507_v13  ;;  %v1509_v24 = vpop.f32.mrb[31].mxu0  ;;  %v1622_v46 = vpop.f32.mrb[39].mxu1  ;;  %v6921_v33 = vadd.f32 %v6801_v23, %v1620_v7  ;;  %v9472_v61 = vmax.f32 %v6902_v35, 0.0 }
 0x523   :  { %v9467_v56 = vmax.f32 %v6905_v15, 0.0  ;;  %v6924_v3 = vadd.f32 %v6804_v38, %v1509_v24  ;;  %1840 = vadd.xlane.f32.xlu0 %v1839_v52  ;;  %v1844_v40 = vadd.f32 %v1843_v25, %v9469_v28  ;;  %v6936_v12 = vadd.f32 %v6807_v41, %v1622_v46 }
 0x524   :  { %v9471_v62 = vmax.f32 %v6914_v39, 0.0  ;;  %v9477_v19 = vmax.f32 %v6918_v17, 0.0  ;;  %v9476_v10 = vmax.f32 %v6921_v33, 0.0 }
 0x525   :  { %v1847_v34 = vadd.f32 %v9467_v56, %v9468_v27  ;;  %v9470_v6 = vmax.f32 %v6924_v3, 0.0  ;;  %1845 = vadd.xlane.f32.xlu1 %v1844_v40 }
 0x527   :  { %v1852_v42 = vadd.f32 %v9470_v6, %v9471_v62  ;;  %v1513_v13 = vpop.f32.mrb[32].mxu0  ;;  %v1626_v7 = vpop.f32.mrb[40].mxu1  ;;  %v1848_v52 = vadd.f32 %v1847_v34, %v9472_v61  ;;  %v9478_v34 = vmax.f32 %v6936_v12, 0.0 }
 0x528   :  { %v6947_v25 = vadd.f32 %v6798_v51, %v1513_v13  ;;  %v1515_v24 = vpop.f32.mrb[33].mxu0  ;;  %v1628_v46 = vpop.f32.mrb[41].mxu1  ;;  %v6950_v40 = vadd.f32 %v6801_v23, %v1626_v7 }
 0x529   :  { %v6953_v56 = vadd.f32 %v6804_v38, %v1515_v24  ;;  %v1517_v27 = vpop.f32.mrb[34].mxu0  ;;  %v1630_v28 = vpop.f32.mrb[42].mxu1  ;;  %v1849_v6 = vadd.f32 %v1848_v52, %v9477_v19  ;;  %v1853_v62 = vadd.f32 %v1852_v42, %v9476_v10  ;;  %v6966_v44 = vadd.f32 %v6807_v41, %v1628_v46 }
 0x52a   :  { %v9481_v13 = vmax.f32 %v6947_v25, 0.0  ;;  %v6962_v61 = vadd.f32 %v6798_v51, %v1517_v27  ;;  %v1519_v7 = vpop.f32.mrb[35].mxu0  ;;  %v1632_v47 = vpop.f32.mrb[43].mxu1  ;;  %v6969_v30 = vadd.f32 %v6801_v23, %v1630_v28  ;;  %v9488_v10 = vmax.f32 %v6950_v40, 0.0 }
 0x52b   :  { %v9480_v24 = vmax.f32 %v6953_v56, 0.0  ;;  %v6972_v52 = vadd.f32 %v6804_v38, %v1519_v7  ;;  %1850 = vadd.xlane.f32.xlu0 %v1849_v6  ;;  %v1854_v27 = vadd.f32 %v1853_v62, %v9478_v34  ;;  %v6984_v28 = vadd.f32 %v6807_v41, %v1632_v47 }
 0x52c   :  { %v9487_v42 = vmax.f32 %v6962_v61, 0.0  ;;  %v9493_v6 = vmax.f32 %v6966_v44, 0.0  ;;  %v9492_v7 = vmax.f32 %v6969_v30, 0.0 }
 0x52d   :  { %v1857_v46 = vadd.f32 %v9480_v24, %v9481_v13  ;;  %v9486_v19 = vmax.f32 %v6972_v52, 0.0  ;;  %1855 = vadd.xlane.f32.xlu1 %v1854_v27 }
 0x52f   :  { %v1862_v62 = vadd.f32 %v9486_v19, %v9487_v42  ;;  %v1523_v34 = vpop.f32.mrb[36].mxu0  ;;  %v1636_v14 = vpop.f32.mrb[44].mxu1  ;;  %v1858_v24 = vadd.f32 %v1857_v46, %v9488_v10  ;;  %v9494_v46 = vmax.f32 %v6984_v28, 0.0 }
 0x530   :  { %v6995_v13 = vadd.f32 %v6798_v51, %v1523_v34  ;;  %v1525_v47 = vpop.f32.mrb[37].mxu0  ;;  %v1638_v58 = vpop.f32.mrb[45].mxu1  ;;  %v6998_v27 = vadd.f32 %v6801_v23, %v1636_v14 }
 0x531   :  { %v7001_v5 = vadd.f32 %v6804_v38, %v1525_v47  ;;  %v1527_v31 = vpop.f32.mrb[38].mxu0  ;;  %v1640_v49 = vpop.f32.mrb[46].mxu1  ;;  %v1859_v19 = vadd.f32 %v1858_v24, %v9493_v6  ;;  %v1863_v42 = vadd.f32 %v1862_v62, %v9492_v7  ;;  %v7014_v26 = vadd.f32 %v6807_v41, %v1638_v58 }
 0x532   :  { %v9497_v34 = vmax.f32 %v6995_v13, 0.0  ;;  %v7010_v10 = vadd.f32 %v6798_v51, %v1527_v31  ;;  %v1529_v14 = vpop.f32.mrb[39].mxu0  ;;  %v1642_v8 = vpop.f32.mrb[47].mxu1  ;;  %v7017_v11 = vadd.f32 %v6801_v23, %v1640_v49  ;;  %v9505_v7 = vmax.f32 %v6998_v27, 0.0 }
 0x533   :  { %v9496_v47 = vmax.f32 %v7001_v5, 0.0  ;;  %v7020_v24 = vadd.f32 %v6804_v38, %v1529_v14  ;;  %1860 = vadd.xlane.f32.xlu0 %v1859_v19  ;;  %v1864_v31 = vadd.f32 %v1863_v42, %v9494_v46  ;;  %v7032_v49 = vadd.f32 %v6807_v41, %v1642_v8 }
 0x534   :  { %9680 = vst [vmem:[#allocation6_spill] sm:$0xff] %v7017_v11  ;;  %v9502_v62 = vmax.f32 %v7010_v10, 0.0  ;;  %v9512_v19 = vmax.f32 %v7014_v26, 0.0 }
 0x535   :  { %v1867_v58 = vadd.f32 %v9496_v47, %v9497_v34  ;;  %v9501_v6 = vmax.f32 %v7020_v24, 0.0  ;;  %9681 = vst [vmem:[#allocation7_spill] sm:$0xff] %v7032_v49  ;;  %1865 = vadd.xlane.f32.xlu1 %v1864_v31 }
 0x537   :  { %v1872_v42 = vadd.f32 %v9501_v6, %v9502_v62  ;;  %v1533_v46 = vpop.f32.mrb[40].mxu0  ;;  %v1646_v50 = vpop.f32.mrb[48].mxu1  ;;  %v1868_v47 = vadd.f32 %v1867_v58, %v9505_v7  ;;  %v9685_v62 = vmax.f32 %v7017_v11, 0.0  ;;  %v9513_v58 = vmax.f32 %v7032_v49, 0.0 }
 0x538   :  { %v7043_v34 = vadd.f32 %v6798_v51, %v1533_v46  ;;  %v1535_v8 = vpop.f32.mrb[41].mxu0  ;;  %v1648_v16 = vpop.f32.mrb[49].mxu1  ;;  %v7046_v31 = vadd.f32 %v6801_v23, %v1646_v50 }
 0x539   :  { %v7049_v43 = vadd.f32 %v6804_v38, %v1535_v8  ;;  %v1537_v1 = vpop.f32.mrb[42].mxu0  ;;  %v1650_v14 = vpop.f32.mrb[50].mxu1  ;;  %v1869_v6 = vadd.f32 %v1868_v47, %v9512_v19  ;;  %v1873_v63 = vadd.f32 %v1872_v42, %v9685_v62  ;;  %v7062_v4 = vadd.f32 %v6807_v41, %v1648_v16 }
 0x53a   :  { %9682 = vst [vmem:[#allocation8_spill] sm:$0xff] %v7043_v34  ;;  %9683 = vst [vmem:[#allocation9_spill] sm:$0xff] %v7046_v31  ;;  %v9516_v46 = vmax.f32 %v7043_v34, 0.0  ;;  %v7058_v7 = vadd.f32 %v6798_v51, %v1537_v1  ;;  %v1539_v50 = vpop.f32.mrb[43].mxu0  ;;  %v1652_v54 = vpop.f32.mrb[51].mxu1  ;;  %v7065_v48 = vadd.f32 %v6801_v23, %v1650_v14 }
 0x53b   :  { %9684 = vst [vmem:[#allocation10_spill] sm:$0xff] %v7049_v43  ;;  %v9515_v8 = vmax.f32 %v7049_v43, 0.0  ;;  %9687 = vst [vmem:[#allocation12_spill] sm:$0xff] %v7062_v4  ;;  %v7068_v47 = vadd.f32 %v6804_v38, %v1539_v50  ;;  %1870 = vadd.xlane.f32.xlu0 %v1869_v6  ;;  %v1874_v1 = vadd.f32 %v1873_v63, %v9513_v58  ;;  %v9691_v43 = vmax.f32 %v7046_v31, 0.0 }
 0x53c   :  { %9686 = vst [vmem:[#allocation11_spill] sm:$0xff] %v7058_v7  ;;  %9688 = vst [vmem:[#allocation13_spill] sm:$0xff] %v7065_v48  ;;  %v9520_v62 = vmax.f32 %v7058_v7, 0.0  ;;  %v7080_v14 = vadd.f32 %v6807_v41, %v1652_v54 }
 0x53d   :  { %9689 = vst [vmem:[#allocation14_spill] sm:$0xff] %v7068_v47  ;;  %v1877_v16 = vadd.f32 %v9515_v8, %v9516_v46  ;;  %v9519_v19 = vmax.f32 %v7068_v47, 0.0  ;;  %1875 = vadd.xlane.f32.xlu1 %v1874_v1  ;;  %v9696_v47 = vmax.f32 %v7065_v48, 0.0 }
 0x53e   :  { %9690 = vst [vmem:[#allocation15_spill] sm:$0xff] %v7080_v14 }
 0x53f   :  { %v1882_v63 = vadd.f32 %v9519_v19, %v9520_v62  ;;  %v1543_v58 = vpop.f32.mrb[44].mxu0  ;;  %v1656_v42 = vpop.f32.mrb[52].mxu1  ;;  %v1878_v8 = vadd.f32 %v1877_v16, %v9691_v43  ;;  %v9695_v19 = vmax.f32 %v7062_v4, 0.0  ;;  %v9526_v43 = vmax.f32 %v7080_v14, 0.0 }
 0x540   :  { %v7091_v46 = vadd.f32 %v6798_v51, %v1543_v58  ;;  %v1545_v54 = vpop.f32.mrb[45].mxu0  ;;  %v1658_v34 = vpop.f32.mrb[53].mxu1  ;;  %v7094_v1 = vadd.f32 %v6801_v23, %v1656_v42 }
 0x541   :  { %v7097_v50 = vadd.f32 %v6804_v38, %v1545_v54  ;;  %v1547_v6 = vpop.f32.mrb[46].mxu0  ;;  %v1660_v7 = vpop.f32.mrb[54].mxu1  ;;  %v1879_v62 = vadd.f32 %v1878_v8, %v9695_v19  ;;  %v1883_v31 = vadd.f32 %v1882_v63, %v9696_v47  ;;  %v7110_v11 = vadd.f32 %v6807_v41, %v1658_v34 }
 0x542   :  { %9692 = vst [vmem:[#allocation16_spill] sm:$0xff] %v7091_v46  ;;  %9693 = vst [vmem:[#allocation17_spill] sm:$0xff] %v7094_v1  ;;  %v9529_v58 = vmax.f32 %v7091_v46, 0.0  ;;  %v7106_v16 = vadd.f32 %v6798_v51, %v1547_v6  ;;  %v1549_v42 = vpop.f32.mrb[47].mxu0  ;;  %v1662_v49 = vpop.f32.mrb[55].mxu1  ;;  %v7113_v4 = vadd.f32 %v6801_v23, %v1660_v7 }
 0x543   :  { %9694 = vst [vmem:[#allocation18_spill] sm:$0xff] %v7097_v50  ;;  %v9528_v54 = vmax.f32 %v7097_v50, 0.0  ;;  %9698 = vst [vmem:[#allocation20_spill] sm:$0xff] %v7110_v11  ;;  %v7116_v19 = vadd.f32 %v6804_v38, %v1549_v42  ;;  %1880 = vadd.xlane.f32.xlu0 %v1879_v62  ;;  %v1884_v47 = vadd.f32 %v1883_v31, %v9526_v43  ;;  %v9700_v50 = vmax.f32 %v7094_v1, 0.0 }
 0x544   :  { %9697 = vst [vmem:[#allocation19_spill] sm:$0xff] %v7106_v16  ;;  %v9533_v8 = vmax.f32 %v7106_v16, 0.0  ;;  %v7128_v7 = vadd.f32 %v6807_v41, %v1662_v49 }
 0x545   :  { %9699 = vst [vmem:[#allocation21_spill] sm:$0xff] %v7116_v19  ;;  %v1887_v34 = vadd.f32 %v9528_v54, %v9529_v58  ;;  %v9532_v63 = vmax.f32 %v7116_v19, 0.0  ;;  %1885 = vadd.xlane.f32.xlu1 %v1884_v47  ;;  %v9702_v19 = vmax.f32 %v7113_v4, 0.0 }
 0x547   :  { %v1892_v31 = vadd.f32 %v9532_v63, %v9533_v8  ;;  %v1553_v43 = vpop.f32.mrb[48].mxu0  ;;  %v1666_v6 = vpop.f32.mrb[56].mxu1  ;;  %v1888_v54 = vadd.f32 %v1887_v34, %v9700_v50  ;;  %v9701_v63 = vmax.f32 %v7110_v11, 0.0  ;;  %v9547_v50 = vmax.f32 %v7128_v7, 0.0 }
 0x548   :  { %v7139_v58 = vadd.f32 %v6798_v51, %v1553_v43  ;;  %v1555_v49 = vpop.f32.mrb[49].mxu0  ;;  %v1668_v46 = vpop.f32.mrb[57].mxu1  ;;  %v7142_v47 = vadd.f32 %v6801_v23, %v1666_v6 }
 0x549   :  { %v7145_v42 = vadd.f32 %v6804_v38, %v1555_v49  ;;  %v1557_v62 = vpop.f32.mrb[50].mxu0  ;;  %v1670_v16 = vpop.f32.mrb[58].mxu1  ;;  %v1889_v8 = vadd.f32 %v1888_v54, %v9701_v63  ;;  %v1893_v1 = vadd.f32 %v1892_v31, %v9702_v19  ;;  %v7158_v48 = vadd.f32 %v6807_v41, %v1668_v46 }
 0x54a   :  { %v9546_v43 = vmax.f32 %v7139_v58, 0.0  ;;  %v7154_v34 = vadd.f32 %v6798_v51, %v1557_v62  ;;  %v1559_v6 = vpop.f32.mrb[51].mxu0  ;;  %v1672_v14 = vpop.f32.mrb[59].mxu1  ;;  %v7161_v11 = vadd.f32 %v6801_v23, %v1670_v16  ;;  %v9544_v63 = vmax.f32 %v7142_v47, 0.0 }
 0x54b   :  { %v9545_v49 = vmax.f32 %v7145_v42, 0.0  ;;  %v7164_v54 = vadd.f32 %v6804_v38, %v1559_v6  ;;  %1890 = vadd.xlane.f32.xlu0 %v1889_v8  ;;  %v1894_v51 = vadd.f32 %v1893_v1, %v9547_v50  ;;  %v7176_v23 = vadd.f32 %v6807_v41, %v1672_v14 }
 0x54c   :  { %v9542_v19 = vmax.f32 %v7154_v34, 0.0  ;;  %v9543_v38 = vmax.f32 %v7158_v48, 0.0  ;;  %v9540_v16 = vmax.f32 %v7161_v11, 0.0 }
 0x54d   :  { %v1897_v46 = vadd.f32 %v9545_v49, %v9546_v43  ;;  %v9541_v62 = vmax.f32 %v7164_v54, 0.0  ;;  %1895 = vadd.xlane.f32.xlu1 %v1894_v51  ;;  %v9539_v31 = vmax.f32 %v7176_v23, 0.0  ;;  %v5528_v51 = vld [vmem:[%s9464_s6] ss:$16 sps:$4 sm:$0xff]   ;;  %v9705_v49 = vmax.f32 %v6813_v21, 0.0 }
 0x54f   :  { %v1902_v1 = vadd.f32 %v9541_v62, %v9542_v19  ;;  %v1898_v8 = vadd.f32 %v1897_v46, %v9544_v63  ;;  %v5530_v46 = vld [vmem:[%s9464_s6 + $0x4] ss:$16 sps:$4 sm:$0xff]   ;;  %v5579_v62 = vld [vmem:[%s9464_s6 + $0x108] ss:$16 sps:$4 sm:$0xff]  }
 0x550   :  { %3236 = vmatprep.subr.bf16.mxu0 %v5530_v46  ;;  %v5539_v46 = vld [vmem:[%s9464_s6 + $0x2c] ss:$16 sps:$4 sm:$0xff]   ;;  %v5584_v19 = vld [vmem:[%s9464_s6 + $0x124] ss:$16 sps:$4 sm:$0xff]  }
 0x551   :  { %v1899_v6 = vadd.f32 %v1898_v8, %v9543_v38  ;;  %v1903_v41 = vadd.f32 %v1902_v1, %v9540_v16  ;;  %v5531_v8 = vld [vmem:[%s9464_s6 + $0x8] ss:$16 sps:$4 sm:$0xff]   ;;  %v5533_v1 = vld [vmem:[%s9464_s6 + $0xc] ss:$16 sps:$4 sm:$0xff]   ;;  %3237 = vmatpush1.bf16.msra.mxu0 %v5528_v51  ;;  %v5540_v51 = vld [vmem:[%s9464_s6 + $0x40] ss:$16 sps:$4 sm:$0xff]  }
 0x552   :  { %3462 = vmatprep.subr.bf16.mxu1 %v5533_v1  ;;  %v5545_v1 = vld [vmem:[%s9464_s6 + $0x4c] ss:$16 sps:$4 sm:$0xff]   ;;  %v5546_v16 = vld [vmem:[%s9464_s6 + $0x60] ss:$16 sps:$4 sm:$0xff]  }
 0x553   :  { %1900 = vadd.xlane.f32.xlu0 %v1899_v6  ;;  %v1904_v14 = vadd.f32 %v1903_v41, %v9539_v31  ;;  %v5534_v6 = vld [vmem:[%s9464_s6 + $0x20] ss:$16 sps:$4 sm:$0xff]   ;;  %v5536_v41 = vld [vmem:[%s9464_s6 + $0x24] ss:$16 sps:$4 sm:$0xff]   ;;  %3463 = vmatpush1.bf16.msra.mxu1 %v5531_v8  ;;  %v5543_v8 = vld [vmem:[%s9464_s6 + $0x48] ss:$16 sps:$4 sm:$0xff]  }
 0x554   :  { %3238 = vmatprep.subr.bf16.mxu0 %v5536_v41  ;;  %v5542_v31 = vld [vmem:[%s9464_s6 + $0x44] ss:$16 sps:$4 sm:$0xff]   ;;  %3464 = vmatprep.subr.bf16.mxu1 %v5539_v46  ;;  %v5551_v46 = vld [vmem:[%s9464_s6 + $0x6c] ss:$16 sps:$4 sm:$0xff]  }
 0x555   :  { %1905 = vadd.xlane.f32.xlu1 %v1904_v14  ;;  %v5537_v14 = vld [vmem:[%s9464_s6 + $0x28] ss:$16 sps:$4 sm:$0xff]   ;;  %3239 = vmatpush1.bf16.msra.mxu0 %v5534_v6  ;;  %v5548_v41 = vld [vmem:[%s9464_s6 + $0x64] ss:$16 sps:$4 sm:$0xff]  }
 0x556   :  { %3240 = vmatprep.subr.bf16.mxu0 %v5542_v31  ;;  %v5549_v6 = vld [vmem:[%s9464_s6 + $0x68] ss:$16 sps:$4 sm:$0xff]   ;;  %v5554_v31 = vld [vmem:[%s9464_s6 + $0x84] ss:$16 sps:$4 sm:$0xff]  }
 0x557   :  { %3465 = vmatpush1.bf16.msra.mxu1 %v5537_v14  ;;  %v5557_v14 = vld [vmem:[%s9464_s6 + $0x8c] ss:$16 sps:$4 sm:$0xff]  }
 0x558   :  { %3466 = vmatprep.subr.bf16.mxu1 %v5545_v1  ;;  %v5552_v1 = vld [vmem:[%s9464_s6 + $0x80] ss:$16 sps:$4 sm:$0xff]  }
 0x559   :  { %3241 = vmatpush1.bf16.msra.mxu0 %v5540_v51  ;;  %v5555_v51 = vld [vmem:[%s9464_s6 + $0x88] ss:$16 sps:$4 sm:$0xff]  }
 0x55a   :  { %3242 = vmatprep.subr.bf16.mxu0 %v5548_v41  ;;  %v5563_v41 = vld [vmem:[%s9464_s6 + $0xac] ss:$16 sps:$4 sm:$0xff]  }
 0x55b   :  { %3467 = vmatpush1.bf16.msra.mxu1 %v5543_v8  ;;  %v5560_v8 = vld [vmem:[%s9464_s6 + $0xa4] ss:$16 sps:$4 sm:$0xff]  }
 0x55c   :  { %3468 = vmatprep.subr.bf16.mxu1 %v5551_v46  ;;  %v5558_v46 = vld [vmem:[%s9464_s6 + $0xa0] ss:$16 sps:$4 sm:$0xff]  }
 0x55d   :  { %3243 = vmatpush1.bf16.msra.mxu0 %v5546_v16  ;;  %v5561_v16 = vld [vmem:[%s9464_s6 + $0xa8] ss:$16 sps:$4 sm:$0xff]  }
 0x55e   :  { %3244 = vmatprep.subr.bf16.mxu0 %v5554_v31  ;;  %v5569_v31 = vld [vmem:[%s9464_s6 + $0xcc] ss:$16 sps:$4 sm:$0xff]  }
 0x55f   :  { %3469 = vmatpush1.bf16.msra.mxu1 %v5549_v6  ;;  %v5566_v6 = vld [vmem:[%s9464_s6 + $0xc4] ss:$16 sps:$4 sm:$0xff]  }
 0x560   :  { %3470 = vmatprep.subr.bf16.mxu1 %v5557_v14  ;;  %v5564_v14 = vld [vmem:[%s9464_s6 + $0xc0] ss:$16 sps:$4 sm:$0xff]  }
 0x561   :  { %3245 = vmatpush1.bf16.msra.mxu0 %v5552_v1  ;;  %v5567_v1 = vld [vmem:[%s9464_s6 + $0xc8] ss:$16 sps:$4 sm:$0xff]  }
 0x562   :  { %3246 = vmatprep.subr.bf16.mxu0 %v5560_v8  ;;  %v5570_v8 = vld [vmem:[%s9464_s6 + $0xe0] ss:$16 sps:$4 sm:$0xff]  }
 0x563   :  { %3471 = vmatpush1.bf16.msra.mxu1 %v5555_v51  ;;  %v5572_v51 = vld [vmem:[%s9464_s6 + $0xe4] ss:$16 sps:$4 sm:$0xff]  }
 0x564   :  { %3472 = vmatprep.subr.bf16.mxu1 %v5563_v41  ;;  %v5575_v41 = vld [vmem:[%s9464_s6 + $0xec] ss:$16 sps:$4 sm:$0xff]  }
 0x565   :  { %3247 = vmatpush1.bf16.msra.mxu0 %v5558_v46  ;;  %v5573_v46 = vld [vmem:[%s9464_s6 + $0xe8] ss:$16 sps:$4 sm:$0xff]  }
 0x566   :  { %3248 = vmatprep.subr.bf16.mxu0 %v5566_v6  ;;  %v5581_v6 = vld [vmem:[%s9464_s6 + $0x10c] ss:$16 sps:$4 sm:$0xff]  }
 0x567   :  { %3473 = vmatpush1.bf16.msra.mxu1 %v5561_v16  ;;  %v5578_v16 = vld [vmem:[%s9464_s6 + $0x104] ss:$16 sps:$4 sm:$0xff]  }
 0x568   :  { %3474 = vmatprep.subr.bf16.mxu1 %v5569_v31  ;;  %v5576_v31 = vld [vmem:[%s9464_s6 + $0x100] ss:$16 sps:$4 sm:$0xff]  }
 0x569   :  { %3249 = vmatpush1.bf16.msra.mxu0 %v5564_v14  ;;  %v5587_v14 = vld [vmem:[%s9464_s6 + $0x12c] ss:$16 sps:$4 sm:$0xff]  }
 0x56a   :  { %3250 = vmatprep.subr.bf16.mxu0 %v5572_v51  ;;  %v5585_v51 = vld [vmem:[%s9464_s6 + $0x128] ss:$16 sps:$4 sm:$0xff]  }
 0x56b   :  { %3475 = vmatpush1.bf16.msra.mxu1 %v5567_v1  ;;  %v5582_v1 = vld [vmem:[%s9464_s6 + $0x120] ss:$16 sps:$4 sm:$0xff]  }
 0x56c   :  { %3476 = vmatprep.subr.bf16.mxu1 %v5575_v41 }
 0x56d   :  { %3251 = vmatpush1.bf16.msra.mxu0 %v5570_v8 }
 0x56e   :  { %3252 = vmatprep.subr.bf16.mxu0 %v5578_v16 }
 0x56f   :  { %3477 = vmatpush1.bf16.msra.mxu1 %v5573_v46  ;;  %v9703_v46 = vmax.f32 %v6810_v22, 0.0 }
 0x570   :  { %3478 = vmatprep.subr.bf16.mxu1 %v5581_v6  ;;  %v9704_v6 = vmax.f32 %v6816_v29, 0.0  ;;  %v9707_v29 = vmax.f32 %v6820_v53, 0.0 }
 0x571   :  { %3253 = vmatpush1.bf16.msra.mxu0 %v5576_v31 }
 0x572   :  { %3254 = vmatprep.subr.bf16.mxu0 %v5584_v19  ;;  %v9706_v19 = vmax.f32 %v6824_v18, 0.0 }
 0x573   :  { %3479 = vmatpush1.bf16.msra.mxu1 %v5579_v62 }
 0x574   :  { %3480 = vmatprep.subr.bf16.mxu1 %v5587_v14 }
 0x575   :  { %3255 = vmatpush1.bf16.msra.mxu0 %v5582_v1 }
 0x577   :  { %3481 = vmatpush1.bf16.msra.mxu1 %v5585_v51  ;;  %v9709_v51 = vmax.f32 %v6830_v36, 0.0 }
 0x5a8   :  { %v1831_v8 = vpop.xlane.xlu0 %1830 }
 0x5a9   :  { %v1908_v41 = vmul.f32 0.001953125, %v1831_v8 }
 0x5aa   :  { %v1836_v63 = vpop.xlane.xlu1 %1835 }
 0x5ab   :  { %v7315_v16 = vsub.f32 %v9703_v46, %v1908_v41  ;;  %v7319_v38 = vsub.f32 %v9704_v6, %v1908_v41  ;;  %v7323_v43 = vsub.f32 %v9705_v49, %v1908_v41  ;;  %v1909_v62 = vmul.f32 0.001953125, %v1836_v63 }
 0x5ac   :  { %v7327_v31 = vsub.f32 %v9706_v19, %v1908_v41  ;;  %v9711_v49 = vmax.f32 %v6827_v37, 0.0  ;;  %v9712_v46 = vmax.f32 %v6840_v2, 0.0 }
 0x5ad   :  { %v1988_v14 = vmul.f32 %v7315_v16, %v7315_v16  ;;  %v1989_v22 = vmul.f32 %v7319_v38, %v7319_v38  ;;  %v7335_v1 = vsub.f32 %v9707_v29, %v1909_v62  ;;  %v7339_v21 = vsub.f32 %v9709_v51, %v1909_v62 }
 0x5ae   :  { %v7343_v63 = vsub.f32 %v9711_v49, %v1909_v62  ;;  %v1990_v18 = vmul.f32 %v7323_v43, %v7323_v43  ;;  %v7349_v6 = vsub.f32 %v9712_v46, %v1909_v62  ;;  %v1991_v37 = vmul.f32 %v7327_v31, %v7327_v31 }
 0x5af   :  { %9708 = vst [vmem:[#allocation22_spill] sm:$0xff] %v7335_v1  ;;  %9710 = vst [vmem:[#allocation23_spill] sm:$0xff] %v7339_v21  ;;  %v2052_v8 = vadd.f32 %v1989_v22, %v1988_v14  ;;  %v1992_v53 = vmul.f32 %v7335_v1, %v7335_v1  ;;  %v1993_v36 = vmul.f32 %v7339_v21, %v7339_v21  ;;  %v9713_v22 = vmax.f32 %v6851_v0, 0.0 }
 0x5b0   :  { %v1841_v41 = vpop.xlane.xlu0 %1840  ;;  %v1994_v51 = vmul.f32 %v7343_v63, %v7343_v63  ;;  %v9714_v62 = vmax.f32 %v6857_v45, 0.0  ;;  %v9716_v0 = vmax.f32 %v6870_v20, 0.0 }
 0x5b1   :  { %v1910_v19 = vmul.f32 0.001953125, %v1841_v41  ;;  %v2053_v29 = vadd.f32 %v2052_v8, %v1990_v18  ;;  %v2057_v14 = vadd.f32 %v1993_v36, %v1992_v53  ;;  %v9715_v41 = vmax.f32 %v6854_v32, 0.0 }
 0x5b2   :  { %v1846_v46 = vpop.xlane.xlu1 %1845  ;;  %v1995_v18 = vmul.f32 %v7349_v6, %v7349_v6  ;;  %v9717_v32 = vmax.f32 %v6866_v59, 0.0 }
 0x5b3   :  { %v7361_v2 = vsub.f32 %v9713_v22, %v1910_v19  ;;  %v7365_v49 = vsub.f32 %v9714_v62, %v1910_v19  ;;  %v2054_v50 = vadd.f32 %v2053_v29, %v1991_v37  ;;  %v7369_v1 = vsub.f32 %v9715_v41, %v1910_v19 }
 0x5b4   :  { %v1911_v21 = vmul.f32 0.001953125, %v1846_v46  ;;  %v2058_v8 = vadd.f32 %v2057_v14, %v1994_v51  ;;  %v7375_v53 = vsub.f32 %v9716_v0, %v1910_v19  ;;  %v9718_v29 = vmax.f32 %v6876_v55, 0.0 }
 0x5b5   :  { %2055 = vadd.xlane.f32.xlu0 %v2054_v50  ;;  %v1996_v45 = vmul.f32 %v7361_v2, %v7361_v2  ;;  %v1997_v36 = vmul.f32 %v7365_v49, %v7365_v49  ;;  %v1998_v20 = vmul.f32 %v7369_v1, %v7369_v1  ;;  %v9719_v19 = vmax.f32 %v6873_v9, 0.0 }
 0x5b6   :  { %v7383_v37 = vsub.f32 %v9717_v32, %v1911_v21  ;;  %v7387_v22 = vsub.f32 %v9718_v29, %v1911_v21  ;;  %v2059_v51 = vadd.f32 %v2058_v8, %v1995_v18  ;;  %v9720_v46 = vmax.f32 %v6888_v60, 0.0 }
 0x5b7   :  { %v2062_v50 = vadd.f32 %v1997_v36, %v1996_v45  ;;  %v7393_v14 = vsub.f32 %v9719_v19, %v1911_v21  ;;  %v1999_v8 = vmul.f32 %v7375_v53, %v7375_v53  ;;  %v9721_v36 = vmax.f32 %v6899_v57, 0.0 }
 0x5b8   :  { %2060 = vadd.xlane.f32.xlu1 %v2059_v51  ;;  %v1851_v62 = vpop.xlane.xlu0 %1850  ;;  %v7397_v59 = vsub.f32 %v9720_v46, %v1911_v21  ;;  %v2000_v55 = vmul.f32 %v7383_v37, %v7383_v37  ;;  %v2001_v41 = vmul.f32 %v7387_v22, %v7387_v22  ;;  %v9722_v21 = vmax.f32 %v6905_v15, 0.0 }
 0x5b9   :  { %v1912_v18 = vmul.f32 0.001953125, %v1851_v62  ;;  %v2063_v0 = vadd.f32 %v2062_v50, %v1998_v20  ;;  %v2002_v9 = vmul.f32 %v7393_v14, %v7393_v14  ;;  %v9723_v19 = vmax.f32 %v6902_v35, 0.0 }
 0x5ba   :  { %v2067_v45 = vadd.f32 %v2001_v41, %v2000_v55  ;;  %v1856_v29 = vpop.xlane.xlu1 %1855  ;;  %v2003_v20 = vmul.f32 %v7397_v59, %v7397_v59  ;;  %v9724_v57 = vmax.f32 %v6918_v17, 0.0  ;;  %v9725_v35 = vmax.f32 %v6914_v39, 0.0 }
 0x5bb   :  { %v7409_v60 = vsub.f32 %v9721_v36, %v1912_v18  ;;  %v7413_v32 = vsub.f32 %v9722_v21, %v1912_v18  ;;  %v2064_v51 = vadd.f32 %v2063_v0, %v1999_v8  ;;  %v7417_v62 = vsub.f32 %v9723_v19, %v1912_v18 }
 0x5bc   :  { %v1913_v46 = vmul.f32 0.001953125, %v1856_v29  ;;  %v2068_v50 = vadd.f32 %v2067_v45, %v2002_v9  ;;  %v7423_v55 = vsub.f32 %v9724_v57, %v1912_v18  ;;  %v9726_v0 = vmax.f32 %v6924_v3, 0.0 }
 0x5bd   :  { %2065 = vadd.xlane.f32.xlu0 %v2064_v51  ;;  %v2004_v15 = vmul.f32 %v7409_v60, %v7409_v60  ;;  %v2005_v41 = vmul.f32 %v7413_v32, %v7413_v32  ;;  %v2006_v17 = vmul.f32 %v7417_v62, %v7417_v62  ;;  %v9727_v45 = vmax.f32 %v6921_v33, 0.0 }
 0x5be   :  { %v7431_v8 = vsub.f32 %v9725_v35, %v1913_v46  ;;  %v7435_v36 = vsub.f32 %v9726_v0, %v1913_v46  ;;  %v2069_v9 = vadd.f32 %v2068_v50, %v2003_v20  ;;  %v9728_v51 = vmax.f32 %v6936_v12, 0.0 }
 0x5bf   :  { %v2072_v18 = vadd.f32 %v2005_v41, %v2004_v15  ;;  %v7441_v21 = vsub.f32 %v9727_v45, %v1913_v46  ;;  %v2007_v50 = vmul.f32 %v7423_v55, %v7423_v55  ;;  %v9729_v41 = vmax.f32 %v6947_v25, 0.0 }
 0x5c0   :  { %2070 = vadd.xlane.f32.xlu1 %v2069_v9  ;;  %v1861_v29 = vpop.xlane.xlu0 %1860  ;;  %v7445_v39 = vsub.f32 %v9728_v51, %v1913_v46  ;;  %v2008_v3 = vmul.f32 %v7431_v8, %v7431_v8  ;;  %v2009_v19 = vmul.f32 %v7435_v36, %v7435_v36  ;;  %v9730_v46 = vmax.f32 %v6953_v56, 0.0 }
 0x5c1   :  { %v1914_v20 = vmul.f32 0.001953125, %v1861_v29  ;;  %v2073_v57 = vadd.f32 %v2072_v18, %v2006_v17  ;;  %v2010_v33 = vmul.f32 %v7441_v21, %v7441_v21  ;;  %v9731_v45 = vmax.f32 %v6950_v40, 0.0  ;;  %v5590_v40 = vld [vmem:[%s9464_s6 + $0x144] ss:$16 sps:$4 sm:$0xff]  }
 0x5c2   :  { %v2077_v15 = vadd.f32 %v2009_v19, %v2008_v3  ;;  %v1866_v0 = vpop.xlane.xlu1 %1865  ;;  %v2011_v17 = vmul.f32 %v7445_v39, %v7445_v39  ;;  %v9733_v25 = vmax.f32 %v6966_v44, 0.0  ;;  %v9735_v44 = vmax.f32 %v6972_v52, 0.0  ;;  %3256 = vmatprep.subr.bf16.mxu0 %v5590_v40  ;;  %v5596_v40 = vld [vmem:[%s9464_s6 + $0x164] ss:$16 sps:$4 sm:$0xff]  }
 0x5c3   :  { %v7457_v12 = vsub.f32 %v9729_v41, %v1914_v20  ;;  %v7461_v35 = vsub.f32 %v9730_v46, %v1914_v20  ;;  %v2074_v9 = vadd.f32 %v2073_v57, %v2007_v50  ;;  %v7465_v29 = vsub.f32 %v9731_v45, %v1914_v20  ;;  %v5593_v50 = vld [vmem:[%s9464_s6 + $0x14c] ss:$16 sps:$4 sm:$0xff]   ;;  %v5588_v41 = vld [vmem:[%s9464_s6 + $0x140] ss:$16 sps:$4 sm:$0xff]   ;;  %v5591_v46 = vld [vmem:[%s9464_s6 + $0x148] ss:$16 sps:$4 sm:$0xff]  }
 0x5c4   :  { %v1915_v51 = vmul.f32 0.001953125, %v1866_v0  ;;  %v2078_v18 = vadd.f32 %v2077_v15, %v2010_v33  ;;  %v7471_v3 = vsub.f32 %v9733_v25, %v1914_v20  ;;  %v9734_v57 = vmax.f32 %v6962_v61, 0.0  ;;  %3482 = vmatprep.subr.bf16.mxu1 %v5593_v50  ;;  %3257 = vmatpush1.bf16.msra.mxu0 %v5588_v41 }
 0x5c5   :  { %9732 = vst [vmem:[#allocation24_spill] sm:$0xff] %v7465_v29  ;;  %2075 = vadd.xlane.f32.xlu0 %v2074_v9  ;;  %v2012_v56 = vmul.f32 %v7457_v12, %v7457_v12  ;;  %v2013_v19 = vmul.f32 %v7461_v35, %v7461_v35  ;;  %v2014_v0 = vmul.f32 %v7465_v29, %v7465_v29  ;;  %v9736_v61 = vmax.f32 %v6969_v30, 0.0 }
 0x5c6   :  { %v7485_v33 = vsub.f32 %v9734_v57, %v1915_v51  ;;  %v7489_v20 = vsub.f32 %v9735_v44, %v1915_v51  ;;  %v2079_v15 = vadd.f32 %v2078_v18, %v2011_v17  ;;  %v9738_v17 = vmax.f32 %v6984_v28, 0.0  ;;  %3483 = vmatpush1.bf16.msra.mxu1 %v5591_v46  ;;  %v5599_v28 = vld [vmem:[%s9464_s6 + $0x16c] ss:$16 sps:$4 sm:$0xff]   ;;  %v5594_v44 = vld [vmem:[%s9464_s6 + $0x160] ss:$16 sps:$4 sm:$0xff]   ;;  %3258 = vmatprep.subr.bf16.mxu0 %v5596_v40 }
 0x5c7   :  { %v2082_v9 = vadd.f32 %v2013_v19, %v2012_v56  ;;  %v7501_v45 = vsub.f32 %v9736_v61, %v1915_v51  ;;  %v2015_v30 = vmul.f32 %v7471_v3, %v7471_v3  ;;  %v9739_v41 = vmax.f32 %v6995_v13, 0.0  ;;  %3484 = vmatprep.subr.bf16.mxu1 %v5599_v28  ;;  %v5605_v40 = vld [vmem:[%s9464_s6 + $0x18c] ss:$16 sps:$4 sm:$0xff]  }
 0x5c8   :  { %2080 = vadd.xlane.f32.xlu1 %v2079_v15  ;;  %v1871_v52 = vpop.xlane.xlu0 %1870  ;;  %v7505_v18 = vsub.f32 %v9738_v17, %v1915_v51  ;;  %v2016_v25 = vmul.f32 %v7485_v33, %v7485_v33  ;;  %v2017_v57 = vmul.f32 %v7489_v20, %v7489_v20  ;;  %v5597_v15 = vld [vmem:[%s9464_s6 + $0x168] ss:$16 sps:$4 sm:$0xff]   ;;  %v9741_v17 = vmax.f32 %v6998_v27, 0.0  ;;  %3259 = vmatpush1.bf16.msra.mxu0 %v5594_v44  ;;  %v5600_v44 = vld [vmem:[%s9464_s6 + $0x180] ss:$16 sps:$4 sm:$0xff]  }
 0x5c9   :  { %9737 = vst [vmem:[#allocation25_spill] sm:$0xff] %v7501_v45  ;;  %v1916_v56 = vmul.f32 0.001953125, %v1871_v52  ;;  %v2083_v19 = vadd.f32 %v2082_v9, %v2014_v0  ;;  %v2018_v51 = vmul.f32 %v7501_v45, %v7501_v45  ;;  %v9740_v0 = vmax.f32 %v7001_v5, 0.0 }
 0x5ca   :  { %v2087_v50 = vadd.f32 %v2017_v57, %v2016_v25  ;;  %v1876_v61 = vpop.xlane.xlu1 %1875  ;;  %v2019_v45 = vmul.f32 %v7505_v18, %v7505_v18  ;;  %v9743_v13 = vmax.f32 %v7014_v26, 0.0  ;;  %3485 = vmatpush1.bf16.msra.mxu1 %v5597_v15  ;;  %v9745_v28 = vmax.f32 %v7010_v10, 0.0  ;;  %v5603_v15 = vld [vmem:[%s9464_s6 + $0x188] ss:$16 sps:$4 sm:$0xff]   ;;  %v9749_v10 = vld [vmem:[#allocation6_spill] sm:$0xff] }
 0x5cb   :  { %v7529_v46 = vsub.f32 %v9739_v41, %v1916_v56  ;;  %v7533_v9 = vsub.f32 %v9740_v0, %v1916_v56  ;;  %v2084_v52 = vadd.f32 %v2083_v19, %v2015_v30  ;;  %v7537_v25 = vsub.f32 %v9741_v17, %v1916_v56  ;;  %v5602_v19 = vld [vmem:[%s9464_s6 + $0x184] ss:$16 sps:$4 sm:$0xff]   ;;  %3486 = vmatprep.subr.bf16.mxu1 %v5605_v40 }
 0x5cc   :  { %v1917_v57 = vmul.f32 0.001953125, %v1876_v61  ;;  %v2088_v29 = vadd.f32 %v2087_v50, %v2018_v51  ;;  %v7543_v5 = vsub.f32 %v9743_v13, %v1916_v56  ;;  %v9747_v56 = vmax.f32 %v7020_v24, 0.0  ;;  %3260 = vmatprep.subr.bf16.mxu0 %v5602_v19  ;;  %v5608_v19 = vld [vmem:[%s9464_s6 + $0x1a4] ss:$16 sps:$4 sm:$0xff]  }
 0x5cd   :  { %9742 = vst [vmem:[#allocation26_spill] sm:$0xff] %v7537_v25  ;;  %2085 = vadd.xlane.f32.xlu0 %v2084_v52  ;;  %v2020_v30 = vmul.f32 %v7529_v46, %v7529_v46  ;;  %v2021_v27 = vmul.f32 %v7533_v9, %v7533_v9  ;;  %v2022_v41 = vmul.f32 %v7537_v25, %v7537_v25  ;;  %v9750_v61 = vmax.f32 %v9749_v10, 0.0 }
 0x5ce   :  { %9744 = vst [vmem:[#allocation27_spill] sm:$0xff] %v7543_v5  ;;  %v7557_v26 = vsub.f32 %v9745_v28, %v1917_v57  ;;  %v7561_v51 = vsub.f32 %v9747_v56, %v1917_v57  ;;  %v2089_v50 = vadd.f32 %v2088_v29, %v2019_v45  ;;  %v9752_v29 = vld [vmem:[#allocation7_spill] sm:$0xff]  ;;  %3261 = vmatpush1.bf16.msra.mxu0 %v5600_v44  ;;  %v5606_v44 = vld [vmem:[%s9464_s6 + $0x1a0] ss:$16 sps:$4 sm:$0xff]  }
 0x5cf   :  { %v2092_v0 = vadd.f32 %v2021_v27, %v2020_v30  ;;  %v7573_v52 = vsub.f32 %v9750_v61, %v1917_v57  ;;  %v9753_v45 = vmax.f32 %v9752_v29, 0.0  ;;  %v2023_v27 = vmul.f32 %v7543_v5, %v7543_v5  ;;  %3487 = vmatpush1.bf16.msra.mxu1 %v5603_v15  ;;  %v5609_v15 = vld [vmem:[%s9464_s6 + $0x1a8] ss:$16 sps:$4 sm:$0xff]   ;;  %v9758_v61 = vld [vmem:[#allocation10_spill] sm:$0xff]  ;;  %3262 = vmatprep.subr.bf16.mxu0 %v5608_v19  ;;  %v5617_v19 = vld [vmem:[%s9464_s6 + $0x1cc] ss:$16 sps:$4 sm:$0xff]  }
 0x5d0   :  { %9746 = vst [vmem:[#allocation28_spill] sm:$0xff] %v7557_v26  ;;  %9748 = vst [vmem:[#allocation29_spill] sm:$0xff] %v7561_v51  ;;  %2090 = vadd.xlane.f32.xlu1 %v2089_v50  ;;  %v1881_v24 = vpop.xlane.xlu0 %1880  ;;  %v2024_v13 = vmul.f32 %v7557_v26, %v7557_v26  ;;  %v2025_v28 = vmul.f32 %v7561_v51, %v7561_v51 }
 0x5d1   :  { %9751 = vst [vmem:[#allocation6_spill] sm:$0xff] %v7573_v52  ;;  %v7577_v17 = vsub.f32 %v9753_v45, %v1917_v57  ;;  %v1918_v30 = vmul.f32 0.001953125, %v1881_v24  ;;  %v2093_v56 = vadd.f32 %v2092_v0, %v2022_v41  ;;  %v5611_v57 = vld [vmem:[%s9464_s6 + $0x1ac] ss:$16 sps:$4 sm:$0xff]   ;;  %v2026_v40 = vmul.f32 %v7573_v52, %v7573_v52  ;;  %v9755_v41 = vld [vmem:[#allocation8_spill] sm:$0xff] }
 0x5d2   :  { %v2097_v50 = vadd.f32 %v2025_v28, %v2024_v13  ;;  %v9756_v0 = vmax.f32 %v9755_v41, 0.0  ;;  %v9759_v24 = vmax.f32 %v9758_v61, 0.0  ;;  %v1886_v45 = vpop.xlane.xlu1 %1885  ;;  %v9761_v52 = vld [vmem:[#allocation9_spill] sm:$0xff]  ;;  %3263 = vmatpush1.bf16.msra.mxu0 %v5606_v44  ;;  %3488 = vmatprep.subr.bf16.mxu1 %v5611_v57  ;;  %v9764_v41 = vld [vmem:[#allocation12_spill] sm:$0xff] }
 0x5d3   :  { %9754 = vst [vmem:[#allocation7_spill] sm:$0xff] %v7577_v17  ;;  %v2094_v25 = vadd.f32 %v2093_v56, %v2023_v27  ;;  %v9762_v13 = vmax.f32 %v9761_v52, 0.0  ;;  %v1919_v5 = vmul.f32 0.001953125, %v1886_v45  ;;  %v2027_v26 = vmul.f32 %v7577_v17, %v7577_v17  ;;  %3489 = vmatpush1.bf16.msra.mxu1 %v5609_v15  ;;  %v5614_v56 = vld [vmem:[%s9464_s6 + $0x1c4] ss:$16 sps:$4 sm:$0xff]  }
 0x5d4   :  { %v7601_v10 = vsub.f32 %v9756_v0, %v1918_v30  ;;  %v7605_v29 = vsub.f32 %v9759_v24, %v1918_v30  ;;  %v2098_v51 = vadd.f32 %v2097_v50, %v2026_v40  ;;  %v9765_v0 = vmax.f32 %v9764_v41, 0.0  ;;  %v5612_v15 = vld [vmem:[%s9464_s6 + $0x1c0] ss:$16 sps:$4 sm:$0xff]   ;;  %v5615_v45 = vld [vmem:[%s9464_s6 + $0x1c8] ss:$16 sps:$4 sm:$0xff]   ;;  %3264 = vmatprep.subr.bf16.mxu0 %v5614_v56  ;;  %3490 = vmatprep.subr.bf16.mxu1 %v5617_v19 }
 0x5d5   :  { %v7609_v28 = vsub.f32 %v9762_v13, %v1918_v30  ;;  %2095 = vadd.xlane.f32.xlu0 %v2094_v25  ;;  %v9767_v25 = vld [vmem:[#allocation11_spill] sm:$0xff]  ;;  %v5620_v56 = vld [vmem:[%s9464_s6 + $0x1e4] ss:$16 sps:$4 sm:$0xff]  }
 0x5d6   :  { %9757 = vst [vmem:[#allocation8_spill] sm:$0xff] %v7601_v10  ;;  %9760 = vst [vmem:[#allocation10_spill] sm:$0xff] %v7605_v29  ;;  %v7615_v61 = vsub.f32 %v9765_v0, %v1918_v30  ;;  %v2028_v27 = vmul.f32 %v7601_v10, %v7601_v10  ;;  %v2029_v52 = vmul.f32 %v7605_v29, %v7605_v29  ;;  %v9768_v57 = vmax.f32 %v9767_v25, 0.0  ;;  %v9770_v30 = vld [vmem:[#allocation14_spill] sm:$0xff]  ;;  %v9773_v0 = vld [vmem:[#allocation13_spill] sm:$0xff] }
 0x5d7   :  { %9763 = vst [vmem:[#allocation9_spill] sm:$0xff] %v7609_v28  ;;  %v9771_v50 = vmax.f32 %v9770_v30, 0.0  ;;  %v2099_v24 = vadd.f32 %v2098_v51, %v2027_v26  ;;  %v2030_v13 = vmul.f32 %v7609_v28, %v7609_v28  ;;  %v9774_v25 = vmax.f32 %v9773_v0, 0.0  ;;  %v9776_v51 = vld [vmem:[#allocation15_spill] sm:$0xff]  ;;  %3265 = vmatpush1.bf16.msra.mxu0 %v5612_v15  ;;  %3491 = vmatpush1.bf16.msra.mxu1 %v5615_v45  ;;  %v5618_v15 = vld [vmem:[%s9464_s6 + $0x1e0] ss:$16 sps:$4 sm:$0xff]  }
 0x5d8   :  { %9766 = vst [vmem:[#allocation12_spill] sm:$0xff] %v7615_v61  ;;  %v7629_v40 = vsub.f32 %v9768_v57, %v1919_v5  ;;  %v2102_v41 = vadd.f32 %v2029_v52, %v2028_v27  ;;  %v1891_v26 = vpop.xlane.xlu0 %1890  ;;  %v9777_v30 = vmax.f32 %v9776_v51, 0.0  ;;  %v2031_v52 = vmul.f32 %v7615_v61, %v7615_v61  ;;  %v5621_v45 = vld [vmem:[%s9464_s6 + $0x1e8] ss:$16 sps:$4 sm:$0xff]   ;;  %3266 = vmatprep.subr.bf16.mxu0 %v5620_v56 }
 0x5d9   :  { %v7633_v44 = vsub.f32 %v9771_v50, %v1919_v5  ;;  %v7645_v57 = vsub.f32 %v9774_v25, %v1919_v5  ;;  %2100 = vadd.xlane.f32.xlu1 %v2099_v24  ;;  %v1920_v27 = vmul.f32 0.001953125, %v1891_v26  ;;  %v9780_v26 = vld [vmem:[#allocation18_spill] sm:$0xff] }
 0x5da   :  { %9769 = vst [vmem:[#allocation11_spill] sm:$0xff] %v7629_v40  ;;  %v7649_v50 = vsub.f32 %v9777_v30, %v1919_v5  ;;  %v2032_v10 = vmul.f32 %v7629_v40, %v7629_v40  ;;  %v2103_v0 = vadd.f32 %v2102_v41, %v2030_v13  ;;  %v5623_v5 = vld [vmem:[%s9464_s6 + $0x1ec] ss:$16 sps:$4 sm:$0xff]   ;;  %v9778_v13 = vld [vmem:[#allocation16_spill] sm:$0xff]  ;;  %v9781_v51 = vmax.f32 %v9780_v26, 0.0  ;;  %v1896_v28 = vpop.xlane.xlu1 %1895 }
 0x5db   :  { %9772 = vst [vmem:[#allocation14_spill] sm:$0xff] %v7633_v44  ;;  %9775 = vst [vmem:[#allocation13_spill] sm:$0xff] %v7645_v57  ;;  %v2033_v29 = vmul.f32 %v7633_v44, %v7633_v44  ;;  %v2034_v19 = vmul.f32 %v7645_v57, %v7645_v57  ;;  %v9779_v41 = vmax.f32 %v9778_v13, 0.0  ;;  %v9782_v57 = vld [vmem:[#allocation17_spill] sm:$0xff]  ;;  %v1921_v40 = vmul.f32 0.001953125, %v1896_v28  ;;  %3267 = vmatpush1.bf16.msra.mxu0 %v5618_v15  ;;  %v9785_v13 = vld [vmem:[#allocation20_spill] sm:$0xff] }
 0x5dc   :  { %v7677_v30 = vsub.f32 %v9781_v51, %v1920_v27  ;;  %v2104_v61 = vadd.f32 %v2103_v0, %v2031_v52  ;;  %v2035_v44 = vmul.f32 %v7649_v50, %v7649_v50  ;;  %3492 = vmatprep.subr.bf16.mxu1 %v5623_v5  ;;  %v5626_v28 = vld [vmem:[%s9464_s6 + $0x204] ss:$16 sps:$4 sm:$0xff]   ;;  %v5629_v0 = vld [vmem:[%s9464_s6 + $0x20c] ss:$16 sps:$4 sm:$0xff]  }
 0x5dd   :  { %v2107_v24 = vadd.f32 %v2033_v29, %v2032_v10  ;;  %v7673_v25 = vsub.f32 %v9779_v41, %v1920_v27  ;;  %v9783_v10 = vmax.f32 %v9782_v57, 0.0  ;;  %v9786_v41 = vmax.f32 %v9785_v13, 0.0  ;;  %3493 = vmatpush1.bf16.msra.mxu1 %v5621_v45  ;;  %3349 = vmatprep.subr.bf16.mxu0 %v5626_v28 }
 0x5de   :  { %2105 = vadd.xlane.f32.xlu0 %v2104_v61  ;;  %v2037_v57 = vmul.f32 %v7677_v30, %v7677_v30  ;;  %v9788_v61 = vld [vmem:[#allocation19_spill] sm:$0xff]  ;;  %3575 = vmatprep.subr.bf16.mxu1 %v5629_v0 }
 0x5df   :  { %v7681_v29 = vsub.f32 %v9783_v10, %v1920_v27  ;;  %v2108_v17 = vadd.f32 %v2107_v24, %v2034_v19  ;;  %v7687_v26 = vsub.f32 %v9786_v41, %v1920_v27  ;;  %v2036_v52 = vmul.f32 %v7673_v25, %v7673_v25  ;;  %v9790_v27 = vld [vmem:[#allocation21_spill] sm:$0xff] }
 0x5e0   :  { %v9789_v56 = vmax.f32 %v9788_v61, 0.0  ;;  %v9791_v19 = vmax.f32 %v9790_v27, 0.0  ;;  %v9792_v10 = vmax.f32 %v7113_v4, 0.0  ;;  %v1901_v41 = vpop.xlane.xlu0 %1900  ;;  %v9794_v61 = vmax.f32 %v7128_v7, 0.0 }
 0x5e1   :  { %9784 = vst [vmem:[#allocation15_spill] sm:$0xff] %v7681_v29  ;;  %9787 = vst [vmem:[#allocation16_spill] sm:$0xff] %v7687_v26  ;;  %v2109_v15 = vadd.f32 %v2108_v17, %v2035_v44  ;;  %v2038_v45 = vmul.f32 %v7681_v29, %v7681_v29  ;;  %v2112_v51 = vadd.f32 %v2037_v57, %v2036_v52  ;;  %v1922_v44 = vmul.f32 0.001953125, %v1901_v41 }
 0x5e2   :  { %v7701_v5 = vsub.f32 %v9789_v56, %v1921_v40  ;;  %v7705_v24 = vsub.f32 %v9791_v19, %v1921_v40  ;;  %v7711_v13 = vsub.f32 %v9792_v10, %v1921_v40  ;;  %v7715_v56 = vsub.f32 %v9794_v61, %v1921_v40  ;;  %v1906_v57 = vpop.xlane.xlu1 %1905 }
 0x5e3   :  { %2110 = vadd.xlane.f32.xlu1 %v2109_v15  ;;  %v2039_v4 = vmul.f32 %v7687_v26, %v7687_v26  ;;  %v2113_v52 = vadd.f32 %v2112_v51, %v2038_v45  ;;  %v9796_v7 = vmax.f32 %v7139_v58, 0.0  ;;  %v9797_v19 = vmax.f32 %v7145_v42, 0.0 }
 0x5e4   :  { %9793 = vst [vmem:[#allocation18_spill] sm:$0xff] %v7711_v13  ;;  %9795 = vst [vmem:[#allocation17_spill] sm:$0xff] %v7715_v56  ;;  %v2040_v27 = vmul.f32 %v7701_v5, %v7701_v5  ;;  %v2041_v17 = vmul.f32 %v7705_v24, %v7705_v24  ;;  %v2042_v28 = vmul.f32 %v7711_v13, %v7711_v13  ;;  %v1923_v10 = vmul.f32 0.001953125, %v1906_v57  ;;  %v9814_v13 = vld [vmem:[#allocation22_spill] sm:$0xff] }
 0x5e5   :  { %v7727_v40 = vsub.f32 %v9796_v7, %v1922_v44  ;;  %v7731_v15 = vsub.f32 %v9797_v19, %v1922_v44  ;;  %v2114_v61 = vadd.f32 %v2113_v52, %v2039_v4  ;;  %v2043_v41 = vmul.f32 %v7715_v56, %v7715_v56 }
 0x5e6   :  { %v2117_v0 = vadd.f32 %v2041_v17, %v2040_v27  ;;  %v9798_v45 = vmax.f32 %v7142_v47, 0.0  ;;  %v9800_v27 = vmax.f32 %v7158_v48, 0.0  ;;  %v9802_v58 = vmax.f32 %v7154_v34, 0.0 }
 0x5e7   :  { %v9804_v42 = vmax.f32 %v7164_v54, 0.0  ;;  %2115 = vadd.xlane.f32.xlu0 %v2114_v61  ;;  %v2044_v4 = vmul.f32 %v7727_v40, %v7727_v40  ;;  %v2045_v47 = vmul.f32 %v7731_v15, %v7731_v15  ;;  %v9807_v54 = vmax.f32 %v7176_v23, 0.0 }
 0x5e8   :  { %v2118_v29 = vadd.f32 %v2117_v0, %v2042_v28  ;;  %v7737_v51 = vsub.f32 %v9798_v45, %v1922_v44  ;;  %v7741_v17 = vsub.f32 %v9800_v27, %v1922_v44  ;;  %v7745_v7 = vsub.f32 %v9802_v58, %v1923_v10 }
 0x5e9   :  { %v7749_v57 = vsub.f32 %v9804_v42, %v1923_v10  ;;  %v9805_v44 = vmax.f32 %v7161_v11, 0.0  ;;  %v2122_v28 = vadd.f32 %v2045_v47, %v2044_v4  ;;  %v7763_v0 = vsub.f32 %v9807_v54, %v1923_v10 }
 0x5ea   :  { %9799 = vst [vmem:[#allocation20_spill] sm:$0xff] %v7737_v51  ;;  %9801 = vst [vmem:[#allocation19_spill] sm:$0xff] %v7741_v17  ;;  %v2119_v52 = vadd.f32 %v2118_v29, %v2043_v41  ;;  %v2046_v48 = vmul.f32 %v7737_v51, %v7737_v51  ;;  %v2048_v19 = vmul.f32 %v7745_v7, %v7745_v7 }
 0x5eb   :  { %9803 = vst [vmem:[#allocation21_spill] sm:$0xff] %v7745_v7  ;;  %v7759_v34 = vsub.f32 %v9805_v44, %v1923_v10  ;;  %9808 = vst [vmem:[#allocation31_spill] sm:$0xff] %v7763_v0  ;;  %v2049_v61 = vmul.f32 %v7749_v57, %v7749_v57  ;;  %v2047_v29 = vmul.f32 %v7741_v17, %v7741_v17  ;;  %v9813_v17 = vld [vmem:[#allocation23_spill] sm:$0xff] }
 0x5ec   :  { %2120 = vadd.xlane.f32.xlu1 %v2119_v52  ;;  %v2123_v41 = vadd.f32 %v2122_v28, %v2046_v48  ;;  %v2051_v23 = vmul.f32 %v7763_v0, %v7763_v0 }
 0x5ed   :  { %9806 = vst [vmem:[#allocation30_spill] sm:$0xff] %v7759_v34  ;;  %v2050_v11 = vmul.f32 %v7759_v34, %v7759_v34  ;;  %v2127_v45 = vadd.f32 %v2049_v61, %v2048_v19  ;;  %v1825_v61 = vld [vmem:[%s9459_s8 + $0xb] sm:$0xf] }
 0x5ee   :  { %v2124_v27 = vadd.f32 %v2123_v41, %v2047_v29  ;;  %v1826_v41 = vld [vmem:[%s9459_s8 + $0xf] sm:$0xf] }
 0x5ef   :  { %v2128_v10 = vadd.f32 %v2127_v45, %v2050_v11  ;;  %v9809_v45 = vld [vmem:[#allocation4_spill] sm:$0xff] }
 0x5f0   :  { %2125 = vadd.xlane.f32.xlu0 %v2124_v27  ;;  %v7782_v27 = vrot.slane %v1825_v61, %v9809_v45 }
 0x5f1   :  { %v2129_v58 = vadd.f32 %v2128_v10, %v2051_v23  ;;  %v9810_v23 = vld [vmem:[#allocation2_spill] sm:$0xff] }
 0x5f2   :  { %v7785_v10 = vrot.slane %v1825_v61, %v9810_v23 }
 0x5f3   :  { %2130 = vadd.xlane.f32.xlu1 %v2129_v58  ;;  %v9811_v58 = vld [vmem:[#allocation5_spill] sm:$0xff] }
 0x642   :  { %v2056_v42 = vpop.xlane.xlu0 %2055 }
 0x643   :  { %v2132_v4 = vmul.f32 0.001953125, %v2056_v42  ;;  %v7788_v42 = vrot.slane %v1825_v61, %v9811_v58 }
 0x645   :  { %v2148_v47 = vadd.f32 1e-05, %v2132_v4  ;;  %v2061_v52 = vpop.xlane.xlu1 %2060 }
 0x646   :  { %v2133_v44 = vmul.f32 0.001953125, %v2061_v52 }
 0x647   :  { %5816 = vrsqrt.f32 %v2148_v47  ;;  %v7791_v47 = vrot.slane %v1826_v41, %v9809_v45 }
 0x648   :  { %v2149_v54 = vadd.f32 1e-05, %v2133_v44 }
 0x64a   :  { %5818 = vrsqrt.f32 %v2149_v54  ;;  %v2066_v48 = vpop.xlane.xlu0 %2065 }
 0x64b   :  { %v2134_v28 = vmul.f32 0.001953125, %v2066_v48 }
 0x64d   :  { %v2150_v34 = vadd.f32 1e-05, %v2134_v28  ;;  %v2071_v19 = vpop.xlane.xlu1 %2070  ;;  %v7797_v28 = vrot.slane %v1826_v41, %v9810_v23 }
 0x64e   :  { %v2135_v29 = vmul.f32 0.001953125, %v2071_v19  ;;  %v7800_v19 = vrot.slane %v1826_v41, %v9811_v58 }
 0x64f   :  { %5820 = vrsqrt.f32 %v2150_v34 }
 0x650   :  { %v2151_v11 = vadd.f32 1e-05, %v2135_v29  ;;  %v9812_v29 = vld [vmem:[#allocation3_spill] sm:$0xff] }
 0x651   :  { %v5817_v4 = vpop.eup %5816  ;;  %v7803_v51 = vrot.slane %v1825_v61, %v9812_v29  ;;  %v7814_v7 = vrot.slane %v1826_v41, %v9812_v29 }
 0x652   :  { %5822 = vrsqrt.f32 %v2151_v11  ;;  %v2076_v52 = vpop.xlane.xlu0 %2075  ;;  %v2181_v44 = vmul.f32 %v5817_v4, %v7319_v38  ;;  %v2180_v34 = vmul.f32 %v5817_v4, %v7315_v16  ;;  %v2183_v54 = vmul.f32 %v5817_v4, %v7327_v31 }
 0x653   :  { %v2136_v48 = vmul.f32 0.001953125, %v2076_v52  ;;  %v2182_v16 = vmul.f32 %v5817_v4, %v7323_v43 }
 0x654   :  { %v5819_v45 = vpop.eup %5818  ;;  %v2266_v11 = vmul.f32 %v7782_v27, %v2181_v44  ;;  %v2265_v0 = vmul.f32 %v7785_v10, %v2180_v34  ;;  %v2268_v38 = vmul.f32 %v7788_v42, %v2183_v54 }
 0x655   :  { %v2152_v31 = vadd.f32 1e-05, %v2136_v48  ;;  %v2081_v52 = vpop.xlane.xlu1 %2080  ;;  %v2185_v23 = vmul.f32 %v5819_v45, %v9813_v17  ;;  %v2184_v56 = vmul.f32 %v5819_v45, %v9814_v13  ;;  %v2187_v58 = vmul.f32 %v5819_v45, %v7349_v6 }
 0x656   :  { %v2137_v26 = vmul.f32 0.001953125, %v2081_v52  ;;  %v2351_v61 = vadd.f32 %v7791_v47, %v2266_v11  ;;  %v2350_v17 = vadd.f32 %v7797_v28, %v2265_v0  ;;  %v2186_v13 = vmul.f32 %v5819_v45, %v7343_v63  ;;  %v5624_v45 = vld [vmem:[%s9464_s6 + $0x200] ss:$16 sps:$4 sm:$0xff]  }
 0x657   :  { %5824 = vrsqrt.f32 %v2152_v31  ;;  %v2270_v44 = vmul.f32 %v7782_v27, %v2185_v23  ;;  %v2269_v34 = vmul.f32 %v7785_v10, %v2184_v56  ;;  %v2272_v43 = vmul.f32 %v7788_v42, %v2187_v58 }
 0x658   :  { %v2153_v4 = vadd.f32 1e-05, %v2137_v26  ;;  %v2267_v6 = vmul.f32 %v7803_v51, %v2182_v16  ;;  %v2353_v11 = vadd.f32 %v7800_v19, %v2268_v38  ;;  %v2271_v0 = vmul.f32 %v7803_v51, %v2186_v13  ;;  %v5627_v38 = vld [vmem:[%s9464_s6 + $0x208] ss:$16 sps:$4 sm:$0xff]  }
 0x659   :  { %v5821_v54 = vpop.eup %5820  ;;  %v2355_v48 = vadd.f32 %v7791_v47, %v2270_v44  ;;  %v2354_v41 = vadd.f32 %v7797_v28, %v2269_v34  ;;  %v2357_v23 = vadd.f32 %v7800_v19, %v2272_v43 }
 0x65a   :  { %5826 = vrsqrt.f32 %v2153_v4  ;;  %v2086_v56 = vpop.xlane.xlu0 %2085  ;;  %v2189_v58 = vmul.f32 %v5821_v54, %v7365_v49  ;;  %v2188_v26 = vmul.f32 %v5821_v54, %v7361_v2  ;;  %v5632_v2 = vld [vmem:[%s9464_s6 + $0x224] ss:$16 sps:$4 sm:$0xff]   ;;  %v5635_v49 = vld [vmem:[%s9464_s6 + $0x22c] ss:$16 sps:$4 sm:$0xff]   ;;  %v2352_v43 = vadd.f32 %v7814_v7, %v2267_v6  ;;  %v5630_v6 = vld [vmem:[%s9464_s6 + $0x220] ss:$16 sps:$4 sm:$0xff]  }
 0x65b   :  { %v2138_v63 = vmul.f32 0.001953125, %v2086_v56  ;;  %v2415_v16 = vpack.c.bf16 %v2355_v48, %v2351_v61  ;;  %v2414_v31 = vpack.c.bf16 %v2354_v41, %v2350_v17  ;;  %v7835_v52 = vpack.c.bf16 %v2357_v23, %v2353_v11 }
 0x65c   :  { %v5823_v44 = vpop.eup %5822  ;;  %v2274_v34 = vmul.f32 %v7782_v27, %v2189_v58  ;;  %v2273_v61 = vmul.f32 %v7785_v10, %v2188_v26  ;;  %v2356_v4 = vadd.f32 %v7814_v7, %v2271_v0  ;;  %v2191_v11 = vmul.f32 %v5821_v54, %v7375_v53 }
 0x65d   :  { %v2154_v17 = vadd.f32 1e-05, %v2138_v63  ;;  %v2091_v13 = vpop.xlane.xlu1 %2090  ;;  %3268 = vmatprep.mubr.bf16.mxu0 %v2415_v16  ;;  %3494 = vmatprep.mubr.bf16.mxu1 %v2415_v16  ;;  %v2193_v48 = vmul.f32 %v5823_v44, %v7387_v22  ;;  %v2192_v41 = vmul.f32 %v5823_v44, %v7383_v37  ;;  %v5633_v37 = vld [vmem:[%s9464_s6 + $0x228] ss:$16 sps:$4 sm:$0xff]   ;;  %v2195_v26 = vmul.f32 %v5823_v44, %v7397_v59  ;;  %v5638_v63 = vld [vmem:[%s9464_s6 + $0x244] ss:$16 sps:$4 sm:$0xff]  }
 0x65e   :  { %v2139_v23 = vmul.f32 0.001953125, %v2091_v13  ;;  %3269 = vmatmul.mubr.bf16.vlgmr.msra.gmra.mrb[52].mxu0 %v2414_v31  ;;  %3495 = vmatmul.mubr.bf16.vlgmr.msra.gmra.mrb[60].mxu1 %v2414_v31  ;;  %v2359_v56 = vadd.f32 %v7791_v47, %v2274_v34  ;;  %v7851_v58 = vpack.c.bf16 %v2356_v4, %v2352_v43  ;;  %v5641_v16 = vld [vmem:[%s9464_s6 + $0x24c] ss:$16 sps:$4 sm:$0xff]   ;;  %v2276_v31 = vmul.f32 %v7788_v42, %v2191_v11 }
 0x65f   :  { %5828 = vrsqrt.f32 %v2154_v17  ;;  %3350 = vmatpush1.bf16.msra.mxu0 %v5624_v45  ;;  %3576 = vmatpush1.bf16.msra.mxu1 %v5627_v38  ;;  %v2278_v53 = vmul.f32 %v7782_v27, %v2193_v48  ;;  %v2277_v22 = vmul.f32 %v7785_v10, %v2192_v41  ;;  %v2358_v45 = vadd.f32 %v7797_v28, %v2273_v61  ;;  %v5636_v48 = vld [vmem:[%s9464_s6 + $0x240] ss:$16 sps:$4 sm:$0xff]   ;;  %v5647_v11 = vld [vmem:[%s9464_s6 + $0x26c] ss:$16 sps:$4 sm:$0xff]  }
 0x660   :  { %v2155_v0 = vadd.f32 1e-05, %v2139_v23  ;;  %3351 = vmatprep.subr.bf16.mxu0 %v5632_v2  ;;  %3577 = vmatprep.subr.bf16.mxu1 %v5635_v49  ;;  %v2190_v38 = vmul.f32 %v5821_v54, %v7369_v1  ;;  %v2280_v49 = vmul.f32 %v7788_v42, %v2195_v26  ;;  %v2194_v43 = vmul.f32 %v5823_v44, %v7393_v14  ;;  %v5639_v14 = vld [vmem:[%s9464_s6 + $0x248] ss:$16 sps:$4 sm:$0xff]  }
 0x661   :  { %v5825_v34 = vpop.eup %5824  ;;  %v2363_v59 = vadd.f32 %v7791_v47, %v2278_v53  ;;  %v2362_v2 = vadd.f32 %v7797_v28, %v2277_v22  ;;  %v2361_v13 = vadd.f32 %v7800_v19, %v2276_v31 }
 0x662   :  { %5830 = vrsqrt.f32 %v2155_v0  ;;  %v2096_v4 = vpop.xlane.xlu0 %2095  ;;  %v2197_v61 = vmul.f32 %v5825_v34, %v7413_v32  ;;  %v2196_v17 = vmul.f32 %v5825_v34, %v7409_v60  ;;  %v2365_v44 = vadd.f32 %v7800_v19, %v2280_v49  ;;  %v5644_v60 = vld [vmem:[%s9464_s6 + $0x264] ss:$16 sps:$4 sm:$0xff]  }
 0x663   :  { %3352 = vmatpush1.bf16.msra.mxu0 %v5630_v6  ;;  %3578 = vmatpush1.bf16.msra.mxu1 %v5633_v37  ;;  %v2140_v1 = vmul.f32 0.001953125, %v2096_v4  ;;  %v2419_v54 = vpack.c.bf16 %v2363_v59, %v2359_v56  ;;  %v2418_v41 = vpack.c.bf16 %v2362_v2, %v2358_v45  ;;  %v2275_v6 = vmul.f32 %v7803_v51, %v2190_v38  ;;  %v5653_v4 = vld [vmem:[%s9464_s6 + $0x28c] ss:$16 sps:$4 sm:$0xff]  }
 0x664   :  { %v5827_v32 = vpop.eup %5826  ;;  %3353 = vmatprep.subr.bf16.mxu0 %v5638_v63  ;;  %3579 = vmatprep.subr.bf16.mxu1 %v5641_v16  ;;  %v2282_v23 = vmul.f32 %v7782_v27, %v2197_v61  ;;  %v2281_v56 = vmul.f32 %v7785_v10, %v2196_v17  ;;  %v7896_v0 = vpack.c.bf16 %v2365_v44, %v2361_v13 }
 0x665   :  { %v2156_v37 = vadd.f32 1e-05, %v2140_v1  ;;  %3278 = vmatprep.mubr.bf16.mxu0 %v2419_v54  ;;  %3504 = vmatprep.mubr.bf16.mxu1 %v2419_v54  ;;  %v2201_v22 = vmul.f32 %v5827_v32, %v7435_v36  ;;  %v2200_v26 = vmul.f32 %v5827_v32, %v7431_v8  ;;  %v2279_v31 = vmul.f32 %v7803_v51, %v2194_v43  ;;  %v5642_v36 = vld [vmem:[%s9464_s6 + $0x260] ss:$16 sps:$4 sm:$0xff]   ;;  %v5645_v8 = vld [vmem:[%s9464_s6 + $0x268] ss:$16 sps:$4 sm:$0xff]  }
 0x666   :  { %v2101_v53 = vpop.xlane.xlu1 %2100  ;;  %3279 = vmatmul.mubr.bf16.gmra.mrb[56].mxu0 %v2418_v41  ;;  %3505 = vmatmul.mubr.bf16.gmra.mrb[64].mxu1 %v2418_v41  ;;  %v2367_v45 = vadd.f32 %v7791_v47, %v2282_v23  ;;  %v2366_v16 = vadd.f32 %v7797_v28, %v2281_v56  ;;  %v2360_v2 = vadd.f32 %v7814_v7, %v2275_v6  ;;  %v5650_v43 = vld [vmem:[%s9464_s6 + $0x284] ss:$16 sps:$4 sm:$0xff]   ;;  %v5659_v56 = vld [vmem:[%s9464_s6 + $0x2ac] ss:$16 sps:$4 sm:$0xff]  }
 0x667   :  { %v2141_v63 = vmul.f32 0.001953125, %v2101_v53  ;;  %5832 = vrsqrt.f32 %v2156_v37  ;;  %3354 = vmatpush1.bf16.msra.mxu0 %v5636_v48  ;;  %3580 = vmatpush1.bf16.msra.mxu1 %v5639_v14  ;;  %v2286_v38 = vmul.f32 %v7782_v27, %v2201_v22  ;;  %v2285_v59 = vmul.f32 %v7785_v10, %v2200_v26 }
 0x668   :  { %3355 = vmatprep.subr.bf16.mxu0 %v5644_v60  ;;  %3581 = vmatprep.subr.bf16.mxu1 %v5647_v11  ;;  %v2364_v61 = vadd.f32 %v7814_v7, %v2279_v31  ;;  %v2199_v17 = vmul.f32 %v5825_v34, %v7423_v55  ;;  %v2203_v13 = vmul.f32 %v5827_v32, %v7445_v39 }
 0x669   :  { %v2157_v49 = vadd.f32 1e-05, %v2141_v63  ;;  %v7919_v1 = vpop.eup %5828  ;;  %v2371_v54 = vadd.f32 %v7791_v47, %v2286_v38  ;;  %v2370_v48 = vadd.f32 %v7797_v28, %v2285_v59  ;;  %v2198_v41 = vmul.f32 %v5825_v34, %v7417_v62  ;;  %v5648_v62 = vld [vmem:[%s9464_s6 + $0x280] ss:$16 sps:$4 sm:$0xff]  }
 0x66a   :  { %v2202_v14 = vmul.f32 %v5827_v32, %v7441_v21  ;;  %v2205_v60 = vmul.f32 %v7919_v1, %v7461_v35  ;;  %v2204_v55 = vmul.f32 %v7919_v1, %v7457_v12  ;;  %v7929_v11 = vpack.c.bf16 %v2364_v61, %v2360_v2  ;;  %v5651_v21 = vld [vmem:[%s9464_s6 + $0x288] ss:$16 sps:$4 sm:$0xff]   ;;  %v5656_v12 = vld [vmem:[%s9464_s6 + $0x2a4] ss:$16 sps:$4 sm:$0xff]   ;;  %v5665_v61 = vld [vmem:[%s9464_s6 + $0x2cc] ss:$16 sps:$4 sm:$0xff]  }
 0x66b   :  { %5834 = vrsqrt.f32 %v2157_v49  ;;  %v2106_v44 = vpop.xlane.xlu0 %2105  ;;  %3356 = vmatpush1.bf16.msra.mxu0 %v5642_v36  ;;  %3582 = vmatpush1.bf16.msra.mxu1 %v5645_v8  ;;  %v2423_v23 = vpack.c.bf16 %v2371_v54, %v2367_v45  ;;  %v2422_v34 = vpack.c.bf16 %v2370_v48, %v2366_v16  ;;  %v2284_v35 = vmul.f32 %v7788_v42, %v2199_v17 }
 0x66c   :  { %v2142_v39 = vmul.f32 0.001953125, %v2106_v44  ;;  %v7938_v32 = vpop.eup %5830  ;;  %3357 = vmatprep.subr.bf16.mxu0 %v5650_v43  ;;  %3583 = vmatprep.subr.bf16.mxu1 %v5653_v4  ;;  %v2290_v6 = vmul.f32 %v7782_v27, %v2205_v60  ;;  %v2289_v37 = vmul.f32 %v7785_v10, %v2204_v55  ;;  %v2288_v53 = vmul.f32 %v7788_v42, %v2203_v13  ;;  %v5662_v4 = vld [vmem:[%s9464_s6 + $0x2c4] ss:$16 sps:$4 sm:$0xff]  }
 0x66d   :  { %3288 = vmatprep.mubr.bf16.mxu0 %v2423_v23  ;;  %3514 = vmatprep.mubr.bf16.mxu1 %v2423_v23  ;;  %v2209_v63 = vmul.f32 %v7938_v32, %v7489_v20  ;;  %v2208_v45 = vmul.f32 %v7938_v32, %v7485_v33  ;;  %v2369_v16 = vadd.f32 %v7800_v19, %v2284_v35  ;;  %v5654_v20 = vld [vmem:[%s9464_s6 + $0x2a0] ss:$16 sps:$4 sm:$0xff]   ;;  %v5657_v33 = vld [vmem:[%s9464_s6 + $0x2a8] ss:$16 sps:$4 sm:$0xff]  }
 0x66e   :  { %v2158_v22 = vadd.f32 1e-05, %v2142_v39  ;;  %3289 = vmatmul.mubr.bf16.gmra.mrb[60].mxu0 %v2422_v34  ;;  %3515 = vmatmul.mubr.bf16.gmra.mrb[68].mxu1 %v2422_v34  ;;  %v2375_v36 = vadd.f32 %v7791_v47, %v2290_v6  ;;  %v2374_v8 = vadd.f32 %v7797_v28, %v2289_v37  ;;  %v2373_v38 = vadd.f32 %v7800_v19, %v2288_v53 }
 0x66f   :  { %3358 = vmatpush1.bf16.msra.mxu0 %v5648_v62  ;;  %3584 = vmatpush1.bf16.msra.mxu1 %v5651_v21  ;;  %v2294_v59 = vmul.f32 %v7782_v27, %v2209_v63  ;;  %v2293_v2 = vmul.f32 %v7785_v10, %v2208_v45  ;;  %v2283_v49 = vmul.f32 %v7803_v51, %v2198_v41  ;;  %v5660_v21 = vld [vmem:[%s9464_s6 + $0x2c0] ss:$16 sps:$4 sm:$0xff]   ;;  %v9815_v63 = vld [vmem:[#allocation29_spill] sm:$0xff] }
 0x670   :  { %v2111_v26 = vpop.xlane.xlu1 %2110  ;;  %5836 = vrsqrt.f32 %v2158_v22  ;;  %3359 = vmatprep.subr.bf16.mxu0 %v5656_v12  ;;  %3585 = vmatprep.subr.bf16.mxu1 %v5659_v56  ;;  %v7972_v17 = vpack.c.bf16 %v2373_v38, %v2369_v16  ;;  %v2287_v13 = vmul.f32 %v7803_v51, %v2202_v14  ;;  %v2207_v54 = vmul.f32 %v7919_v1, %v7471_v3  ;;  %v5671_v56 = vld [vmem:[%s9464_s6 + $0x2ec] ss:$16 sps:$4 sm:$0xff]   ;;  %v9816_v16 = vld [vmem:[#allocation28_spill] sm:$0xff] }
 0x671   :  { %v2143_v31 = vmul.f32 0.001953125, %v2111_v26  ;;  %v7977_v48 = vpop.eup %5832  ;;  %v2379_v41 = vadd.f32 %v7791_v47, %v2294_v59  ;;  %v2378_v44 = vadd.f32 %v7797_v28, %v2293_v2  ;;  %v2368_v60 = vadd.f32 %v7814_v7, %v2283_v49  ;;  %v5666_v59 = vld [vmem:[%s9464_s6 + $0x2e0] ss:$16 sps:$4 sm:$0xff]   ;;  %v5669_v2 = vld [vmem:[%s9464_s6 + $0x2e8] ss:$16 sps:$4 sm:$0xff]  }
 0x672   :  { %v2211_v55 = vmul.f32 %v7938_v32, %v7505_v18  ;;  %v2213_v23 = vmul.f32 %v7977_v48, %v7533_v9  ;;  %v2212_v14 = vmul.f32 %v7977_v48, %v7529_v46  ;;  %v2372_v3 = vadd.f32 %v7814_v7, %v2287_v13  ;;  %v5663_v18 = vld [vmem:[%s9464_s6 + $0x2c8] ss:$16 sps:$4 sm:$0xff]   ;;  %v5668_v46 = vld [vmem:[%s9464_s6 + $0x2e4] ss:$16 sps:$4 sm:$0xff]  }
 0x673   :  { %v2159_v43 = vadd.f32 1e-05, %v2143_v31  ;;  %3360 = vmatpush1.bf16.msra.mxu0 %v5654_v20  ;;  %3586 = vmatpush1.bf16.msra.mxu1 %v5657_v33  ;;  %v2427_v34 = vpack.c.bf16 %v2379_v41, %v2375_v36  ;;  %v2426_v35 = vpack.c.bf16 %v2378_v44, %v2374_v8  ;;  %v2292_v9 = vmul.f32 %v7788_v42, %v2207_v54  ;;  %v5674_v13 = vld [vmem:[%s9464_s6 + $0x304] ss:$16 sps:$4 sm:$0xff]   ;;  %v5677_v54 = vld [vmem:[%s9464_s6 + $0x30c] ss:$16 sps:$4 sm:$0xff]  }
 0x674   :  { %v2116_v39 = vpop.xlane.xlu0 %2115  ;;  %3361 = vmatprep.subr.bf16.mxu0 %v5662_v4  ;;  %3587 = vmatprep.subr.bf16.mxu1 %v5665_v61  ;;  %v2298_v6 = vmul.f32 %v7782_v27, %v2213_v23  ;;  %v2297_v37 = vmul.f32 %v7785_v10, %v2212_v14  ;;  %v8006_v53 = vpack.c.bf16 %v2372_v3, %v2368_v60  ;;  %v9817_v41 = vld [vmem:[#allocation24_spill] sm:$0xff]  ;;  %v9818_v60 = vld [vmem:[#allocation25_spill] sm:$0xff] }
 0x675   :  { %5838 = vrsqrt.f32 %v2159_v43  ;;  %v2144_v62 = vmul.f32 0.001953125, %v2116_v39  ;;  %v7996_v12 = vpop.eup %5834  ;;  %3298 = vmatprep.mubr.bf16.mxu0 %v2427_v34  ;;  %3524 = vmatprep.mubr.bf16.mxu1 %v2427_v34  ;;  %v2296_v36 = vmul.f32 %v7788_v42, %v2211_v55  ;;  %v2377_v33 = vadd.f32 %v7800_v19, %v2292_v9  ;;  %v9819_v39 = vld [vmem:[#allocation27_spill] sm:$0xff] }
 0x676   :  { %v2217_v45 = vmul.f32 %v7996_v12, %v9815_v63  ;;  %v2216_v31 = vmul.f32 %v7996_v12, %v9816_v16  ;;  %3299 = vmatmul.mubr.bf16.gmra.mrb[64].mxu0 %v2426_v35  ;;  %3525 = vmatmul.mubr.bf16.gmra.mrb[72].mxu1 %v2426_v35  ;;  %v2383_v38 = vadd.f32 %v7791_v47, %v2298_v6  ;;  %v5675_v63 = vld [vmem:[%s9464_s6 + $0x308] ss:$16 sps:$4 sm:$0xff]  }
 0x677   :  { %v2160_v22 = vadd.f32 1e-05, %v2144_v62  ;;  %v2382_v20 = vadd.f32 %v7797_v28, %v2297_v37  ;;  %3362 = vmatpush1.bf16.msra.mxu0 %v5660_v21  ;;  %3588 = vmatpush1.bf16.msra.mxu1 %v5663_v18  ;;  %v2381_v4 = vadd.f32 %v7800_v19, %v2296_v36  ;;  %v2206_v44 = vmul.f32 %v7919_v1, %v9817_v41  ;;  %v9820_v21 = vld [vmem:[#allocation7_spill] sm:$0xff]  ;;  %v9821_v1 = vld [vmem:[#allocation10_spill] sm:$0xff] }
 0x678   :  { %v2302_v49 = vmul.f32 %v7782_v27, %v2217_v45  ;;  %v2301_v43 = vmul.f32 %v7785_v10, %v2216_v31  ;;  %3363 = vmatprep.subr.bf16.mxu0 %v5668_v46  ;;  %3589 = vmatprep.subr.bf16.mxu1 %v5671_v56  ;;  %v2210_v55 = vmul.f32 %v7938_v32, %v9818_v60  ;;  %v9822_v32 = vld [vmem:[#allocation8_spill] sm:$0xff] }
 0x679   :  { %v2121_v26 = vpop.xlane.xlu1 %2120  ;;  %5840 = vrsqrt.f32 %v2160_v22  ;;  %v2215_v23 = vmul.f32 %v7977_v48, %v9819_v39  ;;  %v8041_v34 = vpack.c.bf16 %v2381_v4, %v2377_v33  ;;  %v2219_v35 = vmul.f32 %v7996_v12, %v9820_v21  ;;  %v5672_v22 = vld [vmem:[%s9464_s6 + $0x300] ss:$16 sps:$4 sm:$0xff]   ;;  %v5680_v36 = vld [vmem:[%s9464_s6 + $0x324] ss:$16 sps:$4 sm:$0xff]   ;;  %v9824_v4 = vld [vmem:[#allocation11_spill] sm:$0xff] }
 0x67a   :  { %v2145_v8 = vmul.f32 0.001953125, %v2121_v26  ;;  %v8037_v14 = vpop.eup %5836  ;;  %v2387_v3 = vadd.f32 %v7791_v47, %v2302_v49  ;;  %v2386_v62 = vadd.f32 %v7797_v28, %v2301_v43  ;;  %v2291_v56 = vmul.f32 %v7803_v51, %v2206_v44  ;;  %v9823_v49 = vld [vmem:[#allocation14_spill] sm:$0xff]  ;;  %v5689_v21 = vld [vmem:[%s9464_s6 + $0x34c] ss:$16 sps:$4 sm:$0xff]  }
 0x67b   :  { %v2221_v9 = vmul.f32 %v8037_v14, %v9821_v1  ;;  %v2220_v46 = vmul.f32 %v8037_v14, %v9822_v32  ;;  %3364 = vmatpush1.bf16.msra.mxu0 %v5666_v59  ;;  %3590 = vmatpush1.bf16.msra.mxu1 %v5669_v2  ;;  %v2295_v45 = vmul.f32 %v7803_v51, %v2210_v55  ;;  %v5678_v60 = vld [vmem:[%s9464_s6 + $0x320] ss:$16 sps:$4 sm:$0xff]   ;;  %v5681_v55 = vld [vmem:[%s9464_s6 + $0x328] ss:$16 sps:$4 sm:$0xff]  }
 0x67c   :  { %v2161_v61 = vadd.f32 1e-05, %v2145_v8  ;;  %v2431_v37 = vpack.c.bf16 %v2387_v3, %v2383_v38  ;;  %v2430_v26 = vpack.c.bf16 %v2386_v62, %v2382_v20  ;;  %3365 = vmatprep.subr.bf16.mxu0 %v5674_v13  ;;  %3591 = vmatprep.subr.bf16.mxu1 %v5677_v54  ;;  %v5683_v8 = vld [vmem:[%s9464_s6 + $0x32c] ss:$16 sps:$4 sm:$0xff]   ;;  %v2376_v33 = vadd.f32 %v7814_v7, %v2291_v56  ;;  %v5686_v62 = vld [vmem:[%s9464_s6 + $0x344] ss:$16 sps:$4 sm:$0xff]  }
 0x67d   :  { %v2126_v18 = vpop.xlane.xlu0 %2125  ;;  %v2306_v38 = vmul.f32 %v7782_v27, %v2221_v9  ;;  %v2305_v20 = vmul.f32 %v7785_v10, %v2220_v46  ;;  %v2380_v41 = vadd.f32 %v7814_v7, %v2295_v45  ;;  %v2300_v1 = vmul.f32 %v7788_v42, %v2215_v23  ;;  %v5684_v45 = vld [vmem:[%s9464_s6 + $0x340] ss:$16 sps:$4 sm:$0xff]  }
 0x67e   :  { %5842 = vrsqrt.f32 %v2161_v61  ;;  %v2146_v6 = vmul.f32 0.001953125, %v2126_v18  ;;  %3308 = vmatprep.mubr.bf16.mxu0 %v2431_v37  ;;  %3534 = vmatprep.mubr.bf16.mxu1 %v2431_v37  ;;  %v2304_v9 = vmul.f32 %v7788_v42, %v2219_v35 }
 0x67f   :  { %v8057_v16 = vpop.eup %5838  ;;  %3309 = vmatmul.mubr.bf16.gmra.mrb[68].mxu0 %v2430_v26  ;;  %3535 = vmatmul.mubr.bf16.gmra.mrb[76].mxu1 %v2430_v26  ;;  %v2391_v13 = vadd.f32 %v7791_v47, %v2306_v38  ;;  %v2390_v54 = vadd.f32 %v7797_v28, %v2305_v20  ;;  %v8089_v18 = vpack.c.bf16 %v2380_v41, %v2376_v33  ;;  %v5695_v38 = vld [vmem:[%s9464_s6 + $0x36c] ss:$16 sps:$4 sm:$0xff]  }
 0x680   :  { %v2131_v31 = vpop.xlane.xlu1 %2130  ;;  %v2162_v59 = vadd.f32 1e-05, %v2146_v6  ;;  %v2225_v43 = vmul.f32 %v8057_v16, %v9823_v49  ;;  %v2224_v61 = vmul.f32 %v8057_v16, %v9824_v4  ;;  %3366 = vmatpush1.bf16.msra.mxu0 %v5672_v22  ;;  %3592 = vmatpush1.bf16.msra.mxu1 %v5675_v63  ;;  %v9825_v6 = vld [vmem:[#allocation26_spill] sm:$0xff]  ;;  %v2385_v23 = vadd.f32 %v7800_v19, %v2300_v1 }
 0x681   :  { %v2147_v2 = vmul.f32 0.001953125, %v2131_v31  ;;  %3367 = vmatprep.subr.bf16.mxu0 %v5680_v36  ;;  %3593 = vmatprep.subr.bf16.mxu1 %v5683_v8  ;;  %v2214_v37 = vmul.f32 %v7977_v48, %v9825_v6  ;;  %v2389_v35 = vadd.f32 %v7800_v19, %v2304_v9  ;;  %v5687_v48 = vld [vmem:[%s9464_s6 + $0x348] ss:$16 sps:$4 sm:$0xff]   ;;  %v5692_v8 = vld [vmem:[%s9464_s6 + $0x364] ss:$16 sps:$4 sm:$0xff]  }
 0x682   :  { %5844 = vrsqrt.f32 %v2162_v59  ;;  %v2310_v39 = vmul.f32 %v7782_v27, %v2225_v43  ;;  %v2309_v3 = vmul.f32 %v7785_v10, %v2224_v61  ;;  %v9829_v6 = vld [vmem:[#allocation13_spill] sm:$0xff] }
 0x683   :  { %v2163_v44 = vadd.f32 1e-05, %v2147_v2  ;;  %v8093_v32 = vpop.eup %5840  ;;  %v8123_v59 = vpack.c.bf16 %v2389_v35, %v2385_v23  ;;  %v2299_v49 = vmul.f32 %v7803_v51, %v2214_v37  ;;  %v2226_v37 = vmul.f32 %v8057_v16, %v9829_v6 }
 0x684   :  { %v2395_v46 = vadd.f32 %v7791_v47, %v2310_v39  ;;  %v2394_v56 = vadd.f32 %v7797_v28, %v2309_v3  ;;  %v2229_v22 = vmul.f32 %v8093_v32, %v7677_v30  ;;  %v2228_v26 = vmul.f32 %v8093_v32, %v7673_v25  ;;  %3368 = vmatpush1.bf16.msra.mxu0 %v5678_v60  ;;  %v9826_v30 = vld [vmem:[#allocation6_spill] sm:$0xff]  ;;  %v5701_v60 = vld [vmem:[%s9464_s6 + $0x38c] ss:$16 sps:$4 sm:$0xff]   ;;  %v9827_v39 = vld [vmem:[#allocation12_spill] sm:$0xff] }
 0x685   :  { %5846 = vrsqrt.f32 %v2163_v44  ;;  %3594 = vmatpush1.bf16.msra.mxu1 %v5681_v55  ;;  %v2218_v36 = vmul.f32 %v7996_v12, %v9826_v30  ;;  %3369 = vmatprep.subr.bf16.mxu0 %v5686_v62  ;;  %v2384_v41 = vadd.f32 %v7814_v7, %v2299_v49  ;;  %v5698_v44 = vld [vmem:[%s9464_s6 + $0x384] ss:$16 sps:$4 sm:$0xff]   ;;  %v2223_v3 = vmul.f32 %v8037_v14, %v9827_v39  ;;  %v5702_v49 = vld [vmem:[%s9464_s6 + $0x3a0] ss:$16 sps:$4 sm:$0xff]   ;;  %v9833_v39 = vld [vmem:[#allocation15_spill] sm:$0xff] }
 0x686   :  { %v2435_v63 = vpack.c.bf16 %v2395_v46, %v2391_v13  ;;  %v2434_v31 = vpack.c.bf16 %v2394_v56, %v2390_v54  ;;  %3595 = vmatprep.subr.bf16.mxu1 %v5689_v21  ;;  %v2314_v20 = vmul.f32 %v7782_v27, %v2229_v22  ;;  %v2313_v33 = vmul.f32 %v7785_v10, %v2228_v26  ;;  %v5690_v13 = vld [vmem:[%s9464_s6 + $0x360] ss:$16 sps:$4 sm:$0xff]   ;;  %v9828_v46 = vld [vmem:[#allocation9_spill] sm:$0xff] }
 0x687   :  { %v2303_v61 = vmul.f32 %v7803_v51, %v2218_v36  ;;  %v2227_v62 = vmul.f32 %v8057_v16, %v7649_v50  ;;  %v2222_v56 = vmul.f32 %v8037_v14, %v9828_v46  ;;  %v2308_v50 = vmul.f32 %v7788_v42, %v2223_v3  ;;  %v5696_v14 = vld [vmem:[%s9464_s6 + $0x380] ss:$16 sps:$4 sm:$0xff]   ;;  %v9830_v36 = vld [vmem:[#allocation21_spill] sm:$0xff] }
 0x688   :  { %v8113_v25 = vpop.eup %5842  ;;  %3318 = vmatprep.mubr.bf16.mxu0 %v2435_v63  ;;  %3544 = vmatprep.mubr.bf16.mxu1 %v2435_v63  ;;  %v2399_v43 = vadd.f32 %v7791_v47, %v2314_v20  ;;  %v2398_v4 = vadd.f32 %v7797_v28, %v2313_v33  ;;  %v2230_v3 = vmul.f32 %v8093_v32, %v9833_v39 }
 0x689   :  { %v2233_v12 = vmul.f32 %v8113_v25, %v7705_v24  ;;  %v2232_v2 = vmul.f32 %v8113_v25, %v7701_v5  ;;  %3319 = vmatmul.mubr.bf16.gmra.mrb[72].mxu0 %v2434_v31  ;;  %3545 = vmatmul.mubr.bf16.gmra.mrb[80].mxu1 %v2434_v31  ;;  %v5693_v5 = vld [vmem:[%s9464_s6 + $0x368] ss:$16 sps:$4 sm:$0xff]   ;;  %v2388_v55 = vadd.f32 %v7814_v7, %v2303_v61  ;;  %v5707_v31 = vld [vmem:[%s9464_s6 + $0x3ac] ss:$16 sps:$4 sm:$0xff]  }
 0x68a   :  { %3370 = vmatpush1.bf16.msra.mxu0 %v5684_v45  ;;  %3596 = vmatpush1.bf16.msra.mxu1 %v5687_v48  ;;  %v5704_v45 = vld [vmem:[%s9464_s6 + $0x3a4] ss:$16 sps:$4 sm:$0xff]   ;;  %v2393_v20 = vadd.f32 %v7800_v19, %v2308_v50  ;;  %v9835_v50 = vld [vmem:[#allocation19_spill] sm:$0xff] }
 0x68b   :  { %v2318_v24 = vmul.f32 %v7782_v27, %v2233_v12  ;;  %v2317_v54 = vmul.f32 %v7785_v10, %v2232_v2  ;;  %3371 = vmatprep.subr.bf16.mxu0 %v5692_v8  ;;  %3597 = vmatprep.subr.bf16.mxu1 %v5695_v38  ;;  %v8165_v23 = vpack.c.bf16 %v2388_v55, %v2384_v41  ;;  %v9832_v55 = vld [vmem:[#allocation17_spill] sm:$0xff] }
 0x68c   :  { %v8153_v21 = vpop.eup %5844 }
 0x68d   :  { %v2403_v1 = vadd.f32 %v7791_v47, %v2318_v24  ;;  %v2402_v9 = vadd.f32 %v7797_v28, %v2317_v54  ;;  %v2237_v22 = vmul.f32 %v8153_v21, %v7731_v15  ;;  %v2236_v26 = vmul.f32 %v8153_v21, %v7727_v40  ;;  %v5699_v15 = vld [vmem:[%s9464_s6 + $0x388] ss:$16 sps:$4 sm:$0xff]   ;;  %v5713_v54 = vld [vmem:[%s9464_s6 + $0x3cc] ss:$16 sps:$4 sm:$0xff]  }
 0x68e   :  { %3372 = vmatpush1.bf16.msra.mxu0 %v5690_v13  ;;  %3598 = vmatpush1.bf16.msra.mxu1 %v5693_v5  ;;  %v2312_v40 = vmul.f32 %v7788_v42, %v2227_v62  ;;  %v5710_v13 = vld [vmem:[%s9464_s6 + $0x3c4] ss:$16 sps:$4 sm:$0xff]   ;;  %v2311_v24 = vmul.f32 %v7803_v51, %v2226_v37 }
 0x68f   :  { %v8168_v35 = vpop.eup %5846  ;;  %v2439_v63 = vpack.c.bf16 %v2403_v1, %v2399_v43  ;;  %v2438_v16 = vpack.c.bf16 %v2402_v9, %v2398_v4  ;;  %3373 = vmatprep.subr.bf16.mxu0 %v5698_v44  ;;  %3599 = vmatprep.subr.bf16.mxu1 %v5701_v60  ;;  %v2322_v30 = vmul.f32 %v7782_v27, %v2237_v22  ;;  %v5705_v43 = vld [vmem:[%s9464_s6 + $0x3a8] ss:$16 sps:$4 sm:$0xff]   ;;  %v9831_v44 = vld [vmem:[#allocation16_spill] sm:$0xff]  ;;  %v9834_v9 = vld [vmem:[#allocation18_spill] sm:$0xff] }
 0x690   :  { %v2241_v48 = vmul.f32 %v8168_v35, %v7749_v57  ;;  %v2240_v8 = vmul.f32 %v8168_v35, %v9830_v36  ;;  %v2321_v38 = vmul.f32 %v7785_v10, %v2236_v26  ;;  %v2397_v33 = vadd.f32 %v7800_v19, %v2312_v40 }
 0x691   :  { %3328 = vmatprep.mubr.bf16.mxu0 %v2439_v63  ;;  %3554 = vmatprep.mubr.bf16.mxu1 %v2439_v63  ;;  %v2407_v2 = vadd.f32 %v7791_v47, %v2322_v30  ;;  %v2231_v60 = vmul.f32 %v8093_v32, %v9831_v44  ;;  %v2234_v46 = vmul.f32 %v8113_v25, %v9834_v9  ;;  %v5711_v32 = vld [vmem:[%s9464_s6 + $0x3c8] ss:$16 sps:$4 sm:$0xff]  }
 0x692   :  { %3329 = vmatmul.mubr.bf16.gmra.mrb[76].mxu0 %v2438_v16  ;;  %3555 = vmatmul.mubr.bf16.gmra.mrb[84].mxu1 %v2438_v16  ;;  %v2326_v12 = vmul.f32 %v7782_v27, %v2241_v48  ;;  %v2325_v57 = vmul.f32 %v7785_v10, %v2240_v8  ;;  %v2406_v4 = vadd.f32 %v7797_v28, %v2321_v38  ;;  %v5719_v16 = vld [vmem:[%s9464_s6 + $0x3ec] ss:$16 sps:$4 sm:$0xff]   ;;  %v5714_v8 = vld [vmem:[%s9464_s6 + $0x3e0] ss:$16 sps:$4 sm:$0xff]  }
 0x693   :  { %3374 = vmatpush1.bf16.msra.mxu0 %v5696_v14  ;;  %3600 = vmatpush1.bf16.msra.mxu1 %v5699_v15  ;;  %v8201_v61 = vpack.c.bf16 %v2397_v33, %v2393_v20  ;;  %v2307_v27 = vmul.f32 %v7803_v51, %v2222_v56  ;;  %v5708_v56 = vld [vmem:[%s9464_s6 + $0x3c0] ss:$16 sps:$4 sm:$0xff]   ;;  %v2316_v6 = vmul.f32 %v7788_v42, %v2231_v60  ;;  %v5716_v14 = vld [vmem:[%s9464_s6 + $0x3e4] ss:$16 sps:$4 sm:$0xff]   ;;  %v9836_v48 = vld [vmem:[#allocation31_spill] sm:$0xff] }
 0x694   :  { %3375 = vmatprep.subr.bf16.mxu0 %v5704_v45  ;;  %3601 = vmatprep.subr.bf16.mxu1 %v5707_v31  ;;  %v2411_v10 = vadd.f32 %v7791_v47, %v2326_v12  ;;  %v2410_v5 = vadd.f32 %v7797_v28, %v2325_v57  ;;  %v2235_v47 = vmul.f32 %v8113_v25, %v9832_v55  ;;  %v9837_v20 = vld [vmem:[#allocation20_spill] sm:$0xff]  ;;  %v9838_v12 = vld [vmem:[#allocation30_spill] sm:$0xff]  ;;  %v5717_v57 = vld [vmem:[%s9464_s6 + $0x3e8] ss:$16 sps:$4 sm:$0xff]  }
 0x695   :  { %v2392_v41 = vadd.f32 %v7814_v7, %v2307_v27  ;;  %v2396_v28 = vadd.f32 %v7814_v7, %v2311_v24  ;;  %v2315_v22 = vmul.f32 %v7803_v51, %v2230_v3  ;;  %v2319_v25 = vmul.f32 %v7803_v51, %v2234_v46 }
 0x696   :  { %v2443_v62 = vpack.c.bf16 %v2411_v10, %v2407_v2  ;;  %v2442_v1 = vpack.c.bf16 %v2410_v5, %v2406_v4  ;;  %v2320_v37 = vmul.f32 %v7788_v42, %v2235_v47  ;;  %v2239_v63 = vmul.f32 %v8153_v21, %v9835_v50 }
 0x697   :  { %3376 = vmatpush1.bf16.msra.mxu0 %v5702_v49  ;;  %3602 = vmatpush1.bf16.msra.mxu1 %v5705_v43  ;;  %v2436_v26 = vpack.c.bf16 %v2396_v28, %v2392_v41  ;;  %v2401_v15 = vadd.f32 %v7800_v19, %v2316_v6  ;;  %v2400_v45 = vadd.f32 %v7814_v7, %v2315_v22 }
 0x698   :  { %3338 = vmatprep.mubr.bf16.mxu0 %v2443_v62  ;;  %3377 = vmatprep.subr.bf16.mxu0 %v5710_v13  ;;  %v2405_v40 = vadd.f32 %v7800_v19, %v2320_v37  ;;  %v2404_v31 = vadd.f32 %v7814_v7, %v2319_v25  ;;  %v2243_v30 = vmul.f32 %v8168_v35, %v9836_v48 }
 0x699   :  { %3564 = vmatprep.mubr.bf16.mxu1 %v2443_v62  ;;  %3603 = vmatprep.subr.bf16.mxu1 %v5713_v54  ;;  %v2324_v36 = vmul.f32 %v7788_v42, %v2239_v63  ;;  %v2238_v33 = vmul.f32 %v8153_v21, %v9837_v20  ;;  %v2242_v2 = vmul.f32 %v8168_v35, %v9838_v12 }
 0x69a   :  { %3339 = vmatmul.mubr.bf16.gmra.mrb[80].mxu0 %v2442_v1  ;;  %3565 = vmatmul.mubr.bf16.gmra.mrb[88].mxu1 %v2442_v1  ;;  %v2441_v38 = vpack.c.bf16 %v2405_v40, %v2401_v15  ;;  %v2440_v49 = vpack.c.bf16 %v2404_v31, %v2400_v45  ;;  %v2328_v43 = vmul.f32 %v7788_v42, %v2243_v30 }
 0x69b   :  { %3378 = vmatpush1.bf16.msra.mxu0 %v5708_v56  ;;  %3381 = vmatprep.mubr.bf16.mxu0 %v7835_v52  ;;  %v2323_v4 = vmul.f32 %v7803_v51, %v2238_v33  ;;  %v2327_v27 = vmul.f32 %v7803_v51, %v2242_v2  ;;  %v2409_v21 = vadd.f32 %v7800_v19, %v2324_v36  ;;  %v2574_v51 = vld [vmem:[%s9459_s8 + $0x13] sm:$0xf] }
 0x69c   :  { %3604 = vmatpush1.bf16.msra.mxu1 %v5711_v32  ;;  %3607 = vmatprep.mubr.bf16.mxu1 %v7835_v52  ;;  %v2413_v35 = vadd.f32 %v7800_v19, %v2328_v43  ;;  %v8294_v19 = vrot.slane %v2574_v51, %v9812_v29 }
 0x69d   :  { %3379 = vmatprep.subr.bf16.mxu0 %v5716_v14  ;;  %3605 = vmatprep.subr.bf16.mxu1 %v5719_v16  ;;  %v2408_v52 = vadd.f32 %v7814_v7, %v2323_v4  ;;  %v2412_v10 = vadd.f32 %v7814_v7, %v2327_v27  ;;  %v9839_v7 = vld [vmem:[#allocation2_spill] sm:$0xff] }
 0x69e   :  { %v2445_v13 = vpack.c.bf16 %v2413_v35, %v2409_v21  ;;  %v8291_v42 = vrot.slane %v2574_v51, %v9839_v7 }
 0x69f   :  { %3380 = vmatpush1.bf16.msra.mxu0 %v5714_v8  ;;  %v2444_v5 = vpack.c.bf16 %v2412_v10, %v2408_v52 }
 0x6a0   :  { %3606 = vmatpush1.bf16.msra.mxu1 %v5717_v57 }
 0x6a2   :  { %3382 = vmatmul.mubr.bf16.vlgmr.msra.gmra.mrb[52].mxu0 %v7851_v58 }
 0x6a3   :  { %3608 = vmatmul.mubr.bf16.vlgmr.msra.gmra.mrb[60].mxu1 %v7851_v58  ;;  %3391 = vmatprep.mubr.bf16.mxu0 %v7896_v0  ;;  %v9840_v58 = vld [vmem:[#allocation4_spill] sm:$0xff] }
 0x6a4   :  { %3617 = vmatprep.mubr.bf16.mxu1 %v7896_v0  ;;  %v8297_v0 = vrot.slane %v2574_v51, %v9840_v58 }
 0x6aa   :  { %3392 = vmatmul.mubr.bf16.gmra.mrb[56].mxu0 %v7929_v11 }
 0x6ab   :  { %3618 = vmatmul.mubr.bf16.gmra.mrb[64].mxu1 %v7929_v11  ;;  %3401 = vmatprep.mubr.bf16.mxu0 %v7972_v17 }
 0x6ac   :  { %3627 = vmatprep.mubr.bf16.mxu1 %v7972_v17  ;;  %v9841_v17 = vld [vmem:[#allocation5_spill] sm:$0xff] }
 0x6b2   :  { %3402 = vmatmul.mubr.bf16.gmra.mrb[60].mxu0 %v8006_v53 }
 0x6b3   :  { %3628 = vmatmul.mubr.bf16.gmra.mrb[68].mxu1 %v8006_v53  ;;  %3411 = vmatprep.mubr.bf16.mxu0 %v8041_v34  ;;  %v8300_v53 = vrot.slane %v2574_v51, %v9841_v17 }
 0x6b4   :  { %3637 = vmatprep.mubr.bf16.mxu1 %v8041_v34 }
 0x6ba   :  { %3412 = vmatmul.mubr.bf16.gmra.mrb[64].mxu0 %v8089_v18 }
 0x6bb   :  { %3638 = vmatmul.mubr.bf16.gmra.mrb[72].mxu1 %v8089_v18  ;;  %3421 = vmatprep.mubr.bf16.mxu0 %v8123_v59 }
 0x6bc   :  { %3647 = vmatprep.mubr.bf16.mxu1 %v8123_v59 }
 0x6c2   :  { %3422 = vmatmul.mubr.bf16.gmra.mrb[68].mxu0 %v8165_v23 }
 0x6c3   :  { %3648 = vmatmul.mubr.bf16.gmra.mrb[76].mxu1 %v8165_v23  ;;  %3431 = vmatprep.mubr.bf16.mxu0 %v8201_v61 }
 0x6c4   :  { %3657 = vmatprep.mubr.bf16.mxu1 %v8201_v61 }
 0x6ca   :  { %3432 = vmatmul.mubr.bf16.gmra.mrb[72].mxu0 %v2436_v26 }
 0x6cb   :  { %3658 = vmatmul.mubr.bf16.gmra.mrb[80].mxu1 %v2436_v26  ;;  %3441 = vmatprep.mubr.bf16.mxu0 %v2441_v38 }
 0x6cc   :  { %3667 = vmatprep.mubr.bf16.mxu1 %v2441_v38 }
 0x6d2   :  { %3442 = vmatmul.mubr.bf16.gmra.mrb[76].mxu0 %v2440_v49 }
 0x6d3   :  { %3668 = vmatmul.mubr.bf16.gmra.mrb[84].mxu1 %v2440_v49  ;;  %3451 = vmatprep.mubr.bf16.mxu0 %v2445_v13 }
 0x6d4   :  { %3677 = vmatprep.mubr.bf16.mxu1 %v2445_v13 }
 0x6da   :  { %3452 = vmatmul.mubr.bf16.gmra.mrb[80].mxu0 %v2444_v5 }
 0x6db   :  { %3678 = vmatmul.mubr.bf16.gmra.mrb[88].mxu1 %v2444_v5 }
 0x775   :  { %v3383_v11 = vpop.f32.mrb[52].mxu0 }
 0x776   :  { %v8303_v34 = vadd.f32 %v3383_v11, %v8291_v42  ;;  %v3609_v18 = vpop.f32.mrb[60].mxu1  ;;  %v3385_v59 = vpop.f32.mrb[53].mxu0 }
 0x777   :  { %v8306_v23 = vadd.f32 %v3609_v18, %v8294_v19  ;;  %v8309_v61 = vadd.f32 %v3385_v59, %v8297_v0  ;;  %v3611_v24 = vpop.f32.mrb[61].mxu1  ;;  %v3387_v54 = vpop.f32.mrb[54].mxu0 }
 0x778   :  { %v9611_v41 = vmax.f32 %v8303_v34, 0.0  ;;  %v8313_v44 = vadd.f32 %v3387_v54, %v8291_v42  ;;  %v3613_v60 = vpop.f32.mrb[62].mxu1  ;;  %v3389_v55 = vpop.f32.mrb[55].mxu0  ;;  %v8317_v39 = vadd.f32 %v3611_v24, %v8300_v53 }
 0x779   :  { %v9610_v47 = vmax.f32 %v8309_v61, 0.0  ;;  %v8320_v3 = vadd.f32 %v3613_v60, %v8294_v19  ;;  %v8323_v62 = vadd.f32 %v3389_v55, %v8297_v0  ;;  %v3615_v1 = vpop.f32.mrb[63].mxu1  ;;  %v9608_v9 = vmax.f32 %v8306_v23, 0.0 }
 0x77a   :  { %v9605_v28 = vmax.f32 %v8313_v44, 0.0  ;;  %v8333_v6 = vadd.f32 %v3615_v1, %v8300_v53  ;;  %v9599_v37 = vmax.f32 %v8317_v39, 0.0 }
 0x77b   :  { %v3754_v46 = vadd.f32 %v9610_v47, %v9611_v41  ;;  %v9604_v56 = vmax.f32 %v8323_v62, 0.0  ;;  %v9602_v22 = vmax.f32 %v8320_v3, 0.0 }
 0x77c   :  { %v9598_v30 = vmax.f32 %v8333_v6, 0.0 }
 0x77d   :  { %v3759_v32 = vadd.f32 %v9604_v56, %v9605_v28  ;;  %v3393_v26 = vpop.f32.mrb[56].mxu0  ;;  %v3755_v25 = vadd.f32 %v3754_v46, %v9608_v9 }
 0x77e   :  { %v8344_v50 = vadd.f32 %v3393_v26, %v8291_v42  ;;  %v3619_v63 = vpop.f32.mrb[64].mxu1  ;;  %v3395_v14 = vpop.f32.mrb[57].mxu0 }
 0x77f   :  { %v8347_v16 = vadd.f32 %v3619_v63, %v8294_v19  ;;  %v8350_v15 = vadd.f32 %v3395_v14, %v8297_v0  ;;  %v3621_v40 = vpop.f32.mrb[65].mxu1  ;;  %v3397_v45 = vpop.f32.mrb[58].mxu0  ;;  %v3756_v31 = vadd.f32 %v3755_v25, %v9599_v37  ;;  %v3760_v48 = vadd.f32 %v3759_v32, %v9602_v22 }
 0x780   :  { %v9597_v36 = vmax.f32 %v8344_v50, 0.0  ;;  %v8359_v8 = vadd.f32 %v3397_v45, %v8291_v42  ;;  %v3623_v38 = vpop.f32.mrb[66].mxu1  ;;  %v3399_v20 = vpop.f32.mrb[59].mxu0  ;;  %v8363_v12 = vadd.f32 %v3621_v40, %v8300_v53 }
 0x781   :  { %v9594_v33 = vmax.f32 %v8350_v15, 0.0  ;;  %v8366_v2 = vadd.f32 %v3623_v38, %v8294_v19  ;;  %v8369_v57 = vadd.f32 %v3399_v20, %v8297_v0  ;;  %v3625_v49 = vpop.f32.mrb[67].mxu1  ;;  %3757 = vadd.xlane.f32.xlu0 %v3756_v31  ;;  %v3761_v27 = vadd.f32 %v3760_v48, %v9598_v30 }
 0x782   :  { %v9589_v43 = vmax.f32 %v8359_v8, 0.0  ;;  %v8373_v4 = vadd.f32 %v3625_v49, %v8300_v53  ;;  %v9592_v21 = vmax.f32 %v8347_v16, 0.0  ;;  %v9584_v10 = vmax.f32 %v8363_v12, 0.0 }
 0x783   :  { %v3764_v35 = vadd.f32 %v9594_v33, %v9597_v36  ;;  %v9587_v52 = vmax.f32 %v8369_v57, 0.0  ;;  %3762 = vadd.xlane.f32.xlu1 %v3761_v27  ;;  %v9585_v5 = vmax.f32 %v8366_v2, 0.0 }
 0x784   :  { %v9582_v18 = vmax.f32 %v8373_v4, 0.0 }
 0x785   :  { %v3765_v13 = vadd.f32 %v3764_v35, %v9592_v21  ;;  %v3769_v51 = vadd.f32 %v9587_v52, %v9589_v43  ;;  %v3403_v11 = vpop.f32.mrb[60].mxu0 }
 0x786   :  { %v8393_v59 = vadd.f32 %v3403_v11, %v8291_v42  ;;  %v3629_v24 = vpop.f32.mrb[68].mxu1  ;;  %v3405_v54 = vpop.f32.mrb[61].mxu0 }
 0x787   :  { %v3766_v60 = vadd.f32 %v3765_v13, %v9584_v10  ;;  %v3770_v55 = vadd.f32 %v3769_v51, %v9585_v5  ;;  %v8400_v1 = vadd.f32 %v3629_v24, %v8294_v19  ;;  %v8403_v46 = vadd.f32 %v3405_v54, %v8297_v0  ;;  %v3631_v32 = vpop.f32.mrb[69].mxu1  ;;  %v3407_v26 = vpop.f32.mrb[62].mxu0 }
 0x788   :  { %v9579_v25 = vmax.f32 %v8393_v59, 0.0  ;;  %v8407_v63 = vadd.f32 %v3407_v26, %v8291_v42  ;;  %v3633_v14 = vpop.f32.mrb[70].mxu1  ;;  %v3409_v40 = vpop.f32.mrb[63].mxu0  ;;  %v8413_v48 = vadd.f32 %v3631_v32, %v8300_v53 }
 0x789   :  { %v3771_v45 = vadd.f32 %v3770_v55, %v9582_v18  ;;  %v9578_v31 = vmax.f32 %v8403_v46, 0.0  ;;  %v3635_v38 = vpop.f32.mrb[71].mxu1  ;;  %3767 = vadd.xlane.f32.xlu0 %v3766_v60  ;;  %v8417_v49 = vadd.f32 %v3633_v14, %v8294_v19  ;;  %v8420_v27 = vadd.f32 %v3409_v40, %v8297_v0 }
 0x78a   :  { %v9581_v20 = vmax.f32 %v8407_v63, 0.0  ;;  %v9577_v35 = vmax.f32 %v8400_v1, 0.0  ;;  %v8429_v11 = vadd.f32 %v3635_v38, %v8300_v53  ;;  %v9583_v24 = vmax.f32 %v8413_v48, 0.0 }
 0x78b   :  { %v3774_v13 = vadd.f32 %v9578_v31, %v9579_v25  ;;  %3772 = vadd.xlane.f32.xlu1 %v3771_v45  ;;  %v9580_v51 = vmax.f32 %v8420_v27, 0.0  ;;  %v9586_v55 = vmax.f32 %v8417_v49, 0.0 }
 0x78c   :  { %v9588_v25 = vmax.f32 %v8429_v11, 0.0 }
 0x78d   :  { %v3775_v54 = vadd.f32 %v3774_v13, %v9577_v35  ;;  %v3413_v60 = vpop.f32.mrb[64].mxu0  ;;  %v3779_v32 = vadd.f32 %v9580_v51, %v9581_v20 }
 0x78e   :  { %v8440_v26 = vadd.f32 %v3413_v60, %v8291_v42  ;;  %v3639_v14 = vpop.f32.mrb[72].mxu1  ;;  %v3415_v40 = vpop.f32.mrb[65].mxu0 }
 0x78f   :  { %v3776_v45 = vadd.f32 %v3775_v54, %v9583_v24  ;;  %v8445_v38 = vadd.f32 %v3639_v14, %v8294_v19  ;;  %v8448_v13 = vadd.f32 %v3415_v40, %v8297_v0  ;;  %v3641_v35 = vpop.f32.mrb[73].mxu1  ;;  %v3417_v31 = vpop.f32.mrb[66].mxu0  ;;  %v3780_v51 = vadd.f32 %v3779_v32, %v9586_v55 }
 0x790   :  { %v9591_v60 = vmax.f32 %v8440_v26, 0.0  ;;  %v8455_v20 = vadd.f32 %v3417_v31, %v8291_v42  ;;  %v3643_v18 = vpop.f32.mrb[74].mxu1  ;;  %v3419_v54 = vpop.f32.mrb[67].mxu0  ;;  %v8459_v24 = vadd.f32 %v3641_v35, %v8300_v53 }
 0x791   :  { %v9590_v14 = vmax.f32 %v8448_v13, 0.0  ;;  %v8462_v40 = vadd.f32 %v3643_v18, %v8294_v19  ;;  %v8465_v10 = vadd.f32 %v3419_v54, %v8297_v0  ;;  %v3645_v5 = vpop.f32.mrb[75].mxu1  ;;  %3777 = vadd.xlane.f32.xlu0 %v3776_v45  ;;  %v3781_v32 = vadd.f32 %v3780_v51, %v9588_v25 }
 0x792   :  { %v9596_v31 = vmax.f32 %v8455_v20, 0.0  ;;  %v8471_v55 = vadd.f32 %v3645_v5, %v8300_v53  ;;  %v9593_v52 = vmax.f32 %v8445_v38, 0.0  ;;  %v9600_v45 = vmax.f32 %v8459_v24, 0.0 }
 0x793   :  { %v3784_v18 = vadd.f32 %v9590_v14, %v9591_v60  ;;  %v9595_v35 = vmax.f32 %v8465_v10, 0.0  ;;  %3782 = vadd.xlane.f32.xlu1 %v3781_v32  ;;  %v9601_v54 = vmax.f32 %v8462_v40, 0.0 }
 0x794   :  { %v9603_v43 = vmax.f32 %v8471_v55, 0.0 }
 0x795   :  { %v3785_v51 = vadd.f32 %v3784_v18, %v9593_v52  ;;  %v3789_v5 = vadd.f32 %v9595_v35, %v9596_v31  ;;  %v3423_v25 = vpop.f32.mrb[68].mxu0 }
 0x796   :  { %v8489_v14 = vadd.f32 %v3423_v25, %v8291_v42  ;;  %v3649_v60 = vpop.f32.mrb[76].mxu1  ;;  %v3425_v32 = vpop.f32.mrb[69].mxu0 }
 0x797   :  { %v3786_v21 = vadd.f32 %v3785_v51, %v9600_v45  ;;  %v3790_v18 = vadd.f32 %v3789_v5, %v9601_v54  ;;  %v8496_v52 = vadd.f32 %v3649_v60, %v8294_v19  ;;  %v8499_v33 = vadd.f32 %v3425_v32, %v8297_v0  ;;  %v3651_v35 = vpop.f32.mrb[77].mxu1  ;;  %v3427_v31 = vpop.f32.mrb[70].mxu0 }
 0x798   :  { %v9607_v36 = vmax.f32 %v8489_v14, 0.0  ;;  %v8503_v25 = vadd.f32 %v3427_v31, %v8291_v42  ;;  %v3653_v30 = vpop.f32.mrb[78].mxu1  ;;  %v3429_v37 = vpop.f32.mrb[71].mxu0  ;;  %v8509_v60 = vadd.f32 %v3651_v35, %v8300_v53 }
 0x799   :  { %v3791_v51 = vadd.f32 %v3790_v18, %v9603_v43  ;;  %v9606_v5 = vmax.f32 %v8499_v33, 0.0  ;;  %v3655_v45 = vpop.f32.mrb[79].mxu1  ;;  %3787 = vadd.xlane.f32.xlu0 %v3786_v21  ;;  %v8513_v54 = vadd.f32 %v3653_v30, %v8294_v19  ;;  %v8516_v31 = vadd.f32 %v3429_v37, %v8297_v0 }
 0x79a   :  { %v9613_v32 = vmax.f32 %v8503_v25, 0.0  ;;  %v9609_v22 = vmax.f32 %v8496_v52, 0.0  ;;  %v8525_v21 = vadd.f32 %v3655_v45, %v8300_v53  ;;  %v9615_v43 = vmax.f32 %v8509_v60, 0.0 }
 0x79b   :  { %v3794_v18 = vadd.f32 %v9606_v5, %v9607_v36  ;;  %3792 = vadd.xlane.f32.xlu1 %v3791_v51  ;;  %v9612_v35 = vmax.f32 %v8516_v31, 0.0  ;;  %v9616_v56 = vmax.f32 %v8513_v54, 0.0 }
 0x79d   :  { %v3795_v30 = vadd.f32 %v3794_v18, %v9609_v22  ;;  %v3433_v37 = vpop.f32.mrb[72].mxu0  ;;  %v3799_v28 = vadd.f32 %v9612_v35, %v9613_v32 }
 0x79e   :  { %v8536_v51 = vadd.f32 %v3433_v37, %v8291_v42  ;;  %v3659_v5 = vpop.f32.mrb[80].mxu1  ;;  %v3435_v36 = vpop.f32.mrb[73].mxu0 }
 0x79f   :  { %v3796_v45 = vadd.f32 %v3795_v30, %v9615_v43  ;;  %v8541_v9 = vadd.f32 %v3659_v5, %v8294_v19  ;;  %v8544_v18 = vadd.f32 %v3435_v36, %v8297_v0  ;;  %v3661_v22 = vpop.f32.mrb[81].mxu1  ;;  %v3437_v47 = vpop.f32.mrb[74].mxu0  ;;  %v3800_v35 = vadd.f32 %v3799_v28, %v9616_v56 }
 0x7a0   :  { %9842 = vst [vmem:[#allocation23_spill] sm:$0xff] %v8536_v51  ;;  %v8551_v32 = vadd.f32 %v3437_v47, %v8291_v42  ;;  %v3663_v29 = vpop.f32.mrb[82].mxu1  ;;  %v3439_v30 = vpop.f32.mrb[75].mxu0  ;;  %v8555_v43 = vadd.f32 %v3661_v22, %v8300_v53  ;;  %v9849_v28 = vmax.f32 %v8525_v21, 0.0  ;;  %v9851_v22 = vmax.f32 %v8536_v51, 0.0 }
 0x7a1   :  { %9843 = vst [vmem:[#allocation22_spill] sm:$0xff] %v8541_v9  ;;  %9844 = vst [vmem:[#allocation29_spill] sm:$0xff] %v8544_v18  ;;  %v8558_v36 = vadd.f32 %v3663_v29, %v8294_v19  ;;  %v8561_v41 = vadd.f32 %v3439_v30, %v8297_v0  ;;  %v3665_v7 = vpop.f32.mrb[83].mxu1  ;;  %3797 = vadd.xlane.f32.xlu0 %v3796_v45  ;;  %v9619_v5 = vmax.f32 %v8541_v9, 0.0  ;;  %v9852_v29 = vmax.f32 %v8544_v18, 0.0 }
 0x7a2   :  { %9845 = vst [vmem:[#allocation28_spill] sm:$0xff] %v8551_v32  ;;  %9846 = vst [vmem:[#allocation24_spill] sm:$0xff] %v8555_v43  ;;  %v3801_v56 = vadd.f32 %v3800_v35, %v9849_v28  ;;  %v9622_v47 = vmax.f32 %v8551_v32, 0.0  ;;  %v8567_v37 = vadd.f32 %v3665_v7, %v8300_v53  ;;  %v9625_v45 = vmax.f32 %v8555_v43, 0.0 }
 0x7a3   :  { %9847 = vst [vmem:[#allocation25_spill] sm:$0xff] %v8558_v36  ;;  %9848 = vst [vmem:[#allocation27_spill] sm:$0xff] %v8561_v41  ;;  %v3804_v17 = vadd.f32 %v9852_v29, %v9851_v22  ;;  %v9621_v30 = vmax.f32 %v8561_v41, 0.0  ;;  %v9626_v28 = vmax.f32 %v8558_v36, 0.0 }
 0x7a4   :  { %9850 = vst [vmem:[#allocation7_spill] sm:$0xff] %v8567_v37  ;;  %3802 = vadd.xlane.f32.xlu1 %v3801_v56 }
 0x7a5   :  { %v3805_v35 = vadd.f32 %v3804_v17, %v9619_v5  ;;  %v3809_v7 = vadd.f32 %v9621_v30, %v9622_v47  ;;  %v3443_v58 = vpop.f32.mrb[76].mxu0 }
 0x7a6   :  { %v8585_v22 = vadd.f32 %v3443_v58, %v8291_v42  ;;  %v3669_v29 = vpop.f32.mrb[84].mxu1  ;;  %v3445_v56 = vpop.f32.mrb[77].mxu0 }
 0x7a7   :  { %v3806_v18 = vadd.f32 %v3805_v35, %v9625_v45  ;;  %v3810_v17 = vadd.f32 %v3809_v7, %v9626_v28  ;;  %v8592_v5 = vadd.f32 %v3669_v29, %v8294_v19  ;;  %v8595_v41 = vadd.f32 %v3445_v56, %v8297_v0  ;;  %v3671_v30 = vpop.f32.mrb[85].mxu1  ;;  %v3447_v47 = vpop.f32.mrb[78].mxu0 }
 0x7a8   :  { %9853 = vst [vmem:[#allocation10_spill] sm:$0xff] %v8585_v22  ;;  %v8599_v58 = vadd.f32 %v3447_v47, %v8291_v42  ;;  %v3673_v32 = vpop.f32.mrb[86].mxu1  ;;  %v3449_v9 = vpop.f32.mrb[79].mxu0  ;;  %v9856_v35 = vmax.f32 %v8567_v37, 0.0  ;;  %v8605_v29 = vadd.f32 %v3671_v30, %v8300_v53  ;;  %v9860_v37 = vmax.f32 %v8585_v22, 0.0 }
 0x7a9   :  { %9854 = vst [vmem:[#allocation8_spill] sm:$0xff] %v8595_v41  ;;  %v9631_v7 = vmax.f32 %v8595_v41, 0.0  ;;  %v3675_v28 = vpop.f32.mrb[87].mxu1  ;;  %3807 = vadd.xlane.f32.xlu0 %v3806_v18  ;;  %v8609_v43 = vadd.f32 %v3673_v32, %v8294_v19  ;;  %v8612_v47 = vadd.f32 %v3449_v9, %v8297_v0  ;;  %v9633_v51 = vmax.f32 %v8592_v5, 0.0 }
 0x7aa   :  { %9855 = vst [vmem:[#allocation14_spill] sm:$0xff] %v8599_v58  ;;  %v3811_v45 = vadd.f32 %v3810_v17, %v9856_v35  ;;  %9857 = vst [vmem:[#allocation11_spill] sm:$0xff] %v8605_v29  ;;  %v8621_v18 = vadd.f32 %v3675_v28, %v8300_v53  ;;  %v9638_v35 = vmax.f32 %v8605_v29, 0.0  ;;  %v9861_v36 = vmax.f32 %v8599_v58, 0.0 }
 0x7ab   :  { %9858 = vst [vmem:[#allocation26_spill] sm:$0xff] %v8609_v43  ;;  %9859 = vst [vmem:[#allocation6_spill] sm:$0xff] %v8612_v47  ;;  %v3814_v17 = vadd.f32 %v9631_v7, %v9860_v37  ;;  %v9635_v30 = vmax.f32 %v8612_v47, 0.0 }
 0x7ac   :  { %3812 = vadd.xlane.f32.xlu1 %v3811_v45 }
 0x7ad   :  { %v3815_v32 = vadd.f32 %v3814_v17, %v9633_v51  ;;  %v3453_v9 = vpop.f32.mrb[80].mxu0  ;;  %v3819_v41 = vadd.f32 %v9635_v30, %v9861_v36  ;;  %v9862_v36 = vmax.f32 %v8609_v43, 0.0 }
 0x7ae   :  { %v8632_v37 = vadd.f32 %v3453_v9, %v8291_v42  ;;  %v3679_v45 = vpop.f32.mrb[88].mxu1  ;;  %v3455_v7 = vpop.f32.mrb[81].mxu0 }
 0x7af   :  { %v3816_v28 = vadd.f32 %v3815_v32, %v9638_v35  ;;  %v8637_v22 = vadd.f32 %v3679_v45, %v8294_v19  ;;  %v8640_v17 = vadd.f32 %v3455_v7, %v8297_v0  ;;  %v3681_v51 = vpop.f32.mrb[89].mxu1  ;;  %v3457_v56 = vpop.f32.mrb[82].mxu0  ;;  %v3820_v30 = vadd.f32 %v3819_v41, %v9862_v36 }
 0x7b0   :  { %v9647_v9 = vmax.f32 %v8632_v37, 0.0  ;;  %v8647_v47 = vadd.f32 %v3457_v56, %v8291_v42  ;;  %v3683_v29 = vpop.f32.mrb[90].mxu1  ;;  %v3459_v32 = vpop.f32.mrb[83].mxu0  ;;  %v8651_v35 = vadd.f32 %v3681_v51, %v8300_v53  ;;  %v9863_v41 = vmax.f32 %v8621_v18, 0.0 }
 0x7b1   :  { %v9640_v45 = vmax.f32 %v8640_v17, 0.0  ;;  %v8654_v7 = vadd.f32 %v3683_v29, %v8294_v19  ;;  %v8657_v58 = vadd.f32 %v3459_v32, %v8297_v0  ;;  %v3685_v43 = vpop.f32.mrb[91].mxu1  ;;  %3817 = vadd.xlane.f32.xlu0 %v3816_v28  ;;  %v9646_v56 = vmax.f32 %v8637_v22, 0.0 }
 0x7b2   :  { %v3821_v36 = vadd.f32 %v3820_v30, %v9863_v41  ;;  %v9645_v42 = vmax.f32 %v8647_v47, 0.0  ;;  %v8669_v29 = vadd.f32 %v3685_v43, %v8300_v53  ;;  %v9642_v0 = vmax.f32 %v8651_v35, 0.0 }
 0x7b3   :  { %v3824_v51 = vadd.f32 %v9640_v45, %v9647_v9  ;;  %v9644_v19 = vmax.f32 %v8657_v58, 0.0  ;;  %v9643_v28 = vmax.f32 %v8654_v7, 0.0 }
 0x7b4   :  { %3822 = vadd.xlane.f32.xlu1 %v3821_v36  ;;  %v9641_v45 = vmax.f32 %v8669_v29, 0.0  ;;  %v5720_v36 = vld [vmem:[%s9465_s7 + $0x40] sm:$0xff]  }
 0x7b5   :  { %v3825_v30 = vadd.f32 %v3824_v51, %v9646_v56  ;;  %v3829_v32 = vadd.f32 %v9644_v19, %v9645_v42  ;;  %v5721_v51 = vld [vmem:[%s9465_s7] sm:$0xff]   ;;  %5120 = vmatprep.subr.bf16.mxu0 %v5720_v36  ;;  %v5727_v36 = vld [vmem:[%s9465_s7 + $0x88] sm:$0xff]  }
 0x7b6   :  { %5121 = vmatpush3.bf16.msra.mxu0 %v5721_v51  ;;  %v5728_v51 = vld [vmem:[%s9465_s7 + $0x50] sm:$0xff]  }
 0x7b7   :  { %v3826_v41 = vadd.f32 %v3825_v30, %v9642_v0  ;;  %v3830_v53 = vadd.f32 %v3829_v32, %v9643_v28  ;;  %v5722_v30 = vld [vmem:[%s9465_s7 + $0xc0] sm:$0xff]   ;;  %v9866_v0 = vmax.f32 %v8309_v61, 0.0  ;;  %v9867_v28 = vmax.f32 %v8306_v23, 0.0 }
 0x7b8   :  { %v5723_v32 = vld [vmem:[%s9465_s7 + $0x80] sm:$0xff]   ;;  %5184 = vmatprep.subr.bf16.mxu1 %v5722_v30  ;;  %v5729_v30 = vld [vmem:[%s9465_s7 + $0x10] sm:$0xff]   ;;  %v9871_v61 = vmax.f32 %v8323_v62, 0.0  ;;  %v9873_v23 = vmax.f32 %v8320_v3, 0.0 }
 0x7b9   :  { %v3831_v43 = vadd.f32 %v3830_v53, %v9641_v45  ;;  %3827 = vadd.xlane.f32.xlu0 %v3826_v41  ;;  %v5724_v41 = vld [vmem:[%s9465_s7 + $0x48] sm:$0xff]   ;;  %5185 = vmatpush3.bf16.msra.mxu1 %v5723_v32  ;;  %v5730_v32 = vld [vmem:[%s9465_s7 + $0xd0] sm:$0xff]  }
 0x7ba   :  { %v5725_v53 = vld [vmem:[%s9465_s7 + $0x8] sm:$0xff]   ;;  %5122 = vmatprep.subr.bf16.mxu0 %v5724_v41  ;;  %v5731_v41 = vld [vmem:[%s9465_s7 + $0x90] sm:$0xff]  }
 0x7bb   :  { %3832 = vadd.xlane.f32.xlu1 %v3831_v43  ;;  %v5726_v43 = vld [vmem:[%s9465_s7 + $0xc8] sm:$0xff]   ;;  %5123 = vmatpush3.bf16.msra.mxu0 %v5725_v53  ;;  %v5732_v53 = vld [vmem:[%s9465_s7 + $0x58] sm:$0xff]  }
 0x7bc   :  { %5186 = vmatprep.subr.bf16.mxu1 %v5726_v43  ;;  %5124 = vmatprep.subr.bf16.mxu0 %v5728_v51  ;;  %v5733_v43 = vld [vmem:[%s9465_s7 + $0x18] sm:$0xff]  }
 0x7bd   :  { %5187 = vmatpush3.bf16.msra.mxu1 %v5727_v36  ;;  %v5734_v36 = vld [vmem:[%s9465_s7 + $0xd8] sm:$0xff]  }
 0x7be   :  { %5188 = vmatprep.subr.bf16.mxu1 %v5730_v32  ;;  %v5735_v51 = vld [vmem:[%s9465_s7 + $0x98] sm:$0xff]   ;;  %v5737_v32 = vld [vmem:[%s9465_s7 + $0x20] sm:$0xff]  }
 0x7bf   :  { %5125 = vmatpush3.bf16.msra.mxu0 %v5729_v30  ;;  %v5736_v30 = vld [vmem:[%s9465_s7 + $0x60] sm:$0xff]  }
 0x7c0   :  { %5126 = vmatprep.subr.bf16.mxu0 %v5732_v53  ;;  %v5739_v53 = vld [vmem:[%s9465_s7 + $0xa0] sm:$0xff]  }
 0x7c1   :  { %5189 = vmatpush3.bf16.msra.mxu1 %v5731_v41  ;;  %v5738_v41 = vld [vmem:[%s9465_s7 + $0xe0] sm:$0xff]  }
 0x7c2   :  { %5190 = vmatprep.subr.bf16.mxu1 %v5734_v36 }
 0x7c3   :  { %5127 = vmatpush3.bf16.msra.mxu0 %v5733_v43 }
 0x7c4   :  { %5128 = vmatprep.subr.bf16.mxu0 %v5736_v30 }
 0x7c5   :  { %5191 = vmatpush3.bf16.msra.mxu1 %v5735_v51  ;;  %v9864_v51 = vmax.f32 %v8303_v34, 0.0  ;;  %v9869_v34 = vmax.f32 %v8313_v44, 0.0  ;;  %v9875_v44 = vmax.f32 %v8333_v6, 0.0  ;;  %v9876_v6 = vmax.f32 %v8344_v50, 0.0 }
 0x7c6   :  { %5192 = vmatprep.subr.bf16.mxu1 %v5738_v41  ;;  %v9880_v50 = vmax.f32 %v8369_v57, 0.0  ;;  %v9883_v57 = vmax.f32 %v8373_v4, 0.0 }
 0x7c7   :  { %5129 = vmatpush3.bf16.msra.mxu0 %v5737_v32 }
 0x7c9   :  { %5193 = vmatpush3.bf16.msra.mxu1 %v5739_v53 }
 0x80e   :  { %v3758_v43 = vpop.xlane.xlu0 %3757 }
 0x80f   :  { %v3834_v36 = vmul.f32 0.001953125, %v3758_v43 }
 0x810   :  { %v3763_v32 = vpop.xlane.xlu1 %3762 }
 0x811   :  { %v8748_v45 = vsub.f32 %v9864_v51, %v3834_v36  ;;  %v8752_v30 = vsub.f32 %v9866_v0, %v3834_v36  ;;  %v8756_v19 = vsub.f32 %v9867_v28, %v3834_v36  ;;  %v3835_v42 = vmul.f32 0.001953125, %v3763_v32 }
 0x812   :  { %v9874_v51 = vmax.f32 %v8317_v39, 0.0 }
 0x813   :  { %9865 = vst [vmem:[#allocation12_spill] sm:$0xff] %v8748_v45  ;;  %9868 = vst [vmem:[#allocation9_spill] sm:$0xff] %v8756_v19  ;;  %v3914_v41 = vmul.f32 %v8748_v45, %v8748_v45  ;;  %v3915_v53 = vmul.f32 %v8752_v30, %v8752_v30  ;;  %v8764_v43 = vsub.f32 %v9869_v34, %v3835_v42 }
 0x814   :  { %v8768_v0 = vsub.f32 %v9871_v61, %v3835_v42  ;;  %v8772_v28 = vsub.f32 %v9873_v23, %v3835_v42  ;;  %v8776_v32 = vsub.f32 %v9874_v51, %v3834_v36  ;;  %v3916_v56 = vmul.f32 %v8756_v19, %v8756_v19 }
 0x815   :  { %9870 = vst [vmem:[#allocation13_spill] sm:$0xff] %v8764_v43  ;;  %v3978_v9 = vadd.f32 %v3915_v53, %v3914_v41  ;;  %v8782_v34 = vsub.f32 %v9875_v44, %v3835_v42  ;;  %v3918_v62 = vmul.f32 %v8764_v43, %v8764_v43  ;;  %v9877_v51 = vmax.f32 %v8350_v15, 0.0 }
 0x816   :  { %9872 = vst [vmem:[#allocation21_spill] sm:$0xff] %v8768_v0  ;;  %v3768_v45 = vpop.xlane.xlu0 %3767  ;;  %v3919_v3 = vmul.f32 %v8768_v0, %v8768_v0  ;;  %v3917_v36 = vmul.f32 %v8776_v32, %v8776_v32  ;;  %v3920_v41 = vmul.f32 %v8772_v28, %v8772_v28  ;;  %v9881_v15 = vmax.f32 %v8366_v2, 0.0 }
 0x817   :  { %v3836_v61 = vmul.f32 0.001953125, %v3768_v45  ;;  %v3979_v23 = vadd.f32 %v3978_v9, %v3916_v56  ;;  %v9878_v45 = vmax.f32 %v8347_v16, 0.0  ;;  %v3921_v0 = vmul.f32 %v8782_v34, %v8782_v34 }
 0x818   :  { %v3773_v39 = vpop.xlane.xlu1 %3772  ;;  %v3983_v53 = vadd.f32 %v3919_v3, %v3918_v62  ;;  %v9879_v62 = vmax.f32 %v8359_v8, 0.0 }
 0x819   :  { %v8794_v42 = vsub.f32 %v9876_v6, %v3836_v61  ;;  %v8798_v44 = vsub.f32 %v9877_v51, %v3836_v61  ;;  %v3837_v43 = vmul.f32 0.001953125, %v3773_v39  ;;  %v8802_v9 = vsub.f32 %v9878_v45, %v3836_v61 }
 0x81a   :  { %v3980_v56 = vadd.f32 %v3979_v23, %v3917_v36  ;;  %v3984_v19 = vadd.f32 %v3983_v53, %v3920_v41  ;;  %v9882_v36 = vmax.f32 %v8363_v12, 0.0 }
 0x81b   :  { %v8808_v3 = vsub.f32 %v9879_v62, %v3837_v43  ;;  %v8812_v6 = vsub.f32 %v9880_v50, %v3837_v43  ;;  %v8816_v39 = vsub.f32 %v9881_v15, %v3837_v43  ;;  %v3922_v16 = vmul.f32 %v8794_v42, %v8794_v42 }
 0x81c   :  { %3981 = vadd.xlane.f32.xlu0 %v3980_v56  ;;  %v3985_v23 = vadd.f32 %v3984_v19, %v3921_v0  ;;  %v8822_v41 = vsub.f32 %v9882_v36, %v3836_v61  ;;  %v3923_v8 = vmul.f32 %v8798_v44, %v8798_v44  ;;  %v8828_v53 = vsub.f32 %v9883_v57, %v3837_v43 }
 0x81d   :  { %v3926_v2 = vmul.f32 %v8808_v3, %v8808_v3  ;;  %v3927_v51 = vmul.f32 %v8812_v6, %v8812_v6  ;;  %v3924_v12 = vmul.f32 %v8802_v9, %v8802_v9  ;;  %v3928_v61 = vmul.f32 %v8816_v39, %v8816_v39 }
 0x81e   :  { %3986 = vadd.xlane.f32.xlu1 %v3985_v23  ;;  %v3778_v45 = vpop.xlane.xlu0 %3777  ;;  %v3988_v19 = vadd.f32 %v3923_v8, %v3922_v16  ;;  %v3925_v4 = vmul.f32 %v8822_v41, %v8822_v41  ;;  %v3929_v62 = vmul.f32 %v8828_v53, %v8828_v53  ;;  %v9884_v50 = vmax.f32 %v8393_v59, 0.0 }
 0x81f   :  { %v3838_v0 = vmul.f32 0.001953125, %v3778_v45  ;;  %v3993_v56 = vadd.f32 %v3927_v51, %v3926_v2  ;;  %v9885_v23 = vmax.f32 %v8403_v46, 0.0  ;;  %v9886_v16 = vmax.f32 %v8400_v1, 0.0 }
 0x820   :  { %v3989_v43 = vadd.f32 %v3988_v19, %v3924_v12  ;;  %v3783_v57 = vpop.xlane.xlu1 %3782 }
 0x821   :  { %v8844_v15 = vsub.f32 %v9884_v50, %v3838_v0  ;;  %v8848_v36 = vsub.f32 %v9885_v23, %v3838_v0  ;;  %v8852_v8 = vsub.f32 %v9886_v16, %v3838_v0  ;;  %v3994_v2 = vadd.f32 %v3993_v56, %v3928_v61 }
 0x822   :  { %v3839_v51 = vmul.f32 0.001953125, %v3783_v57  ;;  %v3990_v45 = vadd.f32 %v3989_v43, %v3925_v4  ;;  %v9887_v50 = vmax.f32 %v8407_v63, 0.0  ;;  %v9888_v23 = vmax.f32 %v8420_v27, 0.0 }
 0x823   :  { %v3995_v12 = vadd.f32 %v3994_v2, %v3929_v62  ;;  %v3930_v19 = vmul.f32 %v8844_v15, %v8844_v15  ;;  %v3931_v59 = vmul.f32 %v8848_v36, %v8848_v36  ;;  %v9889_v16 = vmax.f32 %v8417_v49, 0.0 }
 0x824   :  { %v8860_v46 = vsub.f32 %v9887_v50, %v3839_v51  ;;  %v8864_v1 = vsub.f32 %v9888_v23, %v3839_v51  ;;  %3991 = vadd.xlane.f32.xlu0 %v3990_v45  ;;  %v9890_v56 = vmax.f32 %v8413_v48, 0.0  ;;  %v3932_v43 = vmul.f32 %v8852_v8, %v8852_v8 }
 0x825   :  { %v8868_v61 = vsub.f32 %v9889_v16, %v3839_v51  ;;  %3996 = vadd.xlane.f32.xlu1 %v3995_v12  ;;  %v3998_v63 = vadd.f32 %v3931_v59, %v3930_v19  ;;  %v9891_v57 = vmax.f32 %v8429_v11, 0.0  ;;  %v9892_v11 = vmax.f32 %v8440_v26, 0.0 }
 0x826   :  { %v8872_v4 = vsub.f32 %v9890_v56, %v3838_v0  ;;  %v3788_v62 = vpop.xlane.xlu0 %3787  ;;  %v3934_v49 = vmul.f32 %v8860_v46, %v8860_v46  ;;  %v3935_v2 = vmul.f32 %v8864_v1, %v8864_v1  ;;  %v9893_v50 = vmax.f32 %v8448_v13, 0.0 }
 0x827   :  { %v8878_v27 = vsub.f32 %v9891_v57, %v3839_v51  ;;  %v3840_v45 = vmul.f32 0.001953125, %v3788_v62  ;;  %v3999_v48 = vadd.f32 %v3998_v63, %v3932_v43  ;;  %v3936_v19 = vmul.f32 %v8868_v61, %v8868_v61 }
 0x828   :  { %v3793_v0 = vpop.xlane.xlu1 %3792  ;;  %v3933_v12 = vmul.f32 %v8872_v4, %v8872_v4  ;;  %v4003_v59 = vadd.f32 %v3935_v2, %v3934_v49  ;;  %v9894_v56 = vmax.f32 %v8445_v38, 0.0  ;;  %v9896_v49 = vmax.f32 %v8455_v20, 0.0 }
 0x829   :  { %v8890_v51 = vsub.f32 %v9892_v11, %v3840_v45  ;;  %v8894_v23 = vsub.f32 %v9893_v50, %v3840_v45  ;;  %v3841_v16 = vmul.f32 0.001953125, %v3793_v0  ;;  %v3937_v62 = vmul.f32 %v8878_v27, %v8878_v27 }
 0x82a   :  { %v8898_v43 = vsub.f32 %v9894_v56, %v3840_v45  ;;  %v4000_v63 = vadd.f32 %v3999_v48, %v3933_v12  ;;  %v4004_v57 = vadd.f32 %v4003_v59, %v3936_v19  ;;  %v9897_v26 = vmax.f32 %v8465_v10, 0.0 }
 0x82b   :  { %v8904_v2 = vsub.f32 %v9896_v49, %v3841_v16  ;;  %v9898_v13 = vmax.f32 %v8462_v40, 0.0  ;;  %v3938_v38 = vmul.f32 %v8890_v51, %v8890_v51  ;;  %v9900_v12 = vmax.f32 %v8459_v24, 0.0 }
 0x82c   :  { %9895 = vst [vmem:[#allocation16_spill] sm:$0xff] %v8898_v43  ;;  %v8908_v11 = vsub.f32 %v9897_v26, %v3841_v16  ;;  %4001 = vadd.xlane.f32.xlu0 %v4000_v63  ;;  %v4005_v48 = vadd.f32 %v4004_v57, %v3937_v62  ;;  %v3939_v20 = vmul.f32 %v8894_v23, %v8894_v23  ;;  %v9901_v10 = vmax.f32 %v8471_v55, 0.0  ;;  %v5740_v63 = vld [vmem:[%s9465_s7 + $0x68] sm:$0xff]  }
 0x82d   :  { %v8912_v0 = vsub.f32 %v9898_v13, %v3841_v16  ;;  %v8918_v19 = vsub.f32 %v9900_v12, %v3840_v45  ;;  %v3942_v40 = vmul.f32 %v8904_v2, %v8904_v2  ;;  %v3940_v24 = vmul.f32 %v8898_v43, %v8898_v43  ;;  %5130 = vmatprep.subr.bf16.mxu0 %v5740_v63  ;;  %v5741_v13 = vld [vmem:[%s9465_s7 + $0x28] sm:$0xff]  }
 0x82e   :  { %v8924_v59 = vsub.f32 %v9901_v10, %v3841_v16  ;;  %v3943_v50 = vmul.f32 %v8908_v11, %v8908_v11  ;;  %4006 = vadd.xlane.f32.xlu1 %v4005_v48  ;;  %v3798_v56 = vpop.xlane.xlu0 %3797  ;;  %v4008_v45 = vadd.f32 %v3939_v20, %v3938_v38  ;;  %v5742_v38 = vld [vmem:[%s9465_s7 + $0xe8] sm:$0xff]   ;;  %v9902_v12 = vmax.f32 %v8489_v14, 0.0  ;;  %5131 = vmatpush3.bf16.msra.mxu0 %v5741_v13 }
 0x82f   :  { %9899 = vst [vmem:[#allocation17_spill] sm:$0xff] %v8912_v0  ;;  %v3842_v62 = vmul.f32 0.001953125, %v3798_v56  ;;  %v3944_v55 = vmul.f32 %v8912_v0, %v8912_v0  ;;  %v3941_v57 = vmul.f32 %v8918_v19, %v8918_v19  ;;  %v5743_v48 = vld [vmem:[%s9465_s7 + $0xa8] sm:$0xff]   ;;  %v9904_v10 = vmax.f32 %v8499_v33, 0.0  ;;  %5194 = vmatprep.subr.bf16.mxu1 %v5742_v38 }
 0x830   :  { %v4013_v16 = vadd.f32 %v3943_v50, %v3942_v40  ;;  %v4009_v49 = vadd.f32 %v4008_v45, %v3940_v24  ;;  %v3945_v26 = vmul.f32 %v8924_v59, %v8924_v59  ;;  %v9905_v50 = vmax.f32 %v8496_v52, 0.0  ;;  %5195 = vmatpush3.bf16.msra.mxu1 %v5743_v48  ;;  %v5745_v48 = vld [vmem:[%s9465_s7 + $0x30] sm:$0xff]  }
 0x831   :  { %v8952_v20 = vsub.f32 %v9902_v12, %v3842_v62  ;;  %v8956_v40 = vsub.f32 %v9904_v10, %v3842_v62  ;;  %v3803_v24 = vpop.xlane.xlu1 %3802  ;;  %v9907_v33 = vmax.f32 %v8503_v25, 0.0  ;;  %v9909_v52 = vmax.f32 %v8516_v31, 0.0 }
 0x832   :  { %v8960_v56 = vsub.f32 %v9905_v50, %v3842_v62  ;;  %v4014_v45 = vadd.f32 %v4013_v16, %v3944_v55  ;;  %v3843_v63 = vmul.f32 0.001953125, %v3803_v24  ;;  %v4010_v0 = vadd.f32 %v4009_v49, %v3941_v57  ;;  %v5747_v24 = vld [vmem:[%s9465_s7 + $0xb0] sm:$0xff]  }
 0x833   :  { %9903 = vst [vmem:[#allocation15_spill] sm:$0xff] %v8952_v20  ;;  %v3946_v14 = vmul.f32 %v8952_v20, %v8952_v20  ;;  %v3947_v12 = vmul.f32 %v8956_v40, %v8956_v40  ;;  %v9910_v55 = vmax.f32 %v8513_v54, 0.0  ;;  %v9912_v57 = vmax.f32 %v8509_v60, 0.0  ;;  %v5744_v60 = vld [vmem:[%s9465_s7 + $0x70] sm:$0xff]  }
 0x834   :  { %9906 = vst [vmem:[#allocation18_spill] sm:$0xff] %v8960_v56  ;;  %v4015_v43 = vadd.f32 %v4014_v45, %v3945_v26  ;;  %v8968_v10 = vsub.f32 %v9907_v33, %v3843_v63  ;;  %v8972_v50 = vsub.f32 %v9909_v52, %v3843_v63  ;;  %4011 = vadd.xlane.f32.xlu0 %v4010_v0  ;;  %v9913_v38 = vmax.f32 %v8525_v21, 0.0  ;;  %v5746_v21 = vld [vmem:[%s9465_s7 + $0xf0] sm:$0xff]   ;;  %v9914_v33 = vld [vmem:[#allocation23_spill] sm:$0xff] }
 0x835   :  { %v8976_v16 = vsub.f32 %v9910_v55, %v3843_v63  ;;  %v8980_v49 = vsub.f32 %v9912_v57, %v3842_v62  ;;  %v3948_v26 = vmul.f32 %v8960_v56, %v8960_v56  ;;  %v4018_v25 = vadd.f32 %v3947_v12, %v3946_v14  ;;  %5132 = vmatprep.subr.bf16.mxu0 %v5744_v60  ;;  %v9917_v57 = vld [vmem:[#allocation29_spill] sm:$0xff]  ;;  %v9923_v60 = vld [vmem:[#allocation28_spill] sm:$0xff] }
 0x836   :  { %9908 = vst [vmem:[#allocation19_spill] sm:$0xff] %v8968_v10  ;;  %4016 = vadd.xlane.f32.xlu1 %v4015_v43  ;;  %v3808_v13 = vpop.xlane.xlu0 %3807  ;;  %v8986_v31 = vsub.f32 %v9913_v38, %v3843_v63  ;;  %v3950_v54 = vmul.f32 %v8968_v10, %v8968_v10  ;;  %v3951_v0 = vmul.f32 %v8972_v50, %v8972_v50  ;;  %v9915_v52 = vmax.f32 %v9914_v33, 0.0  ;;  %v9920_v38 = vld [vmem:[#allocation22_spill] sm:$0xff] }
 0x837   :  { %9911 = vst [vmem:[#allocation31_spill] sm:$0xff] %v8976_v16  ;;  %v3844_v43 = vmul.f32 0.001953125, %v3808_v13  ;;  %v4019_v62 = vadd.f32 %v4018_v25, %v3948_v26  ;;  %v3949_v63 = vmul.f32 %v8980_v49, %v8980_v49  ;;  %v3952_v14 = vmul.f32 %v8976_v16, %v8976_v16  ;;  %5133 = vmatpush3.bf16.msra.mxu0 %v5745_v48  ;;  %v9929_v48 = vld [vmem:[#allocation25_spill] sm:$0xff] }
 0x838   :  { %v4023_v12 = vadd.f32 %v3951_v0, %v3950_v54  ;;  %v9918_v26 = vmax.f32 %v9917_v57, 0.0  ;;  %5196 = vmatprep.subr.bf16.mxu1 %v5746_v21  ;;  %v9921_v56 = vmax.f32 %v9920_v38, 0.0  ;;  %v3953_v54 = vmul.f32 %v8986_v31, %v8986_v31  ;;  %v9926_v57 = vld [vmem:[#allocation27_spill] sm:$0xff] }
 0x839   :  { %v3813_v45 = vpop.xlane.xlu1 %3812  ;;  %v9010_v55 = vsub.f32 %v9915_v52, %v3844_v43  ;;  %v4020_v20 = vadd.f32 %v4019_v62, %v3949_v63  ;;  %5197 = vmatpush3.bf16.msra.mxu1 %v5747_v24  ;;  %v9924_v33 = vmax.f32 %v9923_v60, 0.0  ;;  %v9930_v21 = vmax.f32 %v9929_v48, 0.0  ;;  %v9932_v63 = vld [vmem:[#allocation24_spill] sm:$0xff]  ;;  %v9935_v38 = vld [vmem:[#allocation7_spill] sm:$0xff] }
 0x83a   :  { %v9014_v25 = vsub.f32 %v9918_v26, %v3844_v43  ;;  %v3845_v13 = vmul.f32 0.001953125, %v3813_v45  ;;  %v9018_v10 = vsub.f32 %v9921_v56, %v3844_v43  ;;  %v4024_v0 = vadd.f32 %v4023_v12, %v3952_v14 }
 0x83b   :  { %9916 = vst [vmem:[#allocation20_spill] sm:$0xff] %v9010_v55  ;;  %v9927_v26 = vmax.f32 %v9926_v57, 0.0  ;;  %v3954_v56 = vmul.f32 %v9010_v55, %v9010_v55  ;;  %4021 = vadd.xlane.f32.xlu0 %v4020_v20  ;;  %v9933_v14 = vmax.f32 %v9932_v63, 0.0  ;;  %v9936_v60 = vmax.f32 %v9935_v38, 0.0  ;;  %v5751_v38 = vld [vmem:[%s9465_s7 + $0xb8] sm:$0xff]  }
 0x83c   :  { %9919 = vst [vmem:[#allocation30_spill] sm:$0xff] %v9014_v25  ;;  %9922 = vst [vmem:[#allocation23_spill] sm:$0xff] %v9018_v10  ;;  %v9024_v52 = vsub.f32 %v9924_v33, %v3845_v13  ;;  %v9032_v45 = vsub.f32 %v9930_v21, %v3845_v13  ;;  %v4025_v62 = vadd.f32 %v4024_v0, %v3953_v54  ;;  %v5748_v0 = vld [vmem:[%s9465_s7 + $0x78] sm:$0xff]  }
 0x83d   :  { %v9028_v16 = vsub.f32 %v9927_v26, %v3845_v13  ;;  %v9038_v24 = vsub.f32 %v9933_v14, %v3844_v43  ;;  %v3955_v12 = vmul.f32 %v9014_v25, %v9014_v25  ;;  %v9044_v33 = vsub.f32 %v9936_v60, %v3845_v13  ;;  %5134 = vmatprep.subr.bf16.mxu0 %v5748_v0  ;;  %v9938_v60 = vld [vmem:[#allocation10_spill] sm:$0xff] }
 0x83e   :  { %9925 = vst [vmem:[#allocation29_spill] sm:$0xff] %v9024_v52  ;;  %9931 = vst [vmem:[#allocation28_spill] sm:$0xff] %v9032_v45  ;;  %v3958_v57 = vmul.f32 %v9024_v52, %v9024_v52  ;;  %4026 = vadd.xlane.f32.xlu1 %v4025_v62  ;;  %v3818_v20 = vpop.xlane.xlu0 %3817  ;;  %v3956_v54 = vmul.f32 %v9018_v10, %v9018_v10  ;;  %v3960_v13 = vmul.f32 %v9032_v45, %v9032_v45 }
 0x83f   :  { %9928 = vst [vmem:[#allocation22_spill] sm:$0xff] %v9028_v16  ;;  %9934 = vst [vmem:[#allocation27_spill] sm:$0xff] %v9038_v24  ;;  %v3959_v26 = vmul.f32 %v9028_v16, %v9028_v16  ;;  %v4028_v43 = vadd.f32 %v3955_v12, %v3954_v56  ;;  %v3846_v48 = vmul.f32 0.001953125, %v3818_v20  ;;  %v3957_v63 = vmul.f32 %v9038_v24, %v9038_v24  ;;  %v5749_v56 = vld [vmem:[%s9465_s7 + $0x38] sm:$0xff]   ;;  %v9940_v20 = vld [vmem:[#allocation8_spill] sm:$0xff] }
 0x840   :  { %9937 = vst [vmem:[#allocation25_spill] sm:$0xff] %v9044_v33  ;;  %v3961_v62 = vmul.f32 %v9044_v33, %v9044_v33  ;;  %v5750_v12 = vld [vmem:[%s9465_s7 + $0xf8] sm:$0xff]   ;;  %v9942_v0 = vmax.f32 %v8592_v5, 0.0  ;;  %5135 = vmatpush3.bf16.msra.mxu0 %v5749_v56  ;;  %v9946_v5 = vld [vmem:[#allocation6_spill] sm:$0xff] }
 0x841   :  { %v4033_v21 = vadd.f32 %v3959_v26, %v3958_v57  ;;  %v4029_v14 = vadd.f32 %v4028_v43, %v3956_v54  ;;  %v9939_v57 = vmax.f32 %v9938_v60, 0.0  ;;  %v9941_v54 = vmax.f32 %v9940_v20, 0.0  ;;  %v3823_v10 = vpop.xlane.xlu1 %3822  ;;  %5198 = vmatprep.subr.bf16.mxu1 %v5750_v12  ;;  %v9944_v20 = vld [vmem:[#allocation14_spill] sm:$0xff] }
 0x842   :  { %v9080_v45 = vsub.f32 %v9942_v0, %v3846_v48  ;;  %v3847_v55 = vmul.f32 0.001953125, %v3823_v10  ;;  %5199 = vmatpush3.bf16.msra.mxu1 %v5751_v38  ;;  %v9947_v0 = vmax.f32 %v9946_v5, 0.0  ;;  %v9948_v10 = vld [vmem:[#allocation26_spill] sm:$0xff]  ;;  %v9953_v38 = vmax.f32 %v8621_v18, 0.0 }
 0x843   :  { %v9072_v26 = vsub.f32 %v9939_v57, %v3846_v48  ;;  %v9076_v43 = vsub.f32 %v9941_v54, %v3846_v48  ;;  %v4034_v52 = vadd.f32 %v4033_v21, %v3960_v13  ;;  %v4030_v33 = vadd.f32 %v4029_v14, %v3957_v63 }
 0x844   :  { %9943 = vst [vmem:[#allocation24_spill] sm:$0xff] %v9080_v45  ;;  %v9945_v54 = vmax.f32 %v9944_v20, 0.0  ;;  %v9092_v25 = vsub.f32 %v9947_v0, %v3847_v55  ;;  %v9949_v13 = vmax.f32 %v9948_v10, 0.0  ;;  %v9106_v20 = vsub.f32 %v9953_v38, %v3847_v55 }
 0x845   :  { %v4035_v24 = vadd.f32 %v4034_v52, %v3961_v62  ;;  %v3962_v60 = vmul.f32 %v9072_v26, %v9072_v26  ;;  %v3963_v57 = vmul.f32 %v9076_v43, %v9076_v43  ;;  %4031 = vadd.xlane.f32.xlu0 %v4030_v33  ;;  %v9951_v52 = vld [vmem:[#allocation11_spill] sm:$0xff]  ;;  %v3964_v62 = vmul.f32 %v9080_v45, %v9080_v45 }
 0x846   :  { %v9088_v16 = vsub.f32 %v9945_v54, %v3847_v55  ;;  %v9096_v21 = vsub.f32 %v9949_v13, %v3847_v55  ;;  %v9952_v63 = vmax.f32 %v9951_v52, 0.0  ;;  %v3828_v12 = vpop.xlane.xlu0 %3827  ;;  %v3967_v33 = vmul.f32 %v9092_v25, %v9092_v25 }
 0x847   :  { %4036 = vadd.xlane.f32.xlu1 %v4035_v24  ;;  %v4038_v56 = vadd.f32 %v3963_v57, %v3962_v60  ;;  %v3848_v5 = vmul.f32 0.001953125, %v3828_v12  ;;  %v9954_v18 = vmax.f32 %v8632_v37, 0.0  ;;  %v9956_v10 = vmax.f32 %v8640_v17, 0.0 }
 0x848   :  { %9950 = vst [vmem:[#allocation7_spill] sm:$0xff] %v9096_v21  ;;  %v9100_v14 = vsub.f32 %v9952_v63, %v3846_v48  ;;  %v3966_v54 = vmul.f32 %v9088_v16, %v9088_v16  ;;  %v3833_v48 = vpop.xlane.xlu1 %3832  ;;  %v3968_v60 = vmul.f32 %v9096_v21, %v9096_v21  ;;  %v9958_v63 = vmax.f32 %v8637_v22, 0.0 }
 0x849   :  { %v4039_v0 = vadd.f32 %v4038_v56, %v3964_v62  ;;  %v9118_v55 = vsub.f32 %v9954_v18, %v3848_v5  ;;  %v9122_v13 = vsub.f32 %v9956_v10, %v3848_v5  ;;  %v3849_v52 = vmul.f32 0.001953125, %v3833_v48 }
 0x84a   :  { %v3965_v24 = vmul.f32 %v9100_v14, %v9100_v14  ;;  %v4043_v57 = vadd.f32 %v3967_v33, %v3966_v54  ;;  %v9126_v62 = vsub.f32 %v9958_v63, %v3848_v5  ;;  %v3969_v12 = vmul.f32 %v9106_v20, %v9106_v20 }
 0x84b   :  { %9955 = vst [vmem:[#allocation10_spill] sm:$0xff] %v9118_v55  ;;  %9957 = vst [vmem:[#allocation8_spill] sm:$0xff] %v9122_v13  ;;  %v9960_v54 = vmax.f32 %v8647_v47, 0.0  ;;  %v9962_v37 = vmax.f32 %v8657_v58, 0.0  ;;  %v9964_v17 = vmax.f32 %v8654_v7, 0.0  ;;  %v3970_v22 = vmul.f32 %v9118_v55, %v9118_v55 }
 0x84c   :  { %9959 = vst [vmem:[#allocation14_spill] sm:$0xff] %v9126_v62  ;;  %v4040_v56 = vadd.f32 %v4039_v0, %v3965_v24  ;;  %v4044_v38 = vadd.f32 %v4043_v57, %v3968_v60  ;;  %v9966_v24 = vmax.f32 %v8651_v35, 0.0  ;;  %v3971_v47 = vmul.f32 %v9122_v13, %v9122_v13 }
 0x84d   :  { %v9132_v33 = vsub.f32 %v9960_v54, %v3849_v52  ;;  %v9136_v18 = vsub.f32 %v9962_v37, %v3849_v52  ;;  %v9140_v48 = vsub.f32 %v9964_v17, %v3849_v52  ;;  %v9968_v58 = vmax.f32 %v8669_v29, 0.0 }
 0x84e   :  { %4041 = vadd.xlane.f32.xlu0 %v4040_v56  ;;  %v4045_v0 = vadd.f32 %v4044_v38, %v3969_v12  ;;  %v9146_v60 = vsub.f32 %v9966_v24, %v3848_v5  ;;  %v3972_v63 = vmul.f32 %v9126_v62, %v9126_v62  ;;  %v4048_v35 = vadd.f32 %v3971_v47, %v3970_v22 }
 0x84f   :  { %9961 = vst [vmem:[#allocation6_spill] sm:$0xff] %v9132_v33  ;;  %9963 = vst [vmem:[#allocation26_spill] sm:$0xff] %v9136_v18  ;;  %v9152_v57 = vsub.f32 %v9968_v58, %v3849_v52  ;;  %v3974_v7 = vmul.f32 %v9132_v33, %v9132_v33  ;;  %v3975_v10 = vmul.f32 %v9136_v18, %v9136_v18  ;;  %v9975_v33 = vld [vmem:[#allocation3_spill] sm:$0xff] }
 0x850   :  { %9965 = vst [vmem:[#allocation11_spill] sm:$0xff] %v9140_v48  ;;  %9967 = vst [vmem:[#allocation32_spill] sm:$0xff] %v9146_v60  ;;  %4046 = vadd.xlane.f32.xlu1 %v4045_v0  ;;  %v3976_v5 = vmul.f32 %v9140_v48, %v9140_v48  ;;  %v3973_v29 = vmul.f32 %v9146_v60, %v9146_v60  ;;  %v4049_v52 = vadd.f32 %v4048_v35, %v3972_v63  ;;  %v9976_v60 = vld [vmem:[#allocation21_spill] sm:$0xff] }
 0x851   :  { %9969 = vst [vmem:[#allocation33_spill] sm:$0xff] %v9152_v57  ;;  %v4053_v56 = vadd.f32 %v3975_v10, %v3974_v7  ;;  %v3977_v12 = vmul.f32 %v9152_v57, %v9152_v57 }
 0x852   :  { %v4050_v54 = vadd.f32 %v4049_v52, %v3973_v29  ;;  %v3753_v29 = vld [vmem:[%s9459_s8 + $0x1b] sm:$0xf]  ;;  %v9970_v52 = vld [vmem:[#allocation4_spill] sm:$0xff] }
 0x853   :  { %v4054_v38 = vadd.f32 %v4053_v56, %v3976_v5  ;;  %v3752_v5 = vld [vmem:[%s9459_s8 + $0x17] sm:$0xf] }
 0x854   :  { %4051 = vadd.xlane.f32.xlu0 %v4050_v54  ;;  %v9195_v55 = vrot.slane %v3752_v5, %v9975_v33 }
 0x855   :  { %v4055_v37 = vadd.f32 %v4054_v38, %v3977_v12  ;;  %v9173_v12 = vrot.slane %v3752_v5, %v9970_v52  ;;  %v9971_v38 = vld [vmem:[#allocation5_spill] sm:$0xff] }
 0x856   :  { %v9176_v54 = vrot.slane %v3752_v5, %v9971_v38 }
 0x857   :  { %4056 = vadd.xlane.f32.xlu1 %v4055_v37 }
 0x8a9   :  { %v3982_v17 = vpop.xlane.xlu0 %3981 }
 0x8aa   :  { %v4058_v0 = vmul.f32 0.001953125, %v3982_v17  ;;  %v9972_v17 = vld [vmem:[#allocation2_spill] sm:$0xff] }
 0x8ab   :  { %v3987_v24 = vpop.xlane.xlu1 %3986 }
 0x8ac   :  { %v4074_v22 = vadd.f32 1e-05, %v4058_v0  ;;  %v4059_v47 = vmul.f32 0.001953125, %v3987_v24  ;;  %v9182_v0 = vrot.slane %v3752_v5, %v9972_v17 }
 0x8ae   :  { %5848 = vrsqrt.f32 %v4074_v22  ;;  %v4075_v58 = vadd.f32 1e-05, %v4059_v47 }
 0x8b0   :  { %5850 = vrsqrt.f32 %v4075_v58  ;;  %v9187_v58 = vrot.slane %v3753_v29, %v9971_v38 }
 0x8b1   :  { %v3992_v7 = vpop.xlane.xlu0 %3991 }
 0x8b2   :  { %v4060_v10 = vmul.f32 0.001953125, %v3992_v7  ;;  %v3997_v48 = vpop.xlane.xlu1 %3996  ;;  %v9973_v7 = vld [vmem:[#allocation12_spill] sm:$0xff] }
 0x8b3   :  { %v4061_v63 = vmul.f32 0.001953125, %v3997_v48  ;;  %v9179_v48 = vrot.slane %v3753_v29, %v9970_v52  ;;  %v9974_v52 = vld [vmem:[#allocation9_spill] sm:$0xff] }
 0x8b4   :  { %v4076_v35 = vadd.f32 1e-05, %v4060_v10 }
 0x8b5   :  { %v4077_v56 = vadd.f32 1e-05, %v4061_v63 }
 0x8b6   :  { %5852 = vrsqrt.f32 %v4076_v35 }
 0x8b7   :  { %5854 = vrsqrt.f32 %v4077_v56  ;;  %v9191_v56 = vrot.slane %v3753_v29, %v9972_v17 }
 0x8b8   :  { %v5849_v37 = vpop.eup %5848 }
 0x8b9   :  { %v4002_v24 = vpop.xlane.xlu0 %4001  ;;  %v4107_v22 = vmul.f32 %v5849_v37, %v8752_v30  ;;  %v4109_v47 = vmul.f32 %v5849_v37, %v8776_v32  ;;  %v4106_v10 = vmul.f32 %v5849_v37, %v9973_v7  ;;  %v4108_v62 = vmul.f32 %v5849_v37, %v9974_v52 }
 0x8ba   :  { %v5851_v63 = vpop.eup %5850  ;;  %v4062_v35 = vmul.f32 0.001953125, %v4002_v24  ;;  %v9977_v24 = vld [vmem:[#allocation13_spill] sm:$0xff] }
 0x8bb   :  { %v4007_v57 = vpop.xlane.xlu1 %4006  ;;  %v4111_v30 = vmul.f32 %v5851_v63, %v9976_v60  ;;  %v4192_v32 = vmul.f32 %v9173_v12, %v4107_v22  ;;  %v4113_v38 = vmul.f32 %v5851_v63, %v8782_v34  ;;  %v4194_v18 = vmul.f32 %v9176_v54, %v4109_v47 }
 0x8bc   :  { %v4078_v7 = vadd.f32 1e-05, %v4062_v35  ;;  %v4063_v13 = vmul.f32 0.001953125, %v4007_v57  ;;  %v4110_v21 = vmul.f32 %v5851_v63, %v9977_v24  ;;  %v4191_v17 = vmul.f32 %v9182_v0, %v4106_v10 }
 0x8bd   :  { %v4196_v37 = vmul.f32 %v9173_v12, %v4111_v30  ;;  %v4277_v5 = vadd.f32 %v9179_v48, %v4192_v32  ;;  %v4198_v52 = vmul.f32 %v9176_v54, %v4113_v38  ;;  %v9207_v60 = vrot.slane %v3753_v29, %v9975_v33 }
 0x8be   :  { %5856 = vrsqrt.f32 %v4078_v7  ;;  %v4079_v22 = vadd.f32 1e-05, %v4063_v13  ;;  %v4279_v34 = vadd.f32 %v9187_v58, %v4194_v18  ;;  %v4195_v47 = vmul.f32 %v9182_v0, %v4110_v21 }
 0x8bf   :  { %v4281_v57 = vadd.f32 %v9179_v48, %v4196_v37  ;;  %v4283_v35 = vadd.f32 %v9187_v58, %v4198_v52  ;;  %v4112_v10 = vmul.f32 %v5851_v63, %v8772_v28  ;;  %v4193_v30 = vmul.f32 %v9195_v55, %v4108_v62 }
 0x8c0   :  { %v5853_v32 = vpop.eup %5852  ;;  %5858 = vrsqrt.f32 %v4079_v22  ;;  %v4276_v38 = vadd.f32 %v9191_v56, %v4191_v17  ;;  %v4280_v33 = vadd.f32 %v9191_v56, %v4195_v47 }
 0x8c1   :  { %v5855_v29 = vpop.eup %5854  ;;  %v4012_v13 = vpop.xlane.xlu0 %4011  ;;  %v4341_v7 = vpack.c.bf16 %v4281_v57, %v4277_v5  ;;  %v4343_v18 = vpack.c.bf16 %v4283_v35, %v4279_v34  ;;  %v4197_v21 = vmul.f32 %v9195_v55, %v4112_v10  ;;  %v4278_v24 = vadd.f32 %v9207_v60, %v4193_v30 }
 0x8c2   :  { %v4064_v37 = vmul.f32 0.001953125, %v4012_v13  ;;  %v4340_v45 = vpack.c.bf16 %v4280_v33, %v4276_v38  ;;  %v4115_v28 = vmul.f32 %v5853_v32, %v8798_v44  ;;  %v4119_v62 = vmul.f32 %v5855_v29, %v8812_v6 }
 0x8c3   :  { %v4017_v52 = vpop.xlane.xlu1 %4016  ;;  %4667 = vmatprep.mubr.bf16.mxu0 %v4341_v7  ;;  %4764 = vmatprep.mubr.bf16.mxu1 %v4343_v18  ;;  %v4282_v17 = vadd.f32 %v9207_v60, %v4197_v21  ;;  %v4117_v22 = vmul.f32 %v5853_v32, %v8822_v41  ;;  %v4121_v5 = vmul.f32 %v5855_v29, %v8828_v53 }
 0x8c4   :  { %v4065_v63 = vmul.f32 0.001953125, %v4017_v52  ;;  %v4080_v34 = vadd.f32 1e-05, %v4064_v37  ;;  %4668 = vmatmul.mubr.bf16.vlgmr.msra.gmra.mrb[84].mxu0 %v4340_v45  ;;  %v4200_v47 = vmul.f32 %v9173_v12, %v4115_v28  ;;  %v4204_v57 = vmul.f32 %v9173_v12, %v4119_v62 }
 0x8c5   :  { %v4114_v35 = vmul.f32 %v5853_v32, %v8794_v42  ;;  %v4342_v10 = vpack.c.bf16 %v4282_v17, %v4278_v24  ;;  %v4202_v6 = vmul.f32 %v9176_v54, %v4117_v22  ;;  %v4206_v30 = vmul.f32 %v9176_v54, %v4121_v5 }
 0x8c6   :  { %v4081_v44 = vadd.f32 1e-05, %v4065_v63  ;;  %5860 = vrsqrt.f32 %v4080_v34  ;;  %v4285_v38 = vadd.f32 %v9179_v48, %v4200_v47  ;;  %v4289_v41 = vadd.f32 %v9179_v48, %v4204_v57 }
 0x8c7   :  { %v4118_v53 = vmul.f32 %v5855_v29, %v8808_v3  ;;  %4765 = vmatmul.mubr.bf16.vlgmr.msra.gmra.mrb[92].mxu1 %v4342_v10  ;;  %v4287_v45 = vadd.f32 %v9187_v58, %v4202_v6  ;;  %v4291_v33 = vadd.f32 %v9187_v58, %v4206_v30  ;;  %v4199_v42 = vmul.f32 %v9182_v0, %v4114_v35 }
 0x8c8   :  { %5862 = vrsqrt.f32 %v4081_v44  ;;  %v5857_v13 = vpop.eup %5856  ;;  %v4345_v7 = vpack.c.bf16 %v4289_v41, %v4285_v38  ;;  %v4116_v21 = vmul.f32 %v5853_v32, %v8802_v9  ;;  %v4120_v24 = vmul.f32 %v5855_v29, %v8816_v39  ;;  %v4022_v37 = vpop.xlane.xlu0 %4021 }
 0x8c9   :  { %v4203_v18 = vmul.f32 %v9182_v0, %v4118_v53  ;;  %v4347_v52 = vpack.c.bf16 %v4291_v33, %v4287_v45  ;;  %v4284_v3 = vadd.f32 %v9191_v56, %v4199_v42  ;;  %v4123_v28 = vmul.f32 %v5857_v13, %v8848_v36 }
 0x8ca   :  { %v4125_v62 = vmul.f32 %v5857_v13, %v8872_v4  ;;  %v5859_v63 = vpop.eup %5858  ;;  %v4066_v17 = vmul.f32 0.001953125, %v4022_v37  ;;  %4675 = vmatprep.mubr.bf16.mxu0 %v4345_v7  ;;  %v4201_v5 = vmul.f32 %v9195_v55, %v4116_v21  ;;  %v4205_v34 = vmul.f32 %v9195_v55, %v4120_v24 }
 0x8cb   :  { %v4288_v22 = vadd.f32 %v9191_v56, %v4203_v18  ;;  %v4027_v9 = vpop.xlane.xlu1 %4026  ;;  %4772 = vmatprep.mubr.bf16.mxu1 %v4347_v52  ;;  %v4127_v39 = vmul.f32 %v5859_v63, %v8864_v1  ;;  %v4208_v32 = vmul.f32 %v9173_v12, %v4123_v28  ;;  %v4129_v29 = vmul.f32 %v5859_v63, %v8878_v27 }
 0x8cc   :  { %v4210_v36 = vmul.f32 %v9176_v54, %v4125_v62  ;;  %v4082_v4 = vadd.f32 1e-05, %v4066_v17  ;;  %v4067_v47 = vmul.f32 0.001953125, %v4027_v9  ;;  %v4286_v35 = vadd.f32 %v9207_v60, %v4201_v5 }
 0x8cd   :  { %v4344_v57 = vpack.c.bf16 %v4288_v22, %v4284_v3  ;;  %v4290_v44 = vadd.f32 %v9207_v60, %v4205_v34  ;;  %v4212_v10 = vmul.f32 %v9173_v12, %v4127_v39  ;;  %v4293_v6 = vadd.f32 %v9179_v48, %v4208_v32 }
 0x8ce   :  { %v4214_v30 = vmul.f32 %v9176_v54, %v4129_v29  ;;  %5864 = vrsqrt.f32 %v4082_v4  ;;  %v4083_v1 = vadd.f32 1e-05, %v4067_v47  ;;  %v4295_v27 = vadd.f32 %v9187_v58, %v4210_v36 }
 0x8cf   :  { %4676 = vmatmul.mubr.bf16.gmra.mrb[88].mxu0 %v4344_v57  ;;  %v4122_v38 = vmul.f32 %v5857_v13, %v8844_v15  ;;  %v4346_v41 = vpack.c.bf16 %v4290_v44, %v4286_v35  ;;  %v4297_v53 = vadd.f32 %v9179_v48, %v4212_v10  ;;  %v4126_v33 = vmul.f32 %v5859_v63, %v8860_v46 }
 0x8d0   :  { %v4299_v45 = vadd.f32 %v9187_v58, %v4214_v30  ;;  %v5861_v42 = vpop.eup %5860  ;;  %5866 = vrsqrt.f32 %v4083_v1  ;;  %v4124_v18 = vmul.f32 %v5857_v13, %v8852_v8  ;;  %v4128_v21 = vmul.f32 %v5859_v63, %v8868_v61  ;;  %v9978_v1 = vld [vmem:[#allocation16_spill] sm:$0xff] }
 0x8d1   :  { %v4207_v7 = vmul.f32 %v9182_v0, %v4122_v38  ;;  %4773 = vmatmul.mubr.bf16.gmra.mrb[96].mxu1 %v4346_v41  ;;  %v4349_v52 = vpack.c.bf16 %v4297_v53, %v4293_v6  ;;  %v4211_v3 = vmul.f32 %v9182_v0, %v4126_v33  ;;  %v4131_v28 = vmul.f32 %v5861_v42, %v8894_v23  ;;  %v9979_v38 = vld [vmem:[#allocation17_spill] sm:$0xff] }
 0x8d2   :  { %v5863_v24 = vpop.eup %5862  ;;  %v4032_v37 = vpop.xlane.xlu0 %4031  ;;  %v4351_v15 = vpack.c.bf16 %v4299_v45, %v4295_v27  ;;  %v4209_v22 = vmul.f32 %v9195_v55, %v4124_v18  ;;  %v4213_v5 = vmul.f32 %v9195_v55, %v4128_v21  ;;  %v4133_v39 = vmul.f32 %v5861_v42, %v8918_v19 }
 0x8d3   :  { %v4068_v62 = vmul.f32 0.001953125, %v4032_v37  ;;  %v4292_v46 = vadd.f32 %v9191_v56, %v4207_v7  ;;  %4683 = vmatprep.mubr.bf16.mxu0 %v4349_v52  ;;  %v4296_v61 = vadd.f32 %v9191_v56, %v4211_v3  ;;  %v4135_v13 = vmul.f32 %v5863_v24, %v8908_v11 }
 0x8d4   :  { %v4037_v17 = vpop.xlane.xlu1 %4036  ;;  %4780 = vmatprep.mubr.bf16.mxu1 %v4351_v15  ;;  %v4216_v63 = vmul.f32 %v9173_v12, %v4131_v28  ;;  %v4294_v23 = vadd.f32 %v9207_v60, %v4209_v22  ;;  %v4298_v9 = vadd.f32 %v9207_v60, %v4213_v5  ;;  %v4137_v57 = vmul.f32 %v5863_v24, %v8924_v59 }
 0x8d5   :  { %v4069_v8 = vmul.f32 0.001953125, %v4037_v17  ;;  %v4084_v34 = vadd.f32 1e-05, %v4068_v62  ;;  %v4348_v29 = vpack.c.bf16 %v4296_v61, %v4292_v46  ;;  %v4220_v36 = vmul.f32 %v9173_v12, %v4135_v13 }
 0x8d6   :  { %v4301_v4 = vadd.f32 %v9179_v48, %v4216_v63  ;;  %v4350_v47 = vpack.c.bf16 %v4298_v9, %v4294_v23  ;;  %v4218_v11 = vmul.f32 %v9176_v54, %v4133_v39  ;;  %v4130_v44 = vmul.f32 %v5861_v42, %v8890_v51  ;;  %v9980_v23 = vld [vmem:[#allocation15_spill] sm:$0xff] }
 0x8d7   :  { %v4085_v32 = vadd.f32 1e-05, %v4069_v8  ;;  %5868 = vrsqrt.f32 %v4084_v34  ;;  %4684 = vmatmul.mubr.bf16.gmra.mrb[92].mxu0 %v4348_v29  ;;  %v4305_v35 = vadd.f32 %v9179_v48, %v4220_v36  ;;  %v4134_v19 = vmul.f32 %v5863_v24, %v8904_v2  ;;  %v9981_v39 = vld [vmem:[#allocation19_spill] sm:$0xff] }
 0x8d8   :  { %v5865_v10 = vpop.eup %5864  ;;  %v4222_v6 = vmul.f32 %v9176_v54, %v4137_v57  ;;  %v4303_v30 = vadd.f32 %v9187_v58, %v4218_v11  ;;  %v4132_v27 = vmul.f32 %v5861_v42, %v9978_v1  ;;  %v4136_v41 = vmul.f32 %v5863_v24, %v9979_v38 }
 0x8d9   :  { %5870 = vrsqrt.f32 %v4085_v32  ;;  %4781 = vmatmul.mubr.bf16.gmra.mrb[100].mxu1 %v4350_v47  ;;  %v4353_v53 = vpack.c.bf16 %v4305_v35, %v4301_v4  ;;  %v4215_v45 = vmul.f32 %v9182_v0, %v4130_v44  ;;  %v4219_v33 = vmul.f32 %v9182_v0, %v4134_v19  ;;  %v9982_v47 = vld [vmem:[#allocation18_spill] sm:$0xff]  ;;  %v9983_v19 = vld [vmem:[#allocation31_spill] sm:$0xff] }
 0x8da   :  { %v4139_v51 = vmul.f32 %v5865_v10, %v8956_v40  ;;  %v5867_v7 = vpop.eup %5866  ;;  %v4307_v18 = vadd.f32 %v9187_v58, %v4222_v6  ;;  %v4217_v21 = vmul.f32 %v9195_v55, %v4132_v27  ;;  %v4221_v37 = vmul.f32 %v9195_v55, %v4136_v41 }
 0x8db   :  { %v4042_v59 = vpop.xlane.xlu0 %4041  ;;  %4691 = vmatprep.mubr.bf16.mxu0 %v4353_v53  ;;  %v4300_v24 = vadd.f32 %v9191_v56, %v4215_v45  ;;  %v4304_v52 = vadd.f32 %v9191_v56, %v4219_v33  ;;  %v4143_v15 = vmul.f32 %v5867_v7, %v8972_v50  ;;  %v4141_v13 = vmul.f32 %v5865_v10, %v8980_v49 }
 0x8dc   :  { %v4070_v2 = vmul.f32 0.001953125, %v4042_v59  ;;  %v4224_v3 = vmul.f32 %v9173_v12, %v4139_v51  ;;  %v4355_v62 = vpack.c.bf16 %v4307_v18, %v4303_v30  ;;  %v4302_v17 = vadd.f32 %v9207_v60, %v4217_v21 }
 0x8dd   :  { %v4047_v42 = vpop.xlane.xlu1 %4046  ;;  %v4352_v46 = vpack.c.bf16 %v4304_v52, %v4300_v24  ;;  %v4306_v22 = vadd.f32 %v9207_v60, %v4221_v37  ;;  %v4228_v5 = vmul.f32 %v9173_v12, %v4143_v15  ;;  %v4145_v50 = vmul.f32 %v5867_v7, %v8986_v31  ;;  %v9985_v24 = vld [vmem:[#allocation22_spill] sm:$0xff] }
 0x8de   :  { %v4086_v28 = vadd.f32 1e-05, %v4070_v2  ;;  %v4071_v40 = vmul.f32 0.001953125, %v4047_v42  ;;  %v4309_v8 = vadd.f32 %v9179_v48, %v4224_v3  ;;  %4788 = vmatprep.mubr.bf16.mxu1 %v4355_v62  ;;  %v4138_v9 = vmul.f32 %v5865_v10, %v9980_v23  ;;  %v9984_v2 = vld [vmem:[#allocation30_spill] sm:$0xff]  ;;  %v9986_v3 = vld [vmem:[#allocation27_spill] sm:$0xff] }
 0x8df   :  { %4692 = vmatmul.mubr.bf16.gmra.mrb[96].mxu0 %v4352_v46  ;;  %v4354_v63 = vpack.c.bf16 %v4306_v22, %v4302_v17  ;;  %v4313_v34 = vadd.f32 %v9179_v48, %v4228_v5  ;;  %v4142_v32 = vmul.f32 %v5867_v7, %v9981_v39  ;;  %v4226_v36 = vmul.f32 %v9176_v54, %v4141_v13  ;;  %v9988_v22 = vld [vmem:[#allocation20_spill] sm:$0xff]  ;;  %v9990_v39 = vld [vmem:[#allocation23_spill] sm:$0xff] }
 0x8e0   :  { %5872 = vrsqrt.f32 %v4086_v28  ;;  %v4087_v61 = vadd.f32 1e-05, %v4071_v40  ;;  %v4230_v4 = vmul.f32 %v9176_v54, %v4145_v50  ;;  %v4140_v57 = vmul.f32 %v5865_v10, %v9982_v47  ;;  %v9987_v40 = vld [vmem:[#allocation25_spill] sm:$0xff] }
 0x8e1   :  { %v5869_v29 = vpop.eup %5868  ;;  %4789 = vmatmul.mubr.bf16.gmra.mrb[104].mxu1 %v4354_v63  ;;  %v4052_v49 = vpop.xlane.xlu0 %4051  ;;  %v4357_v31 = vpack.c.bf16 %v4313_v34, %v4309_v8  ;;  %v4223_v35 = vmul.f32 %v9182_v0, %v4138_v9  ;;  %v4227_v44 = vmul.f32 %v9182_v0, %v4142_v32  ;;  %v4144_v6 = vmul.f32 %v5867_v7, %v9983_v19  ;;  %v9989_v63 = vld [vmem:[#allocation29_spill] sm:$0xff] }
 0x8e2   :  { %5874 = vrsqrt.f32 %v4087_v61  ;;  %v4072_v30 = vmul.f32 0.001953125, %v4052_v49  ;;  %v4311_v27 = vadd.f32 %v9187_v58, %v4226_v36  ;;  %v4315_v38 = vadd.f32 %v9187_v58, %v4230_v4  ;;  %v9991_v36 = vld [vmem:[#allocation28_spill] sm:$0xff] }
 0x8e3   :  { %v5871_v11 = vpop.eup %5870  ;;  %v4225_v41 = vmul.f32 %v9195_v55, %v4140_v57  ;;  %4699 = vmatprep.mubr.bf16.mxu0 %v4357_v31  ;;  %v4308_v10 = vadd.f32 %v9191_v56, %v4223_v35  ;;  %v4312_v53 = vadd.f32 %v9191_v56, %v4227_v44  ;;  %v4229_v45 = vmul.f32 %v9195_v55, %v4144_v6 }
 0x8e4   :  { %v4057_v1 = vpop.xlane.xlu1 %4056  ;;  %v4088_v33 = vadd.f32 1e-05, %v4072_v30  ;;  %v4359_v51 = vpack.c.bf16 %v4315_v38, %v4311_v27  ;;  %v4147_v18 = vmul.f32 %v5869_v29, %v9984_v2  ;;  %v4151_v52 = vmul.f32 %v5871_v11, %v9985_v24 }
 0x8e5   :  { %v4073_v59 = vmul.f32 0.001953125, %v4057_v1  ;;  %v4310_v7 = vadd.f32 %v9207_v60, %v4225_v41  ;;  %v4356_v37 = vpack.c.bf16 %v4312_v53, %v4308_v10  ;;  %v4314_v42 = vadd.f32 %v9207_v60, %v4229_v45 }
 0x8e6   :  { %5876 = vrsqrt.f32 %v4088_v33  ;;  %4796 = vmatprep.mubr.bf16.mxu1 %v4359_v51  ;;  %v4232_v15 = vmul.f32 %v9173_v12, %v4147_v18  ;;  %v4149_v28 = vmul.f32 %v5869_v29, %v9986_v3  ;;  %v4153_v62 = vmul.f32 %v5871_v11, %v9987_v40 }
 0x8e7   :  { %v4089_v21 = vadd.f32 1e-05, %v4073_v59  ;;  %4700 = vmatmul.mubr.bf16.gmra.mrb[100].mxu0 %v4356_v37  ;;  %v4358_v17 = vpack.c.bf16 %v4314_v42, %v4310_v7  ;;  %v4236_v46 = vmul.f32 %v9173_v12, %v4151_v52  ;;  %v4146_v5 = vmul.f32 %v5869_v29, %v9988_v22  ;;  %v9993_v42 = vld [vmem:[#allocation7_spill] sm:$0xff] }
 0x8e8   :  { %v4317_v61 = vadd.f32 %v9179_v48, %v4232_v15  ;;  %v4234_v13 = vmul.f32 %v9176_v54, %v4149_v28  ;;  %v4238_v50 = vmul.f32 %v9176_v54, %v4153_v62  ;;  %v4150_v34 = vmul.f32 %v5871_v11, %v9989_v63  ;;  %v9994_v28 = vld [vmem:[#allocation8_spill] sm:$0xff] }
 0x8e9   :  { %5878 = vrsqrt.f32 %v4089_v21  ;;  %4797 = vmatmul.mubr.bf16.gmra.mrb[108].mxu1 %v4358_v17  ;;  %v4321_v23 = vadd.f32 %v9179_v48, %v4236_v46  ;;  %v4231_v9 = vmul.f32 %v9182_v0, %v4146_v5  ;;  %v4148_v32 = vmul.f32 %v5869_v29, %v9990_v39  ;;  %v9992_v21 = vld [vmem:[#allocation24_spill] sm:$0xff] }
 0x8ea   :  { %v5873_v8 = vpop.eup %5872  ;;  %v4152_v4 = vmul.f32 %v5871_v11, %v9991_v36  ;;  %v4319_v57 = vadd.f32 %v9187_v58, %v4234_v13  ;;  %v4323_v49 = vadd.f32 %v9187_v58, %v4238_v50  ;;  %v4235_v31 = vmul.f32 %v9182_v0, %v4150_v34  ;;  %v9996_v34 = vld [vmem:[#allocation32_spill] sm:$0xff] }
 0x8eb   :  { %v4155_v35 = vmul.f32 %v5873_v8, %v9076_v43  ;;  %v4361_v44 = vpack.c.bf16 %v4321_v23, %v4317_v61  ;;  %v4316_v19 = vadd.f32 %v9191_v56, %v4231_v9  ;;  %v4233_v6 = vmul.f32 %v9195_v55, %v4148_v32  ;;  %v9997_v9 = vld [vmem:[#allocation33_spill] sm:$0xff] }
 0x8ec   :  { %v5875_v47 = vpop.eup %5874  ;;  %v4237_v30 = vmul.f32 %v9195_v55, %v4152_v4  ;;  %v4363_v1 = vpack.c.bf16 %v4323_v49, %v4319_v57  ;;  %v4320_v29 = vadd.f32 %v9191_v56, %v4235_v31  ;;  %v4157_v43 = vmul.f32 %v5873_v8, %v9100_v14 }
 0x8ed   :  { %v4159_v11 = vmul.f32 %v5875_v47, %v9092_v25  ;;  %v4240_v27 = vmul.f32 %v9173_v12, %v4155_v35  ;;  %4707 = vmatprep.mubr.bf16.mxu0 %v4361_v44  ;;  %v4318_v38 = vadd.f32 %v9207_v60, %v4233_v6  ;;  %v4161_v59 = vmul.f32 %v5875_v47, %v9106_v20  ;;  %v9999_v44 = vld [vmem:[#allocation6_spill] sm:$0xff] }
 0x8ee   :  { %v4322_v41 = vadd.f32 %v9207_v60, %v4237_v30  ;;  %4804 = vmatprep.mubr.bf16.mxu1 %v4363_v1  ;;  %v4360_v10 = vpack.c.bf16 %v4320_v29, %v4316_v19  ;;  %v4154_v33 = vmul.f32 %v5873_v8, %v9072_v26  ;;  %v4242_v51 = vmul.f32 %v9176_v54, %v4157_v43  ;;  %v10000_v1 = vld [vmem:[#allocation14_spill] sm:$0xff] }
 0x8ef   :  { %v4244_v53 = vmul.f32 %v9173_v12, %v4159_v11  ;;  %v4325_v45 = vadd.f32 %v9179_v48, %v4240_v27  ;;  %v4246_v7 = vmul.f32 %v9176_v54, %v4161_v59  ;;  %v4158_v2 = vmul.f32 %v5875_v47, %v9088_v16  ;;  %v10001_v11 = vld [vmem:[#allocation11_spill] sm:$0xff] }
 0x8f0   :  { %v4362_v25 = vpack.c.bf16 %v4322_v41, %v4318_v38  ;;  %v5877_v18 = vpop.eup %5876  ;;  %4708 = vmatmul.mubr.bf16.gmra.mrb[104].mxu0 %v4360_v10  ;;  %v4239_v20 = vmul.f32 %v9182_v0, %v4154_v33  ;;  %v4156_v37 = vmul.f32 %v5873_v8, %v9992_v21  ;;  %v4160_v24 = vmul.f32 %v5875_v47, %v9993_v42  ;;  %v9995_v8 = vld [vmem:[#allocation26_spill] sm:$0xff] }
 0x8f1   :  { %v4329_v14 = vadd.f32 %v9179_v48, %v4244_v53  ;;  %v4327_v26 = vadd.f32 %v9187_v58, %v4242_v51  ;;  %v4331_v15 = vadd.f32 %v9187_v58, %v4246_v7  ;;  %v4243_v3 = vmul.f32 %v9182_v0, %v4158_v2  ;;  %v9998_v47 = vld [vmem:[#allocation10_spill] sm:$0xff] }
 0x8f2   :  { %4805 = vmatmul.mubr.bf16.gmra.mrb[112].mxu1 %v4362_v25  ;;  %v4163_v16 = vmul.f32 %v5877_v18, %v9994_v28  ;;  %v4324_v62 = vadd.f32 %v9191_v56, %v4239_v20  ;;  %v4241_v17 = vmul.f32 %v9195_v55, %v4156_v37  ;;  %v4245_v46 = vmul.f32 %v9195_v55, %v4160_v24 }
 0x8f3   :  { %v5879_v52 = vpop.eup %5878  ;;  %v4365_v40 = vpack.c.bf16 %v4329_v14, %v4325_v45  ;;  %v4367_v22 = vpack.c.bf16 %v4331_v15, %v4327_v26  ;;  %v4328_v5 = vadd.f32 %v9191_v56, %v4243_v3  ;;  %v4165_v23 = vmul.f32 %v5877_v18, %v9996_v34 }
 0x8f4   :  { %v4167_v61 = vmul.f32 %v5879_v52, %v9995_v8  ;;  %v4248_v13 = vmul.f32 %v9173_v12, %v4163_v16  ;;  %v4326_v50 = vadd.f32 %v9207_v60, %v4241_v17  ;;  %v4330_v63 = vadd.f32 %v9207_v60, %v4245_v46 }
 0x8f5   :  { %4715 = vmatprep.mubr.bf16.mxu0 %v4365_v40  ;;  %v4169_v39 = vmul.f32 %v5879_v52, %v9997_v9  ;;  %4812 = vmatprep.mubr.bf16.mxu1 %v4367_v22  ;;  %v4364_v32 = vpack.c.bf16 %v4328_v5, %v4324_v62  ;;  %v4162_v57 = vmul.f32 %v5877_v18, %v9998_v47 }
 0x8f6   :  { %v4252_v36 = vmul.f32 %v9173_v12, %v4167_v61  ;;  %v4333_v4 = vadd.f32 %v9179_v48, %v4248_v13  ;;  %v4366_v49 = vpack.c.bf16 %v4330_v63, %v4326_v50  ;;  %v4250_v31 = vmul.f32 %v9176_v54, %v4165_v23 }
 0x8f7   :  { %v4254_v35 = vmul.f32 %v9176_v54, %v4169_v39  ;;  %v4166_v19 = vmul.f32 %v5879_v52, %v9999_v44  ;;  %v4247_v30 = vmul.f32 %v9182_v0, %v4162_v57  ;;  %v4164_v29 = vmul.f32 %v5877_v18, %v10000_v1 }
 0x8f8   :  { %v4337_v6 = vadd.f32 %v9179_v48, %v4252_v36  ;;  %v4168_v27 = vmul.f32 %v5879_v52, %v10001_v11  ;;  %4716 = vmatmul.mubr.bf16.gmra.mrb[108].mxu0 %v4364_v32  ;;  %v4335_v12 = vadd.f32 %v9187_v58, %v4250_v31 }
 0x8f9   :  { %v4339_v38 = vadd.f32 %v9187_v58, %v4254_v35  ;;  %v4251_v41 = vmul.f32 %v9182_v0, %v4166_v19  ;;  %v4249_v54 = vmul.f32 %v9195_v55, %v4164_v29  ;;  %v4332_v10 = vadd.f32 %v9191_v56, %v4247_v30 }
 0x8fa   :  { %4813 = vmatmul.mubr.bf16.gmra.mrb[116].mxu1 %v4366_v49  ;;  %v4369_v43 = vpack.c.bf16 %v4337_v6, %v4333_v4  ;;  %v4253_v59 = vmul.f32 %v9195_v55, %v4168_v27  ;;  %v9391_v55 = vld [vmem:[%s9459_s8 + $0x1f] ss:$0 sm:$0xff] }
 0x8fb   :  { %v4371_v48 = vpack.c.bf16 %v4339_v38, %v4335_v12  ;;  %v4336_v53 = vadd.f32 %v9191_v56, %v4251_v41  ;;  %v4334_v45 = vadd.f32 %v9207_v60, %v4249_v54 }
 0x8fc   :  { %4723 = vmatprep.mubr.bf16.mxu0 %v4369_v43  ;;  %v4338_v33 = vadd.f32 %v9207_v60, %v4253_v59 }
 0x8fd   :  { %4820 = vmatprep.mubr.bf16.mxu1 %v4371_v48  ;;  %v4368_v58 = vpack.c.bf16 %v4336_v53, %v4332_v10 }
 0x8fe   :  { %v4370_v25 = vpack.c.bf16 %v4338_v33, %v4334_v45 }
 0x900   :  { %4724 = vmatmul.mubr.bf16.gmra.mrb[112].mxu0 %v4368_v58 }
 0x902   :  { %4821 = vmatmul.mubr.bf16.gmra.mrb[120].mxu1 %v4370_v25 }
 0x997   :  { %v5136_v0 = vpop.f32.mrb[84].mxu0 }
 0x998   :  { %v5137_v51 = vpop.f32.mrb[85].mxu0 }
 0x999   :  { %v5138_v7 = vadd.f32 %v5137_v51, %v5136_v0  ;;  %v5139_v2 = vpop.f32.mrb[86].mxu0 }
 0x99a   :  { %v5200_v56 = vpop.f32.mrb[92].mxu1  ;;  %v5140_v18 = vpop.f32.mrb[87].mxu0 }
 0x99b   :  { %v4670_v14 = vadd.f32 %v5138_v7, %v9391_v55  ;;  %v5201_v20 = vpop.f32.mrb[93].mxu1  ;;  %v5141_v60 = vadd.f32 %v5140_v18, %v5139_v2 }
 0x99c   :  { %v5202_v21 = vadd.f32 %v5201_v20, %v5200_v56  ;;  %v5203_v37 = vpop.f32.mrb[94].mxu1 }
 0x99d   :  { %v4673_v42 = vadd.f32 %v5141_v60, %v9391_v55  ;;  %v5204_v24 = vpop.f32.mrb[95].mxu1 }
 0x99e   :  { %v4767_v52 = vadd.f32 %v5202_v21, %v4670_v14  ;;  %v5205_v26 = vadd.f32 %v5204_v24, %v5203_v37 }
 0x9a0   :  { %4829 = vst [vmem:[%s9466_s9] sm:$0xff] %v4767_v52  ;;  %v4770_v15 = vadd.f32 %v5205_v26, %v4673_v42 }
 0x9a2   :  { %v5142_v3 = vpop.f32.mrb[88].mxu0  ;;  %4830 = vst [vmem:[%s9466_s9 + $0x8] sm:$0xff] %v4770_v15 }
 0x9a3   :  { %v5143_v28 = vpop.f32.mrb[89].mxu0 }
 0x9a4   :  { %v5144_v16 = vadd.f32 %v5143_v28, %v5142_v3  ;;  %v5145_v40 = vpop.f32.mrb[90].mxu0  ;;  %v5206_v62 = vpop.f32.mrb[96].mxu1 }
 0x9a5   :  { %v5146_v17 = vpop.f32.mrb[91].mxu0  ;;  %v5207_v22 = vpop.f32.mrb[97].mxu1 }
 0x9a6   :  { %v4678_v46 = vadd.f32 %v5144_v16, %v9391_v55  ;;  %v5147_v5 = vadd.f32 %v5146_v17, %v5145_v40  ;;  %v5208_v8 = vadd.f32 %v5207_v22, %v5206_v62  ;;  %v5209_v61 = vpop.f32.mrb[98].mxu1 }
 0x9a7   :  { %v5210_v50 = vpop.f32.mrb[99].mxu1 }
 0x9a8   :  { %v4681_v13 = vadd.f32 %v5147_v5, %v9391_v55  ;;  %v4775_v63 = vadd.f32 %v5208_v8, %v4678_v46  ;;  %v5211_v34 = vadd.f32 %v5210_v50, %v5209_v61 }
 0x9aa   :  { %4831 = vst [vmem:[%s9466_s9 + $0x10] sm:$0xff] %v4775_v63  ;;  %v4778_v23 = vadd.f32 %v5211_v34, %v4681_v13  ;;  %v5148_v9 = vpop.f32.mrb[92].mxu0 }
 0x9ab   :  { %v5149_v39 = vpop.f32.mrb[93].mxu0 }
 0x9ac   :  { %4832 = vst [vmem:[%s9466_s9 + $0x18] sm:$0xff] %v4778_v23  ;;  %v5212_v32 = vpop.f32.mrb[100].mxu1  ;;  %v5150_v36 = vadd.f32 %v5149_v39, %v5148_v9  ;;  %v5151_v4 = vpop.f32.mrb[94].mxu0 }
 0x9ad   :  { %v5213_v47 = vpop.f32.mrb[101].mxu1  ;;  %v5152_v57 = vpop.f32.mrb[95].mxu0 }
 0x9ae   :  { %v4686_v49 = vadd.f32 %v5150_v36, %v9391_v55  ;;  %v5214_v31 = vadd.f32 %v5213_v47, %v5212_v32  ;;  %v5215_v35 = vpop.f32.mrb[102].mxu1  ;;  %v5153_v44 = vadd.f32 %v5152_v57, %v5151_v4 }
 0x9af   :  { %v5216_v19 = vpop.f32.mrb[103].mxu1 }
 0x9b0   :  { %v4783_v6 = vadd.f32 %v5214_v31, %v4686_v49  ;;  %v4689_v30 = vadd.f32 %v5153_v44, %v9391_v55  ;;  %v5217_v1 = vadd.f32 %v5216_v19, %v5215_v35 }
 0x9b2   :  { %4833 = vst [vmem:[%s9466_s9 + $0x20] sm:$0xff] %v4783_v6  ;;  %v4786_v29 = vadd.f32 %v5217_v1, %v4689_v30  ;;  %v5154_v11 = vpop.f32.mrb[96].mxu0 }
 0x9b3   :  { %v5155_v27 = vpop.f32.mrb[97].mxu0 }
 0x9b4   :  { %4834 = vst [vmem:[%s9466_s9 + $0x28] sm:$0xff] %v4786_v29  ;;  %v5218_v12 = vpop.f32.mrb[104].mxu1  ;;  %v5156_v38 = vadd.f32 %v5155_v27, %v5154_v11  ;;  %v5157_v41 = vpop.f32.mrb[98].mxu0 }
 0x9b5   :  { %v5219_v43 = vpop.f32.mrb[105].mxu1  ;;  %v5158_v54 = vpop.f32.mrb[99].mxu0 }
 0x9b6   :  { %v4694_v59 = vadd.f32 %v5156_v38, %v9391_v55  ;;  %v5220_v48 = vadd.f32 %v5219_v43, %v5218_v12  ;;  %v5221_v10 = vpop.f32.mrb[106].mxu1  ;;  %v5159_v53 = vadd.f32 %v5158_v54, %v5157_v41 }
 0x9b7   :  { %v5222_v45 = vpop.f32.mrb[107].mxu1 }
 0x9b8   :  { %v4791_v33 = vadd.f32 %v5220_v48, %v4694_v59  ;;  %v4697_v58 = vadd.f32 %v5159_v53, %v9391_v55  ;;  %v5223_v25 = vadd.f32 %v5222_v45, %v5221_v10 }
 0x9ba   :  { %4835 = vst [vmem:[%s9466_s9 + $0x30] sm:$0xff] %v4791_v33  ;;  %v4794_v0 = vadd.f32 %v5223_v25, %v4697_v58  ;;  %v5160_v51 = vpop.f32.mrb[100].mxu0 }
 0x9bb   :  { %v5161_v7 = vpop.f32.mrb[101].mxu0 }
 0x9bc   :  { %4836 = vst [vmem:[%s9466_s9 + $0x38] sm:$0xff] %v4794_v0  ;;  %v5224_v2 = vpop.f32.mrb[108].mxu1  ;;  %v5162_v56 = vadd.f32 %v5161_v7, %v5160_v51  ;;  %v5163_v18 = vpop.f32.mrb[102].mxu0 }
 0x9bd   :  { %v5225_v14 = vpop.f32.mrb[109].mxu1  ;;  %v5164_v20 = vpop.f32.mrb[103].mxu0 }
 0x9be   :  { %v4702_v60 = vadd.f32 %v5162_v56, %v9391_v55  ;;  %v5226_v21 = vadd.f32 %v5225_v14, %v5224_v2  ;;  %v5227_v37 = vpop.f32.mrb[110].mxu1  ;;  %v5165_v42 = vadd.f32 %v5164_v20, %v5163_v18 }
 0x9bf   :  { %v5228_v24 = vpop.f32.mrb[111].mxu1 }
 0x9c0   :  { %v4799_v52 = vadd.f32 %v5226_v21, %v4702_v60  ;;  %v4705_v26 = vadd.f32 %v5165_v42, %v9391_v55  ;;  %v5229_v15 = vadd.f32 %v5228_v24, %v5227_v37 }
 0x9c2   :  { %4837 = vst [vmem:[%s9466_s9 + $0x40] sm:$0xff] %v4799_v52  ;;  %v4802_v3 = vadd.f32 %v5229_v15, %v4705_v26 }
 0x9c3   :  { %v5166_v28 = vpop.f32.mrb[104].mxu0 }
 0x9c4   :  { %4838 = vst [vmem:[%s9466_s9 + $0x48] sm:$0xff] %v4802_v3  ;;  %v5167_v40 = vpop.f32.mrb[105].mxu0 }
 0x9c5   :  { %v5230_v16 = vpop.f32.mrb[112].mxu1  ;;  %v5168_v62 = vadd.f32 %v5167_v40, %v5166_v28  ;;  %v5169_v46 = vpop.f32.mrb[106].mxu0 }
 0x9c6   :  { %v5231_v17 = vpop.f32.mrb[113].mxu1  ;;  %v5170_v8 = vpop.f32.mrb[107].mxu0 }
 0x9c7   :  { %v5232_v22 = vadd.f32 %v5231_v17, %v5230_v16  ;;  %v5233_v5 = vpop.f32.mrb[114].mxu1  ;;  %v4710_v61 = vadd.f32 %v5168_v62, %v9391_v55  ;;  %v5171_v13 = vadd.f32 %v5170_v8, %v5169_v46 }
 0x9c8   :  { %v5234_v50 = vpop.f32.mrb[115].mxu1 }
 0x9c9   :  { %v5235_v63 = vadd.f32 %v5234_v50, %v5233_v5  ;;  %v4807_v34 = vadd.f32 %v5232_v22, %v4710_v61  ;;  %v4713_v23 = vadd.f32 %v5171_v13, %v9391_v55 }
 0x9cb   :  { %4839 = vst [vmem:[%s9466_s9 + $0x50] sm:$0xff] %v4807_v34  ;;  %v4810_v9 = vadd.f32 %v5235_v63, %v4713_v23  ;;  %v5172_v39 = vpop.f32.mrb[108].mxu0 }
 0x9cc   :  { %v5173_v36 = vpop.f32.mrb[109].mxu0 }
 0x9cd   :  { %v5236_v32 = vpop.f32.mrb[116].mxu1  ;;  %4840 = vst [vmem:[%s9466_s9 + $0x58] sm:$0xff] %v4810_v9  ;;  %v5174_v4 = vadd.f32 %v5173_v36, %v5172_v39  ;;  %v5175_v57 = vpop.f32.mrb[110].mxu0 }
 0x9ce   :  { %v5237_v47 = vpop.f32.mrb[117].mxu1  ;;  %v5176_v35 = vpop.f32.mrb[111].mxu0 }
 0x9cf   :  { %v5238_v49 = vadd.f32 %v5237_v47, %v5236_v32  ;;  %v5239_v31 = vpop.f32.mrb[118].mxu1  ;;  %v4718_v44 = vadd.f32 %v5174_v4, %v9391_v55  ;;  %v5177_v19 = vadd.f32 %v5176_v35, %v5175_v57 }
 0x9d0   :  { %v5240_v6 = vpop.f32.mrb[119].mxu1 }
 0x9d1   :  { %v5241_v30 = vadd.f32 %v5240_v6, %v5239_v31  ;;  %v4815_v1 = vadd.f32 %v5238_v49, %v4718_v44  ;;  %v4721_v29 = vadd.f32 %v5177_v19, %v9391_v55 }
 0x9d3   :  { %4841 = vst [vmem:[%s9466_s9 + $0x60] sm:$0xff] %v4815_v1  ;;  %v4818_v11 = vadd.f32 %v5241_v30, %v4721_v29  ;;  %v5178_v27 = vpop.f32.mrb[112].mxu0 }
 0x9d4   :  { %v5179_v38 = vpop.f32.mrb[113].mxu0 }
 0x9d5   :  { %v5242_v12 = vpop.f32.mrb[120].mxu1  ;;  %4842 = vst [vmem:[%s9466_s9 + $0x68] sm:$0xff] %v4818_v11  ;;  %v5180_v41 = vadd.f32 %v5179_v38, %v5178_v27  ;;  %v5181_v54 = vpop.f32.mrb[114].mxu0 }
 0x9d6   :  { %v5243_v43 = vpop.f32.mrb[121].mxu1  ;;  %v5182_v10 = vpop.f32.mrb[115].mxu0 }
 0x9d7   :  { %v5244_v59 = vadd.f32 %v5243_v43, %v5242_v12  ;;  %v5245_v48 = vpop.f32.mrb[122].mxu1  ;;  %v4726_v53 = vadd.f32 %v5180_v41, %v9391_v55  ;;  %v5183_v45 = vadd.f32 %v5182_v10, %v5181_v54 }
 0x9d8   :  { %v5246_v33 = vpop.f32.mrb[123].mxu1 }
 0x9d9   :  { %v5247_v58 = vadd.f32 %v5246_v33, %v5245_v48  ;;  %v4823_v25 = vadd.f32 %v5244_v59, %v4726_v53  ;;  %v4729_v0 = vadd.f32 %v5183_v45, %v9391_v55 }
 0x9db   :  { %4843 = vst [vmem:[%s9466_s9 + $0x70] sm:$0xff] %v4823_v25  ;;  %v4826_v51 = vadd.f32 %v5247_v58, %v4729_v0 }
 0x9dd   :  { %4844 = vst [vmem:[%s9466_s9 + $0x78] sm:$0xff] %v4826_v51 }

</bundles_post_ra>
